<compile_context>
chip_gen: v7x
topology: tpu7x:2x2x1
jax: 0.10.0
libtpu: 0.0.40
codegen_flags: <defaults>
</compile_context>

<pallas_src>
import math
from functools import partial

import numpy as np
import jax
import jax.numpy as jnp
from jax.experimental import pallas as pl
from jax.experimental.pallas import tpu as pltpu

NUM_NODES = 32
NUM_HEADS = 4
EPS = 1e-5

EDGE_PAIRS = [[0, 1], [2, 3], [4, 5], [6, 7], [8, 9], [10, 11], [12, 13],
              [14, 15], [16, 17], [18, 19], [20, 21], [22, 23], [24, 25],
              [26, 27], [28, 29], [30, 31], [0, 2], [1, 3], [2, 4], [3, 5],
              [4, 6], [5, 7], [6, 8], [7, 9], [8, 10], [9, 11], [10, 12],
              [11, 13], [12, 14], [13, 15], [14, 16], [15, 17], [16, 18],
              [17, 19], [18, 20], [19, 21], [20, 22], [21, 23], [22, 24],
              [23, 25], [24, 26], [25, 27], [26, 28], [27, 29], [28, 30],
              [29, 31]]


# ----------------------------------------------------------------------------
# In-kernel math helpers
# ----------------------------------------------------------------------------
def _erf(x):
    # Abramowitz-Stegun 7.1.26 (|err| < 1.5e-7): reproduces PyTorch's exact-erf
    # GELU to ~fp32 precision with exp/mul only.
    a1, a2, a3 = 0.254829592, -0.284496736, 1.421413741
    a4, a5, pp = -1.453152027, 1.061405429, 0.3275911
    ax = jnp.abs(x)
    t = 1.0 / (1.0 + pp * ax)
    poly = t * (a1 + t * (a2 + t * (a3 + t * (a4 + t * a5))))
    y = 1.0 - poly * jnp.exp(-ax * ax)
    return jnp.where(x >= 0, y, -y)


def _gelu(x):
    # PyTorch F.gelu / nn.GELU() default: exact erf formulation.
    return 0.5 * x * (1.0 + _erf(x * 0.7071067811865476))


def _layernorm(x, gamma, beta):
    mu = jnp.mean(x, axis=-1, keepdims=True)
    var = jnp.mean((x - mu) ** 2, axis=-1, keepdims=True)
    return (x - mu) * jax.lax.rsqrt(var + EPS) * gamma + beta


# ----------------------------------------------------------------------------
# Fused forward kernel
# ----------------------------------------------------------------------------
def damgcn_kernel(x_ref, abd_ref, perm_ref, seg_ref, segt_ref,
                  w_in_ref, b_in_ref,
                  w_c1_ref, b_c1_ref, g1_ref, be1_ref,
                  w_c2_ref, b_c2_ref, g2_ref, be2_ref,
                  ca_iw_ref, ca_ib_ref, ca_ow_ref, ca_ob_ref, ln1g_ref, ln1b_ref,
                  fa_iw_ref, fa_ib_ref, fa_ow_ref, fa_ob_ref, ln2g_ref, ln2b_ref,
                  cl1w_ref, cl1b_ref, cl2w_ref, cl2b_ref,
                  o_ref):
    f32 = jnp.float32
    N = x_ref.shape[0]            # total nodes = batch_size * 32
    E = w_in_ref.shape[1]         # hidden dim
    L = NUM_NODES
    Bn = N // L                   # batch_size
    hd = E // NUM_HEADS
    scale = 1.0 / math.sqrt(hd)

    def dotf(u, v):
        return jnp.dot(u, v, preferred_element_type=f32)

    a_bd = abd_ref[...]           # (N, N) block-diagonal normalized adjacency
    seg = seg_ref[...]            # (E, H) head-segment indicator
    segt = segt_ref[...]          # (H, E) transposed indicator / head masks
    head_masks = [segt[h:h + 1, :] for h in range(NUM_HEADS)]   # (1, E) each

    def batchnorm(h, g, be):
        # Training-mode batch statistics over the node axis (biased variance).
        mu = jnp.mean(h, axis=0, keepdims=True)
        var = jnp.mean((h - mu) ** 2, axis=0, keepdims=True)
        return (h - mu) * jax.lax.rsqrt(var + EPS) * g + be

    # ---- GCN trunk (node order): single block-diag aggregation matmuls ------
    h = dotf(x_ref[...], w_in_ref[...]) + b_in_ref[...]
    h = dotf(a_bd, dotf(h, w_c1_ref[...])) + b_c1_ref[...]
    h = _gelu(batchnorm(h, g1_ref[...], be1_ref[...]))
    h = dotf(a_bd, dotf(h, w_c2_ref[...])) + b_c2_ref[...]
    h = _gelu(batchnorm(h, g2_ref[...], be2_ref[...]))

    # ---- relayout to attention order (torch view(32, bsz, H), flattened) ----
    # z[b*L + i] = h[i*Bn + b].  Done as a 0/1 matmul on the MXU (noise at this
    # size; perm is precomputed on the host).
    # TODO(synk): at large batch replace this O(N^2) permutation matmul with a
    # strided-DMA / grid-based relayout (first thing to blow v7x's 64 MiB VMEM).
    z = dotf(perm_ref[...], h)                            # (N, E)

    # ---- channel attention (seq = 32 positions, batch = Bn) + residual + LN1 -
    # Heads stacked along the row axis: one M=4*L=128 score matmul per sample.
    qkv = dotf(z, ca_iw_ref[...]) + ca_ib_ref[...]        # (N, 3E), K=E matmul
    ctx_blocks = []
    for b in range(Bn):
        qb = qkv[b * L:(b + 1) * L, 0 * E:1 * E]          # (L, E)
        kb = qkv[b * L:(b + 1) * L, 1 * E:2 * E]          # (L, E)
        vb = qkv[b * L:(b + 1) * L, 2 * E:3 * E]          # (L, E)
        q_stack = jnp.concatenate(
            [qb * (head_masks[hh] * scale) for hh in range(NUM_HEADS)],
            axis=0)                                       # (4L, E)
        s = jnp.einsum("qd,kd->qk", q_stack, kb,
                       preferred_element_type=f32)        # (4L, L): per-head rows
        m = jnp.max(s, axis=-1, keepdims=True)
        p = jnp.exp(s - m)
        p = p / jnp.sum(p, axis=-1, keepdims=True)
        o_stack = dotf(p, vb)                             # (4L, E)
        ctx_b = o_stack[0:L, :] * head_masks[0]
        for hh in range(1, NUM_HEADS):
            ctx_b = ctx_b + o_stack[hh * L:(hh + 1) * L, :] * head_masks[hh]
        ctx_blocks.append(ctx_b)                          # (L, E)
    ctx = ctx_blocks[0] if Bn == 1 else jnp.concatenate(ctx_blocks, axis=0)
    attn = dotf(ctx, ca_ow_ref[...]) + ca_ob_ref[...]
    z = _layernorm(z + attn, ln1g_ref[...], ln1b_ref[...])

    # ---- frequency attention (seq = Bn (tiny), batch = 32 positions) + LN2 ---
    # For each query block b, all key/value blocks are processed at once as a
    # stacked (Bn*L, E) operand: one segment-sum matmul for scores, VPU softmax
    # over the Bn seq positions, one head-broadcast matmul for the weights.
    # TODO(synk): switch the remaining O(Bn) Python unroll to lax.fori_loop /
    # a grid axis before batch grows large.
    qkv = dotf(z, fa_iw_ref[...]) + fa_ib_ref[...]        # (N, 3E)
    q_all = qkv[:, 0 * E:1 * E]
    k_all = qkv[:, 1 * E:2 * E]
    v_all = qkv[:, 2 * E:3 * E]
    fa_ow = fa_ow_ref[...]
    fa_ob = fa_ob_ref[...]
    y_blocks = []
    for b in range(Bn):
        qb = q_all[b * L:(b + 1) * L, :]                  # (L, E)
        qb_rep = qb if Bn == 1 else jnp.concatenate([qb] * Bn, axis=0)  # (N, E)
        sc = dotf(qb_rep * k_all, seg) * scale            # (N, H)
        sc3 = sc.reshape(Bn, L, NUM_HEADS)
        m = jnp.max(sc3, axis=0, keepdims=True)
        pe = jnp.exp(sc3 - m)
        pw = pe / jnp.sum(pe, axis=0, keepdims=True)      # (Bn, L, H)
        w_bcast = dotf(pw.reshape(N, NUM_HEADS), segt)    # (N, E) head weights
        o_b = jnp.sum((w_bcast * v_all).reshape(Bn, L, E), axis=0)  # (L, E)
        y_b = z[b * L:(b + 1) * L, :] + dotf(o_b, fa_ow) + fa_ob
        y_blocks.append(_layernorm(y_b, ln2g_ref[...], ln2b_ref[...]))

    # ---- mean over the 32 positions, classifier, log_softmax ----------------
    y3 = jnp.stack(y_blocks, axis=0)                      # (Bn, L, E)
    pooled = jnp.mean(y3, axis=1)                         # (Bn, E) sublane mean
    h1 = _gelu(dotf(pooled, cl1w_ref[...]) + cl1b_ref[...])
    logits = dotf(h1, cl2w_ref[...]) + cl2b_ref[...]
    mx = jnp.max(logits, axis=-1, keepdims=True)
    lse = mx + jnp.log(jnp.sum(jnp.exp(logits - mx), axis=-1, keepdims=True))
    o_ref[...] = logits - lse


# ----------------------------------------------------------------------------
# pallas_call wrapper (builds the tiny constant matrices on the host)
# ----------------------------------------------------------------------------
def damgcn_forward(x, a32, params):
    p = params
    N = x.shape[0]
    bsz = N // NUM_NODES
    E = p["w_in"].shape[1]
    hd = E // NUM_HEADS
    num_classes = p["cl2_w"].shape[1]

    # Block-diagonal GCN-normalized adjacency (one sample block per graph).
    a_bd = jnp.kron(jnp.eye(bsz, dtype=jnp.float32), a32.astype(jnp.float32))

    # Permutation taking node order (row = i*bsz + b, torch view(32,bsz,H)) to
    # attention order (row = b*32 + i): z[r] = h[(r%32)*bsz + r//32].
    rows = np.arange(N)
    perm_np = np.zeros((N, N), np.float32)
    perm_np[rows, (rows % NUM_NODES) * bsz + (rows // NUM_NODES)] = 1.0

    # Head-segment indicators: seg (E,H), segt (H,E) (segt rows double as the
    # per-head lane masks).
    seg_np = (np.arange(E)[:, None] // hd ==
              np.arange(NUM_HEADS)[None, :]).astype(np.float32)

    args = (x, a_bd, jnp.asarray(perm_np), jnp.asarray(seg_np),
            jnp.asarray(np.ascontiguousarray(seg_np.T)),
            p["w_in"], p["b_in"],
            p["w_c1"], p["b_c1"], p["bn1_g"], p["bn1_b"],
            p["w_c2"], p["b_c2"], p["bn2_g"], p["bn2_b"],
            p["ca_in_w"], p["ca_in_b"], p["ca_out_w"], p["ca_out_b"],
            p["ln1_g"], p["ln1_b"],
            p["fa_in_w"], p["fa_in_b"], p["fa_out_w"], p["fa_out_b"],
            p["ln2_g"], p["ln2_b"],
            p["cl1_w"], p["cl1_b"], p["cl2_w"], p["cl2_b"])
    vmem = pl.BlockSpec(memory_space=pltpu.MemorySpace.VMEM)
    # TODO(synk): on v7x add a batch grid (dimension_semantics=("parallel",))
    # once BatchNorm statistics are computed in a separate pass.
    return pl.pallas_call(
        damgcn_kernel,
        out_shape=jax.ShapeDtypeStruct((bsz, num_classes), jnp.float32),
        in_specs=[vmem] * len(args),
        out_specs=vmem,
        compiler_params=pltpu.CompilerParams(
            vmem_limit_bytes=32 * 1024 * 1024),
    )(*args)


# ----------------------------------------------------------------------------
# Host-side glue: adjacency + params + plain-JAX reference for self-check
# ----------------------------------------------------------------------------
def build_norm_adj_single(num_nodes=NUM_NODES):
    """32x32 GCN-normalized adjacency (self-loops, gcn_norm degree from dst).

    The batched graph is block-diagonal with this identical block per sample.
    """
    src = [s for s, t in EDGE_PAIRS] + list(range(num_nodes))
    dst = [t for s, t in EDGE_PAIRS] + list(range(num_nodes))
    deg = np.zeros(num_nodes, np.float64)
    np.add.at(deg, dst, 1.0)
    dinv = deg ** -0.5
    a = np.zeros((num_nodes, num_nodes), np.float64)
    for s, t in zip(src, dst):
        a[t, s] += dinv[s] * dinv[t]
    return jnp.asarray(a, dtype=jnp.float32)


def init_params(key, num_features, hidden, num_classes):
    ks = iter(jax.random.split(key, 32))

    def w(shape, scale=0.1):
        return (scale * jax.random.normal(next(ks), shape)).astype(jnp.float32)

    return {
        # Linear weights stored pre-transposed: [in, out]; vectors as [1, D].
        "w_in": w((num_features, hidden)), "b_in": w((1, hidden)),
        "w_c1": w((hidden, hidden)), "b_c1": w((1, hidden)),
        "bn1_g": 1.0 + w((1, hidden)), "bn1_b": w((1, hidden)),
        "w_c2": w((hidden, hidden)), "b_c2": w((1, hidden)),
        "bn2_g": 1.0 + w((1, hidden)), "bn2_b": w((1, hidden)),
        "ca_in_w": w((hidden, 3 * hidden)), "ca_in_b": w((1, 3 * hidden)),
        "ca_out_w": w((hidden, hidden)), "ca_out_b": w((1, hidden)),
        "ln1_g": 1.0 + w((1, hidden)), "ln1_b": w((1, hidden)),
        "fa_in_w": w((hidden, 3 * hidden)), "fa_in_b": w((1, 3 * hidden)),
        "fa_out_w": w((hidden, hidden)), "fa_out_b": w((1, hidden)),
        "ln2_g": 1.0 + w((1, hidden)), "ln2_b": w((1, hidden)),
        "cl1_w": w((hidden, hidden // 2)), "cl1_b": w((1, hidden // 2)),
        "cl2_w": w((hidden // 2, num_classes)), "cl2_b": w((1, num_classes)),
    }


def reference_forward(x, a32, p):
    """Plain-JAX reference mirroring the torch module (for self-checking)."""
    hp = jax.lax.Precision.HIGHEST
    dot = partial(jnp.dot, precision=hp)
    N = x.shape[0]
    bsz = N // NUM_NODES
    E = p["w_in"].shape[1]
    hd = E // NUM_HEADS

    def bn(h, g, be):
        mu = h.mean(0, keepdims=True)
        var = ((h - mu) ** 2).mean(0, keepdims=True)
        return (h - mu) * jax.lax.rsqrt(var + EPS) * g + be

    def gcn(h, w, b):
        hw = dot(h, w).reshape(bsz, NUM_NODES, E)
        agg = jnp.einsum("ij,bjk->bik", a32, hw, precision=hp)
        return agg.reshape(N, E) + b

    def ln(t, g, be):
        mu = t.mean(-1, keepdims=True)
        var = ((t - mu) ** 2).mean(-1, keepdims=True)
        return (t - mu) * jax.lax.rsqrt(var + EPS) * g + be

    def mha(t, iw, ib, ow, ob):      # t: (seq, batch, E), batch_first=False
        S, B, _ = t.shape
        qkv = (dot(t.reshape(S * B, E), iw) + ib).reshape(S, B, 3, NUM_HEADS, hd)
        q, k, v = (jnp.transpose(qkv[:, :, i], (1, 2, 0, 3)) for i in range(3))
        s = jnp.einsum("bhqd,bhkd->bhqk", q, k, precision=hp) / math.sqrt(hd)
        w = jax.nn.softmax(s, axis=-1)
        o = jnp.einsum("bhqk,bhkd->bhqd", w, v, precision=hp)
        o = jnp.transpose(o, (2, 0, 1, 3)).reshape(S * B, E)
        return (dot(o, ow) + ob).reshape(S, B, E)

    h = dot(x, p["w_in"]) + p["b_in"]
    h = _gelu(bn(gcn(h, p["w_c1"], p["b_c1"]), p["bn1_g"], p["bn1_b"]))
    h = _gelu(bn(gcn(h, p["w_c2"], p["b_c2"]), p["bn2_g"], p["bn2_b"]))
    xc = h.reshape(NUM_NODES, bsz, E)
    xc = ln(xc + mha(xc, p["ca_in_w"], p["ca_in_b"], p["ca_out_w"], p["ca_out_b"]),
            p["ln1_g"], p["ln1_b"])
    xf = jnp.transpose(xc, (1, 0, 2))
    xf = ln(xf + mha(xf, p["fa_in_w"], p["fa_in_b"], p["fa_out_w"], p["fa_out_b"]),
            p["ln2_g"], p["ln2_b"])
    pooled = xf.mean(axis=1)
    h1 = _gelu(dot(pooled, p["cl1_w"]) + p["cl1_b"])
    logits = dot(h1, p["cl2_w"]) + p["cl2_b"]
    return jax.nn.log_softmax(logits, axis=-1)


if __name__ == "__main__":
    num_features, hidden, num_classes = 5, 128, 2
    batch_size = 2                                  # N_total = 64 nodes

    key = jax.random.PRNGKey(0)
    kx, kp = jax.random.split(key)
    x = jax.random.normal(kx, (batch_size * NUM_NODES, num_features),
                          dtype=jnp.float32)
    a32 = build_norm_adj_single()
    params = init_params(kp, num_features, hidden, num_classes)

    fwd = jax.jit(damgcn_forward)
    out = fwd(x, a32, params)
    jax.block_until_ready(out)
    assert out.shape == (batch_size, num_classes)

    ref = reference_forward(x, a32, params)
    err = float(np.max(np.abs(np.asarray(out) - np.asarray(ref))))
    assert np.allclose(np.asarray(out), np.asarray(ref),
                       atol=2e-3, rtol=2e-3), f"max abs err {err}"
    print("KERNEL_OK")
</pallas_src>

<mosaic_0001>
module attributes {stable_mosaic.version = 11 : i64} {
  func.func @damgcn_kernel(%arg0: memref<64x5xf32, #tpu.memory_space<vmem>>, %arg1: memref<64x64xf32, #tpu.memory_space<vmem>>, %arg2: memref<64x64xf32, #tpu.memory_space<vmem>>, %arg3: memref<128x4xf32, #tpu.memory_space<vmem>>, %arg4: memref<4x128xf32, #tpu.memory_space<vmem>>, %arg5: memref<5x128xf32, #tpu.memory_space<vmem>>, %arg6: memref<1x128xf32, #tpu.memory_space<vmem>>, %arg7: memref<128x128xf32, #tpu.memory_space<vmem>>, %arg8: memref<1x128xf32, #tpu.memory_space<vmem>>, %arg9: memref<1x128xf32, #tpu.memory_space<vmem>>, %arg10: memref<1x128xf32, #tpu.memory_space<vmem>>, %arg11: memref<128x128xf32, #tpu.memory_space<vmem>>, %arg12: memref<1x128xf32, #tpu.memory_space<vmem>>, %arg13: memref<1x128xf32, #tpu.memory_space<vmem>>, %arg14: memref<1x128xf32, #tpu.memory_space<vmem>>, %arg15: memref<128x384xf32, #tpu.memory_space<vmem>>, %arg16: memref<1x384xf32, #tpu.memory_space<vmem>>, %arg17: memref<128x128xf32, #tpu.memory_space<vmem>>, %arg18: memref<1x128xf32, #tpu.memory_space<vmem>>, %arg19: memref<1x128xf32, #tpu.memory_space<vmem>>, %arg20: memref<1x128xf32, #tpu.memory_space<vmem>>, %arg21: memref<128x384xf32, #tpu.memory_space<vmem>>, %arg22: memref<1x384xf32, #tpu.memory_space<vmem>>, %arg23: memref<128x128xf32, #tpu.memory_space<vmem>>, %arg24: memref<1x128xf32, #tpu.memory_space<vmem>>, %arg25: memref<1x128xf32, #tpu.memory_space<vmem>>, %arg26: memref<1x128xf32, #tpu.memory_space<vmem>>, %arg27: memref<128x64xf32, #tpu.memory_space<vmem>>, %arg28: memref<1x64xf32, #tpu.memory_space<vmem>>, %arg29: memref<64x2xf32, #tpu.memory_space<vmem>>, %arg30: memref<1x2xf32, #tpu.memory_space<vmem>>, %arg31: memref<2x2xf32, #tpu.memory_space<vmem>>) attributes {dimension_semantics = [], scalar_prefetch = 0 : i64, scratch_operands = 0 : i64, tpu.core_type = #tpu.core_type<tc>} {
    %c0 = arith.constant 0 : index
    %c0_0 = arith.constant 0 : index
    %0 = vector.load %arg1[%c0, %c0_0] : memref<64x64xf32, #tpu.memory_space<vmem>>, vector<64x64xf32>
    %c0_1 = arith.constant 0 : index
    %c0_2 = arith.constant 0 : index
    %1 = vector.load %arg3[%c0_1, %c0_2] : memref<128x4xf32, #tpu.memory_space<vmem>>, vector<128x4xf32>
    %c0_3 = arith.constant 0 : index
    %c0_4 = arith.constant 0 : index
    %2 = vector.load %arg4[%c0_3, %c0_4] : memref<4x128xf32, #tpu.memory_space<vmem>>, vector<4x128xf32>
    %3 = vector.extract_strided_slice %2 {offsets = [0, 0], sizes = [1, 128], strides = [1, 1]} : vector<4x128xf32> to vector<1x128xf32>
    %4 = vector.extract_strided_slice %2 {offsets = [1, 0], sizes = [1, 128], strides = [1, 1]} : vector<4x128xf32> to vector<1x128xf32>
    %5 = vector.extract_strided_slice %2 {offsets = [2, 0], sizes = [1, 128], strides = [1, 1]} : vector<4x128xf32> to vector<1x128xf32>
    %6 = vector.extract_strided_slice %2 {offsets = [3, 0], sizes = [1, 128], strides = [1, 1]} : vector<4x128xf32> to vector<1x128xf32>
    %c0_5 = arith.constant 0 : index
    %c0_6 = arith.constant 0 : index
    %7 = vector.load %arg0[%c0_5, %c0_6] : memref<64x5xf32, #tpu.memory_space<vmem>>, vector<64x5xf32>
    %c0_7 = arith.constant 0 : index
    %c0_8 = arith.constant 0 : index
    %8 = vector.load %arg5[%c0_7, %c0_8] : memref<5x128xf32, #tpu.memory_space<vmem>>, vector<5x128xf32>
    %cst = arith.constant dense<0.000000e+00> : vector<64x128xf32>
    %9 = tpu.matmul %7, %8, %cst {dimension_numbers = #tpu.dot_dimension_numbers<[1], [0], [0], [1], [0, 0, 1, 1], [], []>} : vector<64x5xf32>, vector<5x128xf32>, vector<64x128xf32> -> vector<64x128xf32>
    %c0_9 = arith.constant 0 : index
    %c0_10 = arith.constant 0 : index
    %10 = vector.load %arg6[%c0_9, %c0_10] : memref<1x128xf32, #tpu.memory_space<vmem>>, vector<1x128xf32>
    %11 = vector.broadcast %10 : vector<1x128xf32> to vector<64x128xf32>
    %12 = arith.addf %9, %11 : vector<64x128xf32>
    %c0_11 = arith.constant 0 : index
    %c0_12 = arith.constant 0 : index
    %13 = vector.load %arg7[%c0_11, %c0_12] : memref<128x128xf32, #tpu.memory_space<vmem>>, vector<128x128xf32>
    %cst_13 = arith.constant dense<0.000000e+00> : vector<64x128xf32>
    %14 = tpu.matmul %12, %13, %cst_13 {dimension_numbers = #tpu.dot_dimension_numbers<[1], [0], [0], [1], [0, 0, 1, 1], [], []>} : vector<64x128xf32>, vector<128x128xf32>, vector<64x128xf32> -> vector<64x128xf32>
    %cst_14 = arith.constant dense<0.000000e+00> : vector<64x128xf32>
    %15 = tpu.matmul %0, %14, %cst_14 {dimension_numbers = #tpu.dot_dimension_numbers<[1], [0], [0], [1], [0, 0, 1, 1], [], []>} : vector<64x64xf32>, vector<64x128xf32>, vector<64x128xf32> -> vector<64x128xf32>
    %c0_15 = arith.constant 0 : index
    %c0_16 = arith.constant 0 : index
    %16 = vector.load %arg8[%c0_15, %c0_16] : memref<1x128xf32, #tpu.memory_space<vmem>>, vector<1x128xf32>
    %17 = vector.broadcast %16 : vector<1x128xf32> to vector<64x128xf32>
    %18 = arith.addf %15, %17 : vector<64x128xf32>
    %c0_17 = arith.constant 0 : index
    %c0_18 = arith.constant 0 : index
    %19 = vector.load %arg9[%c0_17, %c0_18] : memref<1x128xf32, #tpu.memory_space<vmem>>, vector<1x128xf32>
    %c0_19 = arith.constant 0 : index
    %c0_20 = arith.constant 0 : index
    %20 = vector.load %arg10[%c0_19, %c0_20] : memref<1x128xf32, #tpu.memory_space<vmem>>, vector<1x128xf32>
    %cst_21 = arith.constant dense<0.000000e+00> : vector<128xf32>
    %21 = vector.multi_reduction <add>, %18, %cst_21 [0] : vector<64x128xf32> to vector<128xf32>
    %22 = vector.shape_cast %21 : vector<128xf32> to vector<1x128xf32>
    %cst_22 = arith.constant 6.400000e+01 : f32
    %23 = vector.broadcast %cst_22 : f32 to vector<1x128xf32>
    %24 = arith.divf %22, %23 : vector<1x128xf32>
    %25 = vector.broadcast %24 : vector<1x128xf32> to vector<64x128xf32>
    %26 = arith.subf %18, %25 : vector<64x128xf32>
    %27 = arith.mulf %26, %26 : vector<64x128xf32>
    %cst_23 = arith.constant dense<0.000000e+00> : vector<128xf32>
    %28 = vector.multi_reduction <add>, %27, %cst_23 [0] : vector<64x128xf32> to vector<128xf32>
    %29 = vector.shape_cast %28 : vector<128xf32> to vector<1x128xf32>
    %cst_24 = arith.constant 6.400000e+01 : f32
    %30 = vector.broadcast %cst_24 : f32 to vector<1x128xf32>
    %31 = arith.divf %29, %30 : vector<1x128xf32>
    %32 = vector.broadcast %24 : vector<1x128xf32> to vector<64x128xf32>
    %33 = arith.subf %18, %32 : vector<64x128xf32>
    %cst_25 = arith.constant 9.99999974E-6 : f32
    %34 = vector.broadcast %cst_25 : f32 to vector<1x128xf32>
    %35 = arith.addf %31, %34 : vector<1x128xf32>
    %36 = math.rsqrt %35 : vector<1x128xf32>
    %37 = vector.broadcast %36 : vector<1x128xf32> to vector<64x128xf32>
    %38 = arith.mulf %33, %37 : vector<64x128xf32>
    %39 = vector.broadcast %19 : vector<1x128xf32> to vector<64x128xf32>
    %40 = arith.mulf %38, %39 : vector<64x128xf32>
    %41 = vector.broadcast %20 : vector<1x128xf32> to vector<64x128xf32>
    %42 = arith.addf %40, %41 : vector<64x128xf32>
    %cst_26 = arith.constant 5.000000e-01 : f32
    %43 = vector.broadcast %cst_26 : f32 to vector<64x128xf32>
    %44 = arith.mulf %43, %42 : vector<64x128xf32>
    %cst_27 = arith.constant 0.707106769 : f32
    %45 = vector.broadcast %cst_27 : f32 to vector<64x128xf32>
    %46 = arith.mulf %42, %45 : vector<64x128xf32>
    %47 = math.absf %46 : vector<64x128xf32>
    %cst_28 = arith.constant 0.327591091 : f32
    %48 = vector.broadcast %cst_28 : f32 to vector<64x128xf32>
    %49 = arith.mulf %48, %47 : vector<64x128xf32>
    %cst_29 = arith.constant 1.000000e+00 : f32
    %50 = vector.broadcast %cst_29 : f32 to vector<64x128xf32>
    %51 = arith.addf %50, %49 : vector<64x128xf32>
    %cst_30 = arith.constant 1.000000e+00 : f32
    %52 = vector.broadcast %cst_30 : f32 to vector<64x128xf32>
    %53 = arith.divf %52, %51 : vector<64x128xf32>
    %cst_31 = arith.constant 1.06140542 : f32
    %54 = vector.broadcast %cst_31 : f32 to vector<64x128xf32>
    %55 = arith.mulf %53, %54 : vector<64x128xf32>
    %cst_32 = arith.constant -1.45315206 : f32
    %56 = vector.broadcast %cst_32 : f32 to vector<64x128xf32>
    %57 = arith.addf %56, %55 : vector<64x128xf32>
    %58 = arith.mulf %53, %57 : vector<64x128xf32>
    %cst_33 = arith.constant 1.42141378 : f32
    %59 = vector.broadcast %cst_33 : f32 to vector<64x128xf32>
    %60 = arith.addf %59, %58 : vector<64x128xf32>
    %61 = arith.mulf %53, %60 : vector<64x128xf32>
    %cst_34 = arith.constant -0.284496725 : f32
    %62 = vector.broadcast %cst_34 : f32 to vector<64x128xf32>
    %63 = arith.addf %62, %61 : vector<64x128xf32>
    %64 = arith.mulf %53, %63 : vector<64x128xf32>
    %cst_35 = arith.constant 0.254829586 : f32
    %65 = vector.broadcast %cst_35 : f32 to vector<64x128xf32>
    %66 = arith.addf %65, %64 : vector<64x128xf32>
    %67 = arith.mulf %53, %66 : vector<64x128xf32>
    %cst_36 = arith.constant 0.000000e+00 : f32
    %68 = vector.broadcast %cst_36 : f32 to vector<64x128xf32>
    %69 = arith.subf %68, %47 : vector<64x128xf32>
    %70 = arith.mulf %69, %47 : vector<64x128xf32>
    %71 = math.exp %70 : vector<64x128xf32>
    %72 = arith.mulf %67, %71 : vector<64x128xf32>
    %cst_37 = arith.constant 1.000000e+00 : f32
    %73 = vector.broadcast %cst_37 : f32 to vector<64x128xf32>
    %74 = arith.subf %73, %72 : vector<64x128xf32>
    %cst_38 = arith.constant 0.000000e+00 : f32
    %75 = vector.broadcast %cst_38 : f32 to vector<64x128xf32>
    %76 = arith.cmpf oge, %46, %75 : vector<64x128xf32>
    %cst_39 = arith.constant 0.000000e+00 : f32
    %77 = vector.broadcast %cst_39 : f32 to vector<64x128xf32>
    %78 = arith.subf %77, %74 : vector<64x128xf32>
    %79 = arith.select %76, %74, %78 : vector<64x128xi1>, vector<64x128xf32>
    %cst_40 = arith.constant 1.000000e+00 : f32
    %80 = vector.broadcast %cst_40 : f32 to vector<64x128xf32>
    %81 = arith.addf %80, %79 : vector<64x128xf32>
    %82 = arith.mulf %44, %81 : vector<64x128xf32>
    %c0_41 = arith.constant 0 : index
    %c0_42 = arith.constant 0 : index
    %83 = vector.load %arg11[%c0_41, %c0_42] : memref<128x128xf32, #tpu.memory_space<vmem>>, vector<128x128xf32>
    %cst_43 = arith.constant dense<0.000000e+00> : vector<64x128xf32>
    %84 = tpu.matmul %82, %83, %cst_43 {dimension_numbers = #tpu.dot_dimension_numbers<[1], [0], [0], [1], [0, 0, 1, 1], [], []>} : vector<64x128xf32>, vector<128x128xf32>, vector<64x128xf32> -> vector<64x128xf32>
    %cst_44 = arith.constant dense<0.000000e+00> : vector<64x128xf32>
    %85 = tpu.matmul %0, %84, %cst_44 {dimension_numbers = #tpu.dot_dimension_numbers<[1], [0], [0], [1], [0, 0, 1, 1], [], []>} : vector<64x64xf32>, vector<64x128xf32>, vector<64x128xf32> -> vector<64x128xf32>
    %c0_45 = arith.constant 0 : index
    %c0_46 = arith.constant 0 : index
    %86 = vector.load %arg12[%c0_45, %c0_46] : memref<1x128xf32, #tpu.memory_space<vmem>>, vector<1x128xf32>
    %87 = vector.broadcast %86 : vector<1x128xf32> to vector<64x128xf32>
    %88 = arith.addf %85, %87 : vector<64x128xf32>
    %c0_47 = arith.constant 0 : index
    %c0_48 = arith.constant 0 : index
    %89 = vector.load %arg13[%c0_47, %c0_48] : memref<1x128xf32, #tpu.memory_space<vmem>>, vector<1x128xf32>
    %c0_49 = arith.constant 0 : index
    %c0_50 = arith.constant 0 : index
    %90 = vector.load %arg14[%c0_49, %c0_50] : memref<1x128xf32, #tpu.memory_space<vmem>>, vector<1x128xf32>
    %cst_51 = arith.constant dense<0.000000e+00> : vector<128xf32>
    %91 = vector.multi_reduction <add>, %88, %cst_51 [0] : vector<64x128xf32> to vector<128xf32>
    %92 = vector.shape_cast %91 : vector<128xf32> to vector<1x128xf32>
    %cst_52 = arith.constant 6.400000e+01 : f32
    %93 = vector.broadcast %cst_52 : f32 to vector<1x128xf32>
    %94 = arith.divf %92, %93 : vector<1x128xf32>
    %95 = vector.broadcast %94 : vector<1x128xf32> to vector<64x128xf32>
    %96 = arith.subf %88, %95 : vector<64x128xf32>
    %97 = arith.mulf %96, %96 : vector<64x128xf32>
    %cst_53 = arith.constant dense<0.000000e+00> : vector<128xf32>
    %98 = vector.multi_reduction <add>, %97, %cst_53 [0] : vector<64x128xf32> to vector<128xf32>
    %99 = vector.shape_cast %98 : vector<128xf32> to vector<1x128xf32>
    %cst_54 = arith.constant 6.400000e+01 : f32
    %100 = vector.broadcast %cst_54 : f32 to vector<1x128xf32>
    %101 = arith.divf %99, %100 : vector<1x128xf32>
    %102 = vector.broadcast %94 : vector<1x128xf32> to vector<64x128xf32>
    %103 = arith.subf %88, %102 : vector<64x128xf32>
    %cst_55 = arith.constant 9.99999974E-6 : f32
    %104 = vector.broadcast %cst_55 : f32 to vector<1x128xf32>
    %105 = arith.addf %101, %104 : vector<1x128xf32>
    %106 = math.rsqrt %105 : vector<1x128xf32>
    %107 = vector.broadcast %106 : vector<1x128xf32> to vector<64x128xf32>
    %108 = arith.mulf %103, %107 : vector<64x128xf32>
    %109 = vector.broadcast %89 : vector<1x128xf32> to vector<64x128xf32>
    %110 = arith.mulf %108, %109 : vector<64x128xf32>
    %111 = vector.broadcast %90 : vector<1x128xf32> to vector<64x128xf32>
    %112 = arith.addf %110, %111 : vector<64x128xf32>
    %cst_56 = arith.constant 5.000000e-01 : f32
    %113 = vector.broadcast %cst_56 : f32 to vector<64x128xf32>
    %114 = arith.mulf %113, %112 : vector<64x128xf32>
    %cst_57 = arith.constant 0.707106769 : f32
    %115 = vector.broadcast %cst_57 : f32 to vector<64x128xf32>
    %116 = arith.mulf %112, %115 : vector<64x128xf32>
    %117 = math.absf %116 : vector<64x128xf32>
    %cst_58 = arith.constant 0.327591091 : f32
    %118 = vector.broadcast %cst_58 : f32 to vector<64x128xf32>
    %119 = arith.mulf %118, %117 : vector<64x128xf32>
    %cst_59 = arith.constant 1.000000e+00 : f32
    %120 = vector.broadcast %cst_59 : f32 to vector<64x128xf32>
    %121 = arith.addf %120, %119 : vector<64x128xf32>
    %cst_60 = arith.constant 1.000000e+00 : f32
    %122 = vector.broadcast %cst_60 : f32 to vector<64x128xf32>
    %123 = arith.divf %122, %121 : vector<64x128xf32>
    %cst_61 = arith.constant 1.06140542 : f32
    %124 = vector.broadcast %cst_61 : f32 to vector<64x128xf32>
    %125 = arith.mulf %123, %124 : vector<64x128xf32>
    %cst_62 = arith.constant -1.45315206 : f32
    %126 = vector.broadcast %cst_62 : f32 to vector<64x128xf32>
    %127 = arith.addf %126, %125 : vector<64x128xf32>
    %128 = arith.mulf %123, %127 : vector<64x128xf32>
    %cst_63 = arith.constant 1.42141378 : f32
    %129 = vector.broadcast %cst_63 : f32 to vector<64x128xf32>
    %130 = arith.addf %129, %128 : vector<64x128xf32>
    %131 = arith.mulf %123, %130 : vector<64x128xf32>
    %cst_64 = arith.constant -0.284496725 : f32
    %132 = vector.broadcast %cst_64 : f32 to vector<64x128xf32>
    %133 = arith.addf %132, %131 : vector<64x128xf32>
    %134 = arith.mulf %123, %133 : vector<64x128xf32>
    %cst_65 = arith.constant 0.254829586 : f32
    %135 = vector.broadcast %cst_65 : f32 to vector<64x128xf32>
    %136 = arith.addf %135, %134 : vector<64x128xf32>
    %137 = arith.mulf %123, %136 : vector<64x128xf32>
    %cst_66 = arith.constant 0.000000e+00 : f32
    %138 = vector.broadcast %cst_66 : f32 to vector<64x128xf32>
    %139 = arith.subf %138, %117 : vector<64x128xf32>
    %140 = arith.mulf %139, %117 : vector<64x128xf32>
    %141 = math.exp %140 : vector<64x128xf32>
    %142 = arith.mulf %137, %141 : vector<64x128xf32>
    %cst_67 = arith.constant 1.000000e+00 : f32
    %143 = vector.broadcast %cst_67 : f32 to vector<64x128xf32>
    %144 = arith.subf %143, %142 : vector<64x128xf32>
    %cst_68 = arith.constant 0.000000e+00 : f32
    %145 = vector.broadcast %cst_68 : f32 to vector<64x128xf32>
    %146 = arith.cmpf oge, %116, %145 : vector<64x128xf32>
    %cst_69 = arith.constant 0.000000e+00 : f32
    %147 = vector.broadcast %cst_69 : f32 to vector<64x128xf32>
    %148 = arith.subf %147, %144 : vector<64x128xf32>
    %149 = arith.select %146, %144, %148 : vector<64x128xi1>, vector<64x128xf32>
    %cst_70 = arith.constant 1.000000e+00 : f32
    %150 = vector.broadcast %cst_70 : f32 to vector<64x128xf32>
    %151 = arith.addf %150, %149 : vector<64x128xf32>
    %152 = arith.mulf %114, %151 : vector<64x128xf32>
    %c0_71 = arith.constant 0 : index
    %c0_72 = arith.constant 0 : index
    %153 = vector.load %arg2[%c0_71, %c0_72] : memref<64x64xf32, #tpu.memory_space<vmem>>, vector<64x64xf32>
    %cst_73 = arith.constant dense<0.000000e+00> : vector<64x128xf32>
    %154 = tpu.matmul %153, %152, %cst_73 {dimension_numbers = #tpu.dot_dimension_numbers<[1], [0], [0], [1], [0, 0, 1, 1], [], []>} : vector<64x64xf32>, vector<64x128xf32>, vector<64x128xf32> -> vector<64x128xf32>
    %c0_74 = arith.constant 0 : index
    %c0_75 = arith.constant 0 : index
    %155 = vector.load %arg15[%c0_74, %c0_75] : memref<128x384xf32, #tpu.memory_space<vmem>>, vector<128x384xf32>
    %cst_76 = arith.constant dense<0.000000e+00> : vector<64x384xf32>
    %156 = tpu.matmul %154, %155, %cst_76 {dimension_numbers = #tpu.dot_dimension_numbers<[1], [0], [0], [1], [0, 0, 1, 1], [], []>} : vector<64x128xf32>, vector<128x384xf32>, vector<64x384xf32> -> vector<64x384xf32>
    %c0_77 = arith.constant 0 : index
    %c0_78 = arith.constant 0 : index
    %157 = vector.load %arg16[%c0_77, %c0_78] : memref<1x384xf32, #tpu.memory_space<vmem>>, vector<1x384xf32>
    %158 = vector.broadcast %157 : vector<1x384xf32> to vector<64x384xf32>
    %159 = arith.addf %156, %158 : vector<64x384xf32>
    %160 = vector.extract_strided_slice %159 {offsets = [0, 0], sizes = [32, 128], strides = [1, 1]} : vector<64x384xf32> to vector<32x128xf32>
    %161 = vector.extract_strided_slice %159 {offsets = [0, 128], sizes = [32, 128], strides = [1, 1]} : vector<64x384xf32> to vector<32x128xf32>
    %162 = vector.extract_strided_slice %159 {offsets = [0, 256], sizes = [32, 128], strides = [1, 1]} : vector<64x384xf32> to vector<32x128xf32>
    %cst_79 = arith.constant 0.176776692 : f32
    %163 = vector.broadcast %cst_79 : f32 to vector<1x128xf32>
    %164 = arith.mulf %3, %163 : vector<1x128xf32>
    %165 = vector.broadcast %164 : vector<1x128xf32> to vector<32x128xf32>
    %166 = arith.mulf %160, %165 : vector<32x128xf32>
    %cst_80 = arith.constant 0.176776692 : f32
    %167 = vector.broadcast %cst_80 : f32 to vector<1x128xf32>
    %168 = arith.mulf %4, %167 : vector<1x128xf32>
    %169 = vector.broadcast %168 : vector<1x128xf32> to vector<32x128xf32>
    %170 = arith.mulf %160, %169 : vector<32x128xf32>
    %cst_81 = arith.constant 0.176776692 : f32
    %171 = vector.broadcast %cst_81 : f32 to vector<1x128xf32>
    %172 = arith.mulf %5, %171 : vector<1x128xf32>
    %173 = vector.broadcast %172 : vector<1x128xf32> to vector<32x128xf32>
    %174 = arith.mulf %160, %173 : vector<32x128xf32>
    %cst_82 = arith.constant 0.176776692 : f32
    %175 = vector.broadcast %cst_82 : f32 to vector<1x128xf32>
    %176 = arith.mulf %6, %175 : vector<1x128xf32>
    %177 = vector.broadcast %176 : vector<1x128xf32> to vector<32x128xf32>
    %178 = arith.mulf %160, %177 : vector<32x128xf32>
    %179 = tpu.concatenate %166, %170, %174, %178 in 0 : vector<32x128xf32>, vector<32x128xf32>, vector<32x128xf32>, vector<32x128xf32> -> vector<128x128xf32>
    "tpu.trace_start"() <{level = 10 : i32, message = "qd,kd->qk"}> : () -> ()
    %cst_83 = arith.constant dense<0.000000e+00> : vector<128x32xf32>
    %180 = tpu.matmul %179, %161, %cst_83 {dimension_numbers = #tpu.dot_dimension_numbers<[1], [1], [0], [0], [0, 0, 1, 0], [], []>} : vector<128x128xf32>, vector<32x128xf32>, vector<128x32xf32> -> vector<128x32xf32>
    "tpu.trace_stop"() : () -> ()
    %cst_84 = arith.constant dense<0xFF800000> : vector<128xf32>
    %181 = vector.multi_reduction <maximumf>, %180, %cst_84 [1] : vector<128x32xf32> to vector<128xf32>
    %182 = vector.shape_cast %181 : vector<128xf32> to vector<128x1xf32>
    %183 = vector.broadcast %182 : vector<128x1xf32> to vector<128x32xf32>
    %184 = arith.subf %180, %183 : vector<128x32xf32>
    %185 = math.exp %184 : vector<128x32xf32>
    %cst_85 = arith.constant dense<0.000000e+00> : vector<128xf32>
    %186 = vector.multi_reduction <add>, %185, %cst_85 [1] : vector<128x32xf32> to vector<128xf32>
    %187 = vector.shape_cast %186 : vector<128xf32> to vector<128x1xf32>
    %188 = vector.broadcast %187 : vector<128x1xf32> to vector<128x32xf32>
    %189 = arith.divf %185, %188 : vector<128x32xf32>
    %cst_86 = arith.constant dense<0.000000e+00> : vector<128x128xf32>
    %190 = tpu.matmul %189, %162, %cst_86 {dimension_numbers = #tpu.dot_dimension_numbers<[1], [0], [0], [1], [0, 0, 1, 1], [], []>} : vector<128x32xf32>, vector<32x128xf32>, vector<128x128xf32> -> vector<128x128xf32>
    %191 = vector.extract_strided_slice %190 {offsets = [0, 0], sizes = [32, 128], strides = [1, 1]} : vector<128x128xf32> to vector<32x128xf32>
    %192 = vector.broadcast %3 : vector<1x128xf32> to vector<32x128xf32>
    %193 = arith.mulf %191, %192 : vector<32x128xf32>
    %194 = vector.extract_strided_slice %190 {offsets = [32, 0], sizes = [32, 128], strides = [1, 1]} : vector<128x128xf32> to vector<32x128xf32>
    %195 = vector.broadcast %4 : vector<1x128xf32> to vector<32x128xf32>
    %196 = arith.mulf %194, %195 : vector<32x128xf32>
    %197 = arith.addf %193, %196 : vector<32x128xf32>
    %198 = vector.extract_strided_slice %190 {offsets = [64, 0], sizes = [32, 128], strides = [1, 1]} : vector<128x128xf32> to vector<32x128xf32>
    %199 = vector.broadcast %5 : vector<1x128xf32> to vector<32x128xf32>
    %200 = arith.mulf %198, %199 : vector<32x128xf32>
    %201 = arith.addf %197, %200 : vector<32x128xf32>
    %202 = vector.extract_strided_slice %190 {offsets = [96, 0], sizes = [32, 128], strides = [1, 1]} : vector<128x128xf32> to vector<32x128xf32>
    %203 = vector.broadcast %6 : vector<1x128xf32> to vector<32x128xf32>
    %204 = arith.mulf %202, %203 : vector<32x128xf32>
    %205 = arith.addf %201, %204 : vector<32x128xf32>
    %206 = vector.extract_strided_slice %159 {offsets = [32, 0], sizes = [32, 128], strides = [1, 1]} : vector<64x384xf32> to vector<32x128xf32>
    %207 = vector.extract_strided_slice %159 {offsets = [32, 128], sizes = [32, 128], strides = [1, 1]} : vector<64x384xf32> to vector<32x128xf32>
    %208 = vector.extract_strided_slice %159 {offsets = [32, 256], sizes = [32, 128], strides = [1, 1]} : vector<64x384xf32> to vector<32x128xf32>
    %cst_87 = arith.constant 0.176776692 : f32
    %209 = vector.broadcast %cst_87 : f32 to vector<1x128xf32>
    %210 = arith.mulf %3, %209 : vector<1x128xf32>
    %211 = vector.broadcast %210 : vector<1x128xf32> to vector<32x128xf32>
    %212 = arith.mulf %206, %211 : vector<32x128xf32>
    %cst_88 = arith.constant 0.176776692 : f32
    %213 = vector.broadcast %cst_88 : f32 to vector<1x128xf32>
    %214 = arith.mulf %4, %213 : vector<1x128xf32>
    %215 = vector.broadcast %214 : vector<1x128xf32> to vector<32x128xf32>
    %216 = arith.mulf %206, %215 : vector<32x128xf32>
    %cst_89 = arith.constant 0.176776692 : f32
    %217 = vector.broadcast %cst_89 : f32 to vector<1x128xf32>
    %218 = arith.mulf %5, %217 : vector<1x128xf32>
    %219 = vector.broadcast %218 : vector<1x128xf32> to vector<32x128xf32>
    %220 = arith.mulf %206, %219 : vector<32x128xf32>
    %cst_90 = arith.constant 0.176776692 : f32
    %221 = vector.broadcast %cst_90 : f32 to vector<1x128xf32>
    %222 = arith.mulf %6, %221 : vector<1x128xf32>
    %223 = vector.broadcast %222 : vector<1x128xf32> to vector<32x128xf32>
    %224 = arith.mulf %206, %223 : vector<32x128xf32>
    %225 = tpu.concatenate %212, %216, %220, %224 in 0 : vector<32x128xf32>, vector<32x128xf32>, vector<32x128xf32>, vector<32x128xf32> -> vector<128x128xf32>
    "tpu.trace_start"() <{level = 10 : i32, message = "qd,kd->qk"}> : () -> ()
    %cst_91 = arith.constant dense<0.000000e+00> : vector<128x32xf32>
    %226 = tpu.matmul %225, %207, %cst_91 {dimension_numbers = #tpu.dot_dimension_numbers<[1], [1], [0], [0], [0, 0, 1, 0], [], []>} : vector<128x128xf32>, vector<32x128xf32>, vector<128x32xf32> -> vector<128x32xf32>
    "tpu.trace_stop"() : () -> ()
    %cst_92 = arith.constant dense<0xFF800000> : vector<128xf32>
    %227 = vector.multi_reduction <maximumf>, %226, %cst_92 [1] : vector<128x32xf32> to vector<128xf32>
    %228 = vector.shape_cast %227 : vector<128xf32> to vector<128x1xf32>
    %229 = vector.broadcast %228 : vector<128x1xf32> to vector<128x32xf32>
    %230 = arith.subf %226, %229 : vector<128x32xf32>
    %231 = math.exp %230 : vector<128x32xf32>
    %cst_93 = arith.constant dense<0.000000e+00> : vector<128xf32>
    %232 = vector.multi_reduction <add>, %231, %cst_93 [1] : vector<128x32xf32> to vector<128xf32>
    %233 = vector.shape_cast %232 : vector<128xf32> to vector<128x1xf32>
    %234 = vector.broadcast %233 : vector<128x1xf32> to vector<128x32xf32>
    %235 = arith.divf %231, %234 : vector<128x32xf32>
    %cst_94 = arith.constant dense<0.000000e+00> : vector<128x128xf32>
    %236 = tpu.matmul %235, %208, %cst_94 {dimension_numbers = #tpu.dot_dimension_numbers<[1], [0], [0], [1], [0, 0, 1, 1], [], []>} : vector<128x32xf32>, vector<32x128xf32>, vector<128x128xf32> -> vector<128x128xf32>
    %237 = vector.extract_strided_slice %236 {offsets = [0, 0], sizes = [32, 128], strides = [1, 1]} : vector<128x128xf32> to vector<32x128xf32>
    %238 = vector.broadcast %3 : vector<1x128xf32> to vector<32x128xf32>
    %239 = arith.mulf %237, %238 : vector<32x128xf32>
    %240 = vector.extract_strided_slice %236 {offsets = [32, 0], sizes = [32, 128], strides = [1, 1]} : vector<128x128xf32> to vector<32x128xf32>
    %241 = vector.broadcast %4 : vector<1x128xf32> to vector<32x128xf32>
    %242 = arith.mulf %240, %241 : vector<32x128xf32>
    %243 = arith.addf %239, %242 : vector<32x128xf32>
    %244 = vector.extract_strided_slice %236 {offsets = [64, 0], sizes = [32, 128], strides = [1, 1]} : vector<128x128xf32> to vector<32x128xf32>
    %245 = vector.broadcast %5 : vector<1x128xf32> to vector<32x128xf32>
    %246 = arith.mulf %244, %245 : vector<32x128xf32>
    %247 = arith.addf %243, %246 : vector<32x128xf32>
    %248 = vector.extract_strided_slice %236 {offsets = [96, 0], sizes = [32, 128], strides = [1, 1]} : vector<128x128xf32> to vector<32x128xf32>
    %249 = vector.broadcast %6 : vector<1x128xf32> to vector<32x128xf32>
    %250 = arith.mulf %248, %249 : vector<32x128xf32>
    %251 = arith.addf %247, %250 : vector<32x128xf32>
    %252 = tpu.concatenate %205, %251 in 0 : vector<32x128xf32>, vector<32x128xf32> -> vector<64x128xf32>
    %c0_95 = arith.constant 0 : index
    %c0_96 = arith.constant 0 : index
    %253 = vector.load %arg17[%c0_95, %c0_96] : memref<128x128xf32, #tpu.memory_space<vmem>>, vector<128x128xf32>
    %cst_97 = arith.constant dense<0.000000e+00> : vector<64x128xf32>
    %254 = tpu.matmul %252, %253, %cst_97 {dimension_numbers = #tpu.dot_dimension_numbers<[1], [0], [0], [1], [0, 0, 1, 1], [], []>} : vector<64x128xf32>, vector<128x128xf32>, vector<64x128xf32> -> vector<64x128xf32>
    %c0_98 = arith.constant 0 : index
    %c0_99 = arith.constant 0 : index
    %255 = vector.load %arg18[%c0_98, %c0_99] : memref<1x128xf32, #tpu.memory_space<vmem>>, vector<1x128xf32>
    %256 = vector.broadcast %255 : vector<1x128xf32> to vector<64x128xf32>
    %257 = arith.addf %254, %256 : vector<64x128xf32>
    %258 = arith.addf %154, %257 : vector<64x128xf32>
    %c0_100 = arith.constant 0 : index
    %c0_101 = arith.constant 0 : index
    %259 = vector.load %arg19[%c0_100, %c0_101] : memref<1x128xf32, #tpu.memory_space<vmem>>, vector<1x128xf32>
    %c0_102 = arith.constant 0 : index
    %c0_103 = arith.constant 0 : index
    %260 = vector.load %arg20[%c0_102, %c0_103] : memref<1x128xf32, #tpu.memory_space<vmem>>, vector<1x128xf32>
    %cst_104 = arith.constant dense<0.000000e+00> : vector<64xf32>
    %261 = vector.multi_reduction <add>, %258, %cst_104 [1] : vector<64x128xf32> to vector<64xf32>
    %262 = vector.shape_cast %261 : vector<64xf32> to vector<64x1xf32>
    %cst_105 = arith.constant 1.280000e+02 : f32
    %263 = vector.broadcast %cst_105 : f32 to vector<64x1xf32>
    %264 = arith.divf %262, %263 : vector<64x1xf32>
    %265 = vector.broadcast %264 : vector<64x1xf32> to vector<64x128xf32>
    %266 = arith.subf %258, %265 : vector<64x128xf32>
    %267 = arith.mulf %266, %266 : vector<64x128xf32>
    %cst_106 = arith.constant dense<0.000000e+00> : vector<64xf32>
    %268 = vector.multi_reduction <add>, %267, %cst_106 [1] : vector<64x128xf32> to vector<64xf32>
    %269 = vector.shape_cast %268 : vector<64xf32> to vector<64x1xf32>
    %cst_107 = arith.constant 1.280000e+02 : f32
    %270 = vector.broadcast %cst_107 : f32 to vector<64x1xf32>
    %271 = arith.divf %269, %270 : vector<64x1xf32>
    %272 = vector.broadcast %264 : vector<64x1xf32> to vector<64x128xf32>
    %273 = arith.subf %258, %272 : vector<64x128xf32>
    %cst_108 = arith.constant 9.99999974E-6 : f32
    %274 = vector.broadcast %cst_108 : f32 to vector<64x1xf32>
    %275 = arith.addf %271, %274 : vector<64x1xf32>
    %276 = math.rsqrt %275 : vector<64x1xf32>
    %277 = vector.broadcast %276 : vector<64x1xf32> to vector<64x128xf32>
    %278 = arith.mulf %273, %277 : vector<64x128xf32>
    %279 = vector.broadcast %259 : vector<1x128xf32> to vector<64x128xf32>
    %280 = arith.mulf %278, %279 : vector<64x128xf32>
    %281 = vector.broadcast %260 : vector<1x128xf32> to vector<64x128xf32>
    %282 = arith.addf %280, %281 : vector<64x128xf32>
    %c0_109 = arith.constant 0 : index
    %c0_110 = arith.constant 0 : index
    %283 = vector.load %arg21[%c0_109, %c0_110] : memref<128x384xf32, #tpu.memory_space<vmem>>, vector<128x384xf32>
    %cst_111 = arith.constant dense<0.000000e+00> : vector<64x384xf32>
    %284 = tpu.matmul %282, %283, %cst_111 {dimension_numbers = #tpu.dot_dimension_numbers<[1], [0], [0], [1], [0, 0, 1, 1], [], []>} : vector<64x128xf32>, vector<128x384xf32>, vector<64x384xf32> -> vector<64x384xf32>
    %c0_112 = arith.constant 0 : index
    %c0_113 = arith.constant 0 : index
    %285 = vector.load %arg22[%c0_112, %c0_113] : memref<1x384xf32, #tpu.memory_space<vmem>>, vector<1x384xf32>
    %286 = vector.broadcast %285 : vector<1x384xf32> to vector<64x384xf32>
    %287 = arith.addf %284, %286 : vector<64x384xf32>
    %288 = vector.extract_strided_slice %287 {offsets = [0, 0], sizes = [64, 128], strides = [1, 1]} : vector<64x384xf32> to vector<64x128xf32>
    %289 = vector.extract_strided_slice %287 {offsets = [0, 128], sizes = [64, 128], strides = [1, 1]} : vector<64x384xf32> to vector<64x128xf32>
    %290 = vector.extract_strided_slice %287 {offsets = [0, 256], sizes = [64, 128], strides = [1, 1]} : vector<64x384xf32> to vector<64x128xf32>
    %c0_114 = arith.constant 0 : index
    %c0_115 = arith.constant 0 : index
    %291 = vector.load %arg23[%c0_114, %c0_115] : memref<128x128xf32, #tpu.memory_space<vmem>>, vector<128x128xf32>
    %c0_116 = arith.constant 0 : index
    %c0_117 = arith.constant 0 : index
    %292 = vector.load %arg24[%c0_116, %c0_117] : memref<1x128xf32, #tpu.memory_space<vmem>>, vector<1x128xf32>
    %293 = vector.extract_strided_slice %288 {offsets = [0, 0], sizes = [32, 128], strides = [1, 1]} : vector<64x128xf32> to vector<32x128xf32>
    %294 = tpu.concatenate %293, %293 in 0 : vector<32x128xf32>, vector<32x128xf32> -> vector<64x128xf32>
    %295 = arith.mulf %294, %289 : vector<64x128xf32>
    %cst_118 = arith.constant dense<0.000000e+00> : vector<64x4xf32>
    %296 = tpu.matmul %295, %1, %cst_118 {dimension_numbers = #tpu.dot_dimension_numbers<[1], [0], [0], [1], [0, 0, 1, 1], [], []>} : vector<64x128xf32>, vector<128x4xf32>, vector<64x4xf32> -> vector<64x4xf32>
    %cst_119 = arith.constant 0.176776692 : f32
    %297 = vector.broadcast %cst_119 : f32 to vector<64x4xf32>
    %298 = arith.mulf %296, %297 : vector<64x4xf32>
    %299 = vector.shape_cast %298 : vector<64x4xf32> to vector<2x32x4xf32>
    %cst_120 = arith.constant dense<0xFF800000> : vector<32x4xf32>
    %300 = vector.multi_reduction <maximumf>, %299, %cst_120 [0] : vector<2x32x4xf32> to vector<32x4xf32>
    %301 = vector.shape_cast %300 : vector<32x4xf32> to vector<1x32x4xf32>
    %302 = vector.broadcast %301 : vector<1x32x4xf32> to vector<2x32x4xf32>
    %303 = arith.subf %299, %302 : vector<2x32x4xf32>
    %304 = math.exp %303 : vector<2x32x4xf32>
    %cst_121 = arith.constant dense<0.000000e+00> : vector<32x4xf32>
    %305 = vector.multi_reduction <add>, %304, %cst_121 [0] : vector<2x32x4xf32> to vector<32x4xf32>
    %306 = vector.shape_cast %305 : vector<32x4xf32> to vector<1x32x4xf32>
    %307 = vector.broadcast %306 : vector<1x32x4xf32> to vector<2x32x4xf32>
    %308 = arith.divf %304, %307 : vector<2x32x4xf32>
    %309 = vector.shape_cast %308 : vector<2x32x4xf32> to vector<64x4xf32>
    %cst_122 = arith.constant dense<0.000000e+00> : vector<64x128xf32>
    %310 = tpu.matmul %309, %2, %cst_122 {dimension_numbers = #tpu.dot_dimension_numbers<[1], [0], [0], [1], [0, 0, 1, 1], [], []>} : vector<64x4xf32>, vector<4x128xf32>, vector<64x128xf32> -> vector<64x128xf32>
    %311 = arith.mulf %310, %290 : vector<64x128xf32>
    %312 = vector.shape_cast %311 : vector<64x128xf32> to vector<2x32x128xf32>
    %cst_123 = arith.constant dense<0.000000e+00> : vector<32x128xf32>
    %313 = vector.multi_reduction <add>, %312, %cst_123 [0] : vector<2x32x128xf32> to vector<32x128xf32>
    %314 = vector.extract_strided_slice %282 {offsets = [0, 0], sizes = [32, 128], strides = [1, 1]} : vector<64x128xf32> to vector<32x128xf32>
    %cst_124 = arith.constant dense<0.000000e+00> : vector<32x128xf32>
    %315 = tpu.matmul %313, %291, %cst_124 {dimension_numbers = #tpu.dot_dimension_numbers<[1], [0], [0], [1], [0, 0, 1, 1], [], []>} : vector<32x128xf32>, vector<128x128xf32>, vector<32x128xf32> -> vector<32x128xf32>
    %316 = arith.addf %314, %315 : vector<32x128xf32>
    %317 = vector.broadcast %292 : vector<1x128xf32> to vector<32x128xf32>
    %318 = arith.addf %316, %317 : vector<32x128xf32>
    %c0_125 = arith.constant 0 : index
    %c0_126 = arith.constant 0 : index
    %319 = vector.load %arg25[%c0_125, %c0_126] : memref<1x128xf32, #tpu.memory_space<vmem>>, vector<1x128xf32>
    %c0_127 = arith.constant 0 : index
    %c0_128 = arith.constant 0 : index
    %320 = vector.load %arg26[%c0_127, %c0_128] : memref<1x128xf32, #tpu.memory_space<vmem>>, vector<1x128xf32>
    %cst_129 = arith.constant dense<0.000000e+00> : vector<32xf32>
    %321 = vector.multi_reduction <add>, %318, %cst_129 [1] : vector<32x128xf32> to vector<32xf32>
    %322 = vector.shape_cast %321 : vector<32xf32> to vector<32x1xf32>
    %cst_130 = arith.constant 1.280000e+02 : f32
    %323 = vector.broadcast %cst_130 : f32 to vector<32x1xf32>
    %324 = arith.divf %322, %323 : vector<32x1xf32>
    %325 = vector.broadcast %324 : vector<32x1xf32> to vector<32x128xf32>
    %326 = arith.subf %318, %325 : vector<32x128xf32>
    %327 = arith.mulf %326, %326 : vector<32x128xf32>
    %cst_131 = arith.constant dense<0.000000e+00> : vector<32xf32>
    %328 = vector.multi_reduction <add>, %327, %cst_131 [1] : vector<32x128xf32> to vector<32xf32>
    %329 = vector.shape_cast %328 : vector<32xf32> to vector<32x1xf32>
    %cst_132 = arith.constant 1.280000e+02 : f32
    %330 = vector.broadcast %cst_132 : f32 to vector<32x1xf32>
    %331 = arith.divf %329, %330 : vector<32x1xf32>
    %332 = vector.broadcast %324 : vector<32x1xf32> to vector<32x128xf32>
    %333 = arith.subf %318, %332 : vector<32x128xf32>
    %cst_133 = arith.constant 9.99999974E-6 : f32
    %334 = vector.broadcast %cst_133 : f32 to vector<32x1xf32>
    %335 = arith.addf %331, %334 : vector<32x1xf32>
    %336 = math.rsqrt %335 : vector<32x1xf32>
    %337 = vector.broadcast %336 : vector<32x1xf32> to vector<32x128xf32>
    %338 = arith.mulf %333, %337 : vector<32x128xf32>
    %339 = vector.broadcast %319 : vector<1x128xf32> to vector<32x128xf32>
    %340 = arith.mulf %338, %339 : vector<32x128xf32>
    %341 = vector.broadcast %320 : vector<1x128xf32> to vector<32x128xf32>
    %342 = arith.addf %340, %341 : vector<32x128xf32>
    %343 = vector.extract_strided_slice %288 {offsets = [32, 0], sizes = [32, 128], strides = [1, 1]} : vector<64x128xf32> to vector<32x128xf32>
    %344 = tpu.concatenate %343, %343 in 0 : vector<32x128xf32>, vector<32x128xf32> -> vector<64x128xf32>
    %345 = arith.mulf %344, %289 : vector<64x128xf32>
    %cst_134 = arith.constant dense<0.000000e+00> : vector<64x4xf32>
    %346 = tpu.matmul %345, %1, %cst_134 {dimension_numbers = #tpu.dot_dimension_numbers<[1], [0], [0], [1], [0, 0, 1, 1], [], []>} : vector<64x128xf32>, vector<128x4xf32>, vector<64x4xf32> -> vector<64x4xf32>
    %cst_135 = arith.constant 0.176776692 : f32
    %347 = vector.broadcast %cst_135 : f32 to vector<64x4xf32>
    %348 = arith.mulf %346, %347 : vector<64x4xf32>
    %349 = vector.shape_cast %348 : vector<64x4xf32> to vector<2x32x4xf32>
    %cst_136 = arith.constant dense<0xFF800000> : vector<32x4xf32>
    %350 = vector.multi_reduction <maximumf>, %349, %cst_136 [0] : vector<2x32x4xf32> to vector<32x4xf32>
    %351 = vector.shape_cast %350 : vector<32x4xf32> to vector<1x32x4xf32>
    %352 = vector.broadcast %351 : vector<1x32x4xf32> to vector<2x32x4xf32>
    %353 = arith.subf %349, %352 : vector<2x32x4xf32>
    %354 = math.exp %353 : vector<2x32x4xf32>
    %cst_137 = arith.constant dense<0.000000e+00> : vector<32x4xf32>
    %355 = vector.multi_reduction <add>, %354, %cst_137 [0] : vector<2x32x4xf32> to vector<32x4xf32>
    %356 = vector.shape_cast %355 : vector<32x4xf32> to vector<1x32x4xf32>
    %357 = vector.broadcast %356 : vector<1x32x4xf32> to vector<2x32x4xf32>
    %358 = arith.divf %354, %357 : vector<2x32x4xf32>
    %359 = vector.shape_cast %358 : vector<2x32x4xf32> to vector<64x4xf32>
    %cst_138 = arith.constant dense<0.000000e+00> : vector<64x128xf32>
    %360 = tpu.matmul %359, %2, %cst_138 {dimension_numbers = #tpu.dot_dimension_numbers<[1], [0], [0], [1], [0, 0, 1, 1], [], []>} : vector<64x4xf32>, vector<4x128xf32>, vector<64x128xf32> -> vector<64x128xf32>
    %361 = arith.mulf %360, %290 : vector<64x128xf32>
    %362 = vector.shape_cast %361 : vector<64x128xf32> to vector<2x32x128xf32>
    %cst_139 = arith.constant dense<0.000000e+00> : vector<32x128xf32>
    %363 = vector.multi_reduction <add>, %362, %cst_139 [0] : vector<2x32x128xf32> to vector<32x128xf32>
    %364 = vector.extract_strided_slice %282 {offsets = [32, 0], sizes = [32, 128], strides = [1, 1]} : vector<64x128xf32> to vector<32x128xf32>
    %cst_140 = arith.constant dense<0.000000e+00> : vector<32x128xf32>
    %365 = tpu.matmul %363, %291, %cst_140 {dimension_numbers = #tpu.dot_dimension_numbers<[1], [0], [0], [1], [0, 0, 1, 1], [], []>} : vector<32x128xf32>, vector<128x128xf32>, vector<32x128xf32> -> vector<32x128xf32>
    %366 = arith.addf %364, %365 : vector<32x128xf32>
    %367 = vector.broadcast %292 : vector<1x128xf32> to vector<32x128xf32>
    %368 = arith.addf %366, %367 : vector<32x128xf32>
    %c0_141 = arith.constant 0 : index
    %c0_142 = arith.constant 0 : index
    %369 = vector.load %arg25[%c0_141, %c0_142] : memref<1x128xf32, #tpu.memory_space<vmem>>, vector<1x128xf32>
    %c0_143 = arith.constant 0 : index
    %c0_144 = arith.constant 0 : index
    %370 = vector.load %arg26[%c0_143, %c0_144] : memref<1x128xf32, #tpu.memory_space<vmem>>, vector<1x128xf32>
    %cst_145 = arith.constant dense<0.000000e+00> : vector<32xf32>
    %371 = vector.multi_reduction <add>, %368, %cst_145 [1] : vector<32x128xf32> to vector<32xf32>
    %372 = vector.shape_cast %371 : vector<32xf32> to vector<32x1xf32>
    %cst_146 = arith.constant 1.280000e+02 : f32
    %373 = vector.broadcast %cst_146 : f32 to vector<32x1xf32>
    %374 = arith.divf %372, %373 : vector<32x1xf32>
    %375 = vector.broadcast %374 : vector<32x1xf32> to vector<32x128xf32>
    %376 = arith.subf %368, %375 : vector<32x128xf32>
    %377 = arith.mulf %376, %376 : vector<32x128xf32>
    %cst_147 = arith.constant dense<0.000000e+00> : vector<32xf32>
    %378 = vector.multi_reduction <add>, %377, %cst_147 [1] : vector<32x128xf32> to vector<32xf32>
    %379 = vector.shape_cast %378 : vector<32xf32> to vector<32x1xf32>
    %cst_148 = arith.constant 1.280000e+02 : f32
    %380 = vector.broadcast %cst_148 : f32 to vector<32x1xf32>
    %381 = arith.divf %379, %380 : vector<32x1xf32>
    %382 = vector.broadcast %374 : vector<32x1xf32> to vector<32x128xf32>
    %383 = arith.subf %368, %382 : vector<32x128xf32>
    %cst_149 = arith.constant 9.99999974E-6 : f32
    %384 = vector.broadcast %cst_149 : f32 to vector<32x1xf32>
    %385 = arith.addf %381, %384 : vector<32x1xf32>
    %386 = math.rsqrt %385 : vector<32x1xf32>
    %387 = vector.broadcast %386 : vector<32x1xf32> to vector<32x128xf32>
    %388 = arith.mulf %383, %387 : vector<32x128xf32>
    %389 = vector.broadcast %369 : vector<1x128xf32> to vector<32x128xf32>
    %390 = arith.mulf %388, %389 : vector<32x128xf32>
    %391 = vector.broadcast %370 : vector<1x128xf32> to vector<32x128xf32>
    %392 = arith.addf %390, %391 : vector<32x128xf32>
    %393 = vector.shape_cast %342 : vector<32x128xf32> to vector<1x32x128xf32>
    %394 = vector.shape_cast %392 : vector<32x128xf32> to vector<1x32x128xf32>
    %395 = tpu.concatenate %393, %394 in 0 : vector<1x32x128xf32>, vector<1x32x128xf32> -> vector<2x32x128xf32>
    %cst_150 = arith.constant dense<0.000000e+00> : vector<2x128xf32>
    %396 = vector.multi_reduction <add>, %395, %cst_150 [1] : vector<2x32x128xf32> to vector<2x128xf32>
    %cst_151 = arith.constant 3.200000e+01 : f32
    %397 = vector.broadcast %cst_151 : f32 to vector<2x128xf32>
    %398 = arith.divf %396, %397 : vector<2x128xf32>
    %c0_152 = arith.constant 0 : index
    %c0_153 = arith.constant 0 : index
    %399 = vector.load %arg27[%c0_152, %c0_153] : memref<128x64xf32, #tpu.memory_space<vmem>>, vector<128x64xf32>
    %cst_154 = arith.constant dense<0.000000e+00> : vector<2x64xf32>
    %400 = tpu.matmul %398, %399, %cst_154 {dimension_numbers = #tpu.dot_dimension_numbers<[1], [0], [0], [1], [0, 0, 1, 1], [], []>} : vector<2x128xf32>, vector<128x64xf32>, vector<2x64xf32> -> vector<2x64xf32>
    %c0_155 = arith.constant 0 : index
    %c0_156 = arith.constant 0 : index
    %401 = vector.load %arg28[%c0_155, %c0_156] : memref<1x64xf32, #tpu.memory_space<vmem>>, vector<1x64xf32>
    %402 = vector.broadcast %401 : vector<1x64xf32> to vector<2x64xf32>
    %403 = arith.addf %400, %402 : vector<2x64xf32>
    %cst_157 = arith.constant 5.000000e-01 : f32
    %404 = vector.broadcast %cst_157 : f32 to vector<2x64xf32>
    %405 = arith.mulf %404, %403 : vector<2x64xf32>
    %cst_158 = arith.constant 0.707106769 : f32
    %406 = vector.broadcast %cst_158 : f32 to vector<2x64xf32>
    %407 = arith.mulf %403, %406 : vector<2x64xf32>
    %408 = math.absf %407 : vector<2x64xf32>
    %cst_159 = arith.constant 0.327591091 : f32
    %409 = vector.broadcast %cst_159 : f32 to vector<2x64xf32>
    %410 = arith.mulf %409, %408 : vector<2x64xf32>
    %cst_160 = arith.constant 1.000000e+00 : f32
    %411 = vector.broadcast %cst_160 : f32 to vector<2x64xf32>
    %412 = arith.addf %411, %410 : vector<2x64xf32>
    %cst_161 = arith.constant 1.000000e+00 : f32
    %413 = vector.broadcast %cst_161 : f32 to vector<2x64xf32>
    %414 = arith.divf %413, %412 : vector<2x64xf32>
    %cst_162 = arith.constant 1.06140542 : f32
    %415 = vector.broadcast %cst_162 : f32 to vector<2x64xf32>
    %416 = arith.mulf %414, %415 : vector<2x64xf32>
    %cst_163 = arith.constant -1.45315206 : f32
    %417 = vector.broadcast %cst_163 : f32 to vector<2x64xf32>
    %418 = arith.addf %417, %416 : vector<2x64xf32>
    %419 = arith.mulf %414, %418 : vector<2x64xf32>
    %cst_164 = arith.constant 1.42141378 : f32
    %420 = vector.broadcast %cst_164 : f32 to vector<2x64xf32>
    %421 = arith.addf %420, %419 : vector<2x64xf32>
    %422 = arith.mulf %414, %421 : vector<2x64xf32>
    %cst_165 = arith.constant -0.284496725 : f32
    %423 = vector.broadcast %cst_165 : f32 to vector<2x64xf32>
    %424 = arith.addf %423, %422 : vector<2x64xf32>
    %425 = arith.mulf %414, %424 : vector<2x64xf32>
    %cst_166 = arith.constant 0.254829586 : f32
    %426 = vector.broadcast %cst_166 : f32 to vector<2x64xf32>
    %427 = arith.addf %426, %425 : vector<2x64xf32>
    %428 = arith.mulf %414, %427 : vector<2x64xf32>
    %cst_167 = arith.constant 0.000000e+00 : f32
    %429 = vector.broadcast %cst_167 : f32 to vector<2x64xf32>
    %430 = arith.subf %429, %408 : vector<2x64xf32>
    %431 = arith.mulf %430, %408 : vector<2x64xf32>
    %432 = math.exp %431 : vector<2x64xf32>
    %433 = arith.mulf %428, %432 : vector<2x64xf32>
    %cst_168 = arith.constant 1.000000e+00 : f32
    %434 = vector.broadcast %cst_168 : f32 to vector<2x64xf32>
    %435 = arith.subf %434, %433 : vector<2x64xf32>
    %cst_169 = arith.constant 0.000000e+00 : f32
    %436 = vector.broadcast %cst_169 : f32 to vector<2x64xf32>
    %437 = arith.cmpf oge, %407, %436 : vector<2x64xf32>
    %cst_170 = arith.constant 0.000000e+00 : f32
    %438 = vector.broadcast %cst_170 : f32 to vector<2x64xf32>
    %439 = arith.subf %438, %435 : vector<2x64xf32>
    %440 = arith.select %437, %435, %439 : vector<2x64xi1>, vector<2x64xf32>
    %cst_171 = arith.constant 1.000000e+00 : f32
    %441 = vector.broadcast %cst_171 : f32 to vector<2x64xf32>
    %442 = arith.addf %441, %440 : vector<2x64xf32>
    %443 = arith.mulf %405, %442 : vector<2x64xf32>
    %c0_172 = arith.constant 0 : index
    %c0_173 = arith.constant 0 : index
    %444 = vector.load %arg29[%c0_172, %c0_173] : memref<64x2xf32, #tpu.memory_space<vmem>>, vector<64x2xf32>
    %cst_174 = arith.constant dense<0.000000e+00> : vector<2x2xf32>
    %445 = tpu.matmul %443, %444, %cst_174 {dimension_numbers = #tpu.dot_dimension_numbers<[1], [0], [0], [1], [0, 0, 1, 1], [], []>} : vector<2x64xf32>, vector<64x2xf32>, vector<2x2xf32> -> vector<2x2xf32>
    %c0_175 = arith.constant 0 : index
    %c0_176 = arith.constant 0 : index
    %446 = vector.load %arg30[%c0_175, %c0_176] : memref<1x2xf32, #tpu.memory_space<vmem>>, vector<1x2xf32>
    %447 = vector.broadcast %446 : vector<1x2xf32> to vector<2x2xf32>
    %448 = arith.addf %445, %447 : vector<2x2xf32>
    %cst_177 = arith.constant dense<0xFF800000> : vector<2xf32>
    %449 = vector.multi_reduction <maximumf>, %448, %cst_177 [1] : vector<2x2xf32> to vector<2xf32>
    %450 = vector.shape_cast %449 : vector<2xf32> to vector<2x1xf32>
    %451 = vector.broadcast %450 : vector<2x1xf32> to vector<2x2xf32>
    %452 = arith.subf %448, %451 : vector<2x2xf32>
    %453 = math.exp %452 : vector<2x2xf32>
    %cst_178 = arith.constant dense<0.000000e+00> : vector<2xf32>
    %454 = vector.multi_reduction <add>, %453, %cst_178 [1] : vector<2x2xf32> to vector<2xf32>
    %455 = vector.shape_cast %454 : vector<2xf32> to vector<2x1xf32>
    %456 = math.log %455 : vector<2x1xf32>
    %457 = arith.addf %450, %456 : vector<2x1xf32>
    %458 = vector.broadcast %457 : vector<2x1xf32> to vector<2x2xf32>
    %459 = arith.subf %448, %458 : vector<2x2xf32>
    %c0_179 = arith.constant 0 : index
    %c0_180 = arith.constant 0 : index
    %460 = vector.load %arg31[%c0_179, %c0_180] : memref<2x2xf32, #tpu.memory_space<vmem>>, vector<2x2xf32>
    tpu.vector_store %arg31[%c0_179, %c0_180], %459 {strides = array<i32>} : memref<2x2xf32, #tpu.memory_space<vmem>>, vector<2x2xf32>,
    return
  }
}

</mosaic_0001>

<bundles_post_ra>
// kernel: damgcn_forward.1
= control target key start
LH: loop header
LB: loop body
LE: loop exit
PB: predicated region body
PF: predicated region fallthrough
CT: control target
= control target key end

     0   :  { %s7539_s6 = smov 1   ;;  %s7540_s10 = smov 2   ;;  %s9324_s0 = inlined_call_operand.smem [shape: u32[32], index: -1, kind: input, shape index: {}] }
   0x1   :  { %s7607_s5 = sld [smem:[%s9324_s0]]   ;;  %s7541_s14 = smov 3  }
   0x2   :  { %s7612_s9 = sld [smem:[%s9324_s0 + %s7539_s6]]   ;;  %s7542_s18 = smov 4  }
   0x3   :  { %s7617_s13 = sld [smem:[%s9324_s0 + %s7540_s10]]   ;;  %s7543_s22 = smov 5  }
   0x4   :  { %s7622_s17 = sld [smem:[%s9324_s0 + %s7541_s14]]   ;;  %s7544_s26 = smov 6  }
   0x5   :  { %s7627_s21 = sld [smem:[%s9324_s0 + %s7542_s18]]   ;;  %s7545_s30 = smov 7  }
   0x6   :  { %s7632_s25 = sld [smem:[%s9324_s0 + %s7543_s22]]   ;;  %s7546_s4 = smov 8  }
   0x7   :  { %9340 = sst [smem:[#allocation48_spill]] %s7607_s5  ;;  %s7547_s10 = smov 9  }
   0x8   :  { %9341 = sst [smem:[#allocation49_spill]] %s7612_s9  ;;  %s7548_s15 = smov 10  }
   0x9   :  { %s7637_s29 = sld [smem:[%s9324_s0 + %s7544_s26]]   ;;  %s7549_s20 = smov 11  }
   0xa   :  { %9342 = sst [smem:[#allocation50_spill]] %s7622_s17  ;;  %s7550_s26 = smov 12  }
   0xb   :  { %9343 = sst [smem:[#allocation51_spill]] %s7627_s21  ;;  %s7551_s1 = smov 13  }
   0xc   :  { %9344 = sst [smem:[#allocation52_spill]] %s7632_s25  ;;  %s7552_s7 = smov 14  }
   0xd   :  { %s7642_s3 = sld [smem:[%s9324_s0 + %s7545_s30]]   ;;  %s7554_s22 = smov 16  }
   0xe   :  { %s7647_s8 = sld [smem:[%s9324_s0 + %s7546_s4]]   ;;  %s7555_s28 = smov 17  }
   0xf   :  { %s7652_s14 = sld [smem:[%s9324_s0 + %s7547_s10]]  }
  0x10   :  { %s7657_s19 = sld [smem:[%s9324_s0 + %s7548_s15]]   ;;  %s7553_s15 = smov 15  }
  0x11   :  { %s7662_s24 = sld [smem:[%s9324_s0 + %s7549_s20]]  }
  0x12   :  { %s7667_s30 = sld [smem:[%s9324_s0 + %s7550_s26]]  }
  0x13   :  { %9345 = sst [smem:[#allocation53_spill]] %s7642_s3 }
  0x14   :  { %s7672_s6 = sld [smem:[%s9324_s0 + %s7551_s1]]  }
  0x15   :  { %s7677_s12 = sld [smem:[%s9324_s0 + %s7552_s7]]   ;;  %s7556_s7 = smov 18  }
  0x16   :  { %s7682_s20 = sld [smem:[%s9324_s0 + %s7553_s15]]   ;;  %s7557_s15 = smov 19  }
  0x17   :  { %9346 = sst [smem:[#allocation54_spill]] %s7662_s24 }
  0x18   :  { %s7687_s27 = sld [smem:[%s9324_s0 + %s7554_s22]]   ;;  %s7558_s22 = smov 20  }
  0x19   :  { %s7692_s4 = sld [smem:[%s9324_s0 + %s7555_s28]]   ;;  %s7559_s28 = smov 21  }
  0x1a   :  { %s7697_s17 = sld [smem:[%s9324_s0 + %s7556_s7]]   ;;  %s7560_s7 = smov 22  }
  0x1b   :  { %s7702_s21 = sld [smem:[%s9324_s0 + %s7557_s15]]   ;;  %s7561_s15 = smov 23  }
  0x1c   :  { %9347 = sst [smem:[#allocation55_spill]] %s7682_s20 }
  0x1d   :  { %s7707_s20 = sld [smem:[%s9324_s0 + %s7558_s22]]   ;;  %s7562_s22 = smov 24  }
  0x1e   :  { %s7712_s24 = sld [smem:[%s9324_s0 + %s7559_s28]]   ;;  %s7563_s28 = smov 25  }
  0x1f   :  { %s7717_s9 = sld [smem:[%s9324_s0 + %s7560_s7]]   ;;  %s7564_s7 = smov 26  }
  0x20   :  { %9348 = sst [smem:[#allocation56_spill]] %s7697_s17 }
  0x21   :  { %s7722_s3 = sld [smem:[%s9324_s0 + %s7561_s15]]   ;;  %s7565_s15 = smov 27  }
  0x22   :  { %s7727_s5 = sld [smem:[%s9324_s0 + %s7562_s22]]   ;;  %s7566_s22 = smov 28  }
  0x23   :  { %9349 = sst [smem:[#allocation57_spill]] %s7707_s20 }
  0x24   :  { %s7732_s25 = sld [smem:[%s9324_s0 + %s7563_s28]]   ;;  %s7567_s28 = smov 29  }
  0x25   :  { %9350 = sst [smem:[#allocation58_spill]] %s7717_s9 }
  0x26   :  { %s7737_s9 = sld [smem:[%s9324_s0 + %s7564_s7]]   ;;  %s7568_s7 = smov 30  }
  0x27   :  { %s7742_s20 = sld [smem:[%s9324_s0 + %s7565_s15]]   ;;  %s7569_s15 = smov 31  }
  0x28   :  { %9351 = sst [smem:[#allocation59_spill]] %s7727_s5 }
  0x29   :  { %s7747_s5 = sld [smem:[%s9324_s0 + %s7566_s22]]  }
  0x2a   :  { %s7752_s17 = sld [smem:[%s9324_s0 + %s7567_s28]]  }
  0x2c   :  { %9352 = sst [smem:[#allocation60_spill]] %s7737_s9 }
  0x2d   :  { %9353 = sst [smem:[#allocation61_spill]] %s7742_s20 }
  0x2e   :  { %s7757_s9 = sld [smem:[%s9324_s0 + %s7568_s7]]  }
  0x2f   :  { %s7762_s20 = sld [smem:[%s9324_s0 + %s7569_s15]]  }
  0x30   :  { %68 = vsyncpa [#allocation3], 0 }
  0x31   :  { %69 = vsyncpa [#allocation6], 0 }
  0x32   :  { %70 = vsyncpa [#allocation9], 0 }
  0x33   :  { %71 = vsyncpa [#allocation12], 0 }
  0x34   :  { %72 = vsyncpa [#allocation15], 0 }
  0x35   :  { %73 = vsyncpa [#allocation18], 0 }
  0x36   :  { %74 = vsyncpa [#allocation21], 0 }
  0x37   :  { %75 = vsyncpa [#allocation24], 0 }
  0x38   :  { %76 = vsyncpa [#allocation27], 0 }
  0x39   :  { %77 = vsyncpa [#allocation30], 0 }
  0x3a   :  { %78 = vsyncpa [#allocation33], 0 }
  0x3b   :  { %79 = vsyncpa [#allocation4], 0  ;;  %s7570_s22 = smov [#allocation5]   ;;  %s7571_s26 = smov [#allocation8]  }
  0x3c   :  { %s108_s23 = sshll.u32 %s7570_s22, 4  ;;  %s130_s0 = sshll.u32 %s7571_s26, 4  ;;  %s109_s23 = int_to_ptr.vmem [resolvable:$true] %s108_s23  ;;  %s131_s0 = int_to_ptr.vmem [resolvable:$true] %s130_s0 }
  0x3d   :  { %s7031_s28 = scalar_lea.hbm %s7637_s29, 16 }
  0x3e   :  { %p7032_p0 = scmp.ne.s32.totalorder %s7637_s29, %s7031_s28  ;;  %p7035_p1 = scmp.lt.u32.totalorder %s7031_s28, %s7637_s29 }
  0x40   :  { %p7037_p2 = pnand %p7035_p1, %p7032_p0 }
  0x42   :  { %7040 = shalt.err (!%p7037_p2)
}
  0x43   :  { %s7041_s1 = scalar_lea.vmem %s109_s23, 16  ;;  %s7045_s2 = scalar_lea.vmem %s109_s23, 32 }
  0x44   :  { %p7042_p3 = scmp.ne.s32.totalorder %s109_s23, %s7041_s1  ;;  %p7046_p4 = scmp.lt.s32.totalorder %s109_s23, %s109_s23 }
  0x45   :  { %p7047_p5 = scmp.lt.s32.totalorder %s7045_s2, %s7041_s1 }
  0x47   :  { %p7048_p6 = por %p7047_p5, %p7046_p4 }
  0x49   :  { %p7049_p7 = pnand %p7048_p6, %p7042_p3 }
  0x4b   :  { %7052 = shalt.err (!%p7049_p7)
}
  0x4c   :  { %111 = dma.hbm_to_vmem [thread:$0]  %s7637_s29, 16, %s109_s23, [#allocation6]  }
  0x4d   :  { %s7053_s7 = scalar_lea.hbm %s7652_s14, 16 }
  0x4e   :  { %p7054_p8 = scmp.ne.s32.totalorder %s7652_s14, %s7053_s7  ;;  %p7057_p9 = scmp.lt.u32.totalorder %s7053_s7, %s7652_s14 }
  0x50   :  { %p7059_p10 = pnand %p7057_p9, %p7054_p8 }
  0x52   :  { %7062 = shalt.err (!%p7059_p10)
}
  0x53   :  { %s7063_s10 = scalar_lea.vmem %s131_s0, 16  ;;  %s7067_s11 = scalar_lea.vmem %s131_s0, 32 }
  0x54   :  { %p7064_p11 = scmp.ne.s32.totalorder %s131_s0, %s7063_s10  ;;  %p7068_p12 = scmp.lt.s32.totalorder %s131_s0, %s131_s0 }
  0x55   :  { %p7069_p13 = scmp.lt.s32.totalorder %s7067_s11, %s7063_s10 }
  0x57   :  { %p7070_p0 = por %p7069_p13, %p7068_p12 }
  0x59   :  { %p7071_p1 = pnand %p7070_p0, %p7064_p11 }
  0x5b   :  { %7074 = shalt.err (!%p7071_p1)
}
  0x5c   :  { %133 = dma.hbm_to_vmem [thread:$0]  %s7652_s14, 16, %s131_s0, [#allocation9]  }
  0x5d   :  { %s7572_s15 = smov [#allocation11]   ;;  %s7573_s16 = smov [#allocation14]  }
  0x5e   :  { %s152_s29 = sshll.u32 %s7572_s15, 4  ;;  %s172_s18 = sshll.u32 %s7573_s16, 4  ;;  %s153_s29 = int_to_ptr.vmem [resolvable:$true] %s152_s29  ;;  %s173_s18 = int_to_ptr.vmem [resolvable:$true] %s172_s18 }
  0x5f   :  { %s7075_s22 = scalar_lea.hbm %s7667_s30, 16 }
  0x60   :  { %p7076_p2 = scmp.ne.s32.totalorder %s7667_s30, %s7075_s22  ;;  %p7079_p3 = scmp.lt.u32.totalorder %s7075_s22, %s7667_s30 }
  0x62   :  { %p7081_p4 = pnand %p7079_p3, %p7076_p2 }
  0x64   :  { %7084 = shalt.err (!%p7081_p4)
}
  0x65   :  { %s7085_s23 = scalar_lea.vmem %s153_s29, 16  ;;  %s7089_s26 = scalar_lea.vmem %s153_s29, 32 }
  0x66   :  { %p7086_p5 = scmp.ne.s32.totalorder %s153_s29, %s7085_s23  ;;  %p7090_p6 = scmp.lt.s32.totalorder %s153_s29, %s153_s29 }
  0x67   :  { %p7091_p7 = scmp.lt.s32.totalorder %s7089_s26, %s7085_s23 }
  0x69   :  { %p7092_p8 = por %p7091_p7, %p7090_p6 }
  0x6b   :  { %p7093_p9 = pnand %p7092_p8, %p7086_p5 }
  0x6d   :  { %7096 = shalt.err (!%p7093_p9)
}
  0x6e   :  { %155 = dma.hbm_to_vmem [thread:$0]  %s7667_s30, 16, %s153_s29, [#allocation12]  }
  0x6f   :  { %s7097_s14 = scalar_lea.hbm %s7677_s12, 16 }
  0x70   :  { %p7098_p10 = scmp.ne.s32.totalorder %s7677_s12, %s7097_s14  ;;  %p7101_p11 = scmp.lt.u32.totalorder %s7097_s14, %s7677_s12 }
  0x72   :  { %p7103_p12 = pnand %p7101_p11, %p7098_p10 }
  0x74   :  { %7106 = shalt.err (!%p7103_p12)
}
  0x75   :  { %s7107_s0 = scalar_lea.vmem %s173_s18, 16  ;;  %s7111_s28 = scalar_lea.vmem %s173_s18, 32 }
  0x76   :  { %p7108_p13 = scmp.ne.s32.totalorder %s173_s18, %s7107_s0  ;;  %p7112_p0 = scmp.lt.s32.totalorder %s173_s18, %s173_s18 }
  0x77   :  { %p7113_p1 = scmp.lt.s32.totalorder %s7111_s28, %s7107_s0 }
  0x79   :  { %p7114_p2 = por %p7113_p1, %p7112_p0 }
  0x7b   :  { %p7115_p3 = pnand %p7114_p2, %p7108_p13 }
  0x7d   :  { %7118 = shalt.err (!%p7115_p3)
}
  0x7e   :  { %175 = dma.hbm_to_vmem [thread:$0]  %s7677_s12, 16, %s173_s18, [#allocation15]  }
  0x7f   :  { %s7574_s1 = smov [#allocation17]   ;;  %s7575_s2 = smov [#allocation20]  }
  0x80   :  { %s193_s30 = sshll.u32 %s7574_s1, 4  ;;  %s216_s7 = sshll.u32 %s7575_s2, 4  ;;  %s194_s30 = int_to_ptr.vmem [resolvable:$true] %s193_s30  ;;  %s7780_s7 = int_to_ptr.vmem [resolvable:$true] %s216_s7 }
  0x81   :  { %s7119_s10 = scalar_lea.hbm %s7692_s4, 2048 }
  0x82   :  { %p7120_p4 = scmp.ne.s32.totalorder %s7692_s4, %s7119_s10  ;;  %p7123_p5 = scmp.lt.u32.totalorder %s7119_s10, %s7692_s4 }
  0x84   :  { %p7125_p6 = pnand %p7123_p5, %p7120_p4 }
  0x86   :  { %7128 = shalt.err (!%p7125_p6)
}
  0x87   :  { %s7129_s11 = scalar_lea.vmem %s194_s30, 2048  ;;  %p7134_p8 = scmp.lt.s32.totalorder %s194_s30, %s194_s30 }
  0x88   :  { %p7130_p7 = scmp.ne.s32.totalorder %s194_s30, %s7129_s11  ;;  %p7135_p9 = scmp.lt.s32.totalorder %s7129_s11, %s7129_s11 }
  0x8a   :  { %p7136_p10 = por %p7135_p9, %p7134_p8 }
  0x8c   :  { %p7137_p11 = pnand %p7136_p10, %p7130_p7 }
  0x8e   :  { %7140 = shalt.err (!%p7137_p11)
}
  0x8f   :  { %s7576_s12 = smov 128   ;;  %s7577_s15 = smov 8  }
  0x90   :  { %199 = dma.hbm_to_vmem [thread:$0]  %s7692_s4, 2048, %s194_s30, [#allocation18], %s7576_s12, %s7576_s12, %s7577_s15  }
  0x91   :  { %s7141_s29 = scalar_lea.hbm %s7702_s21, 16 }
  0x92   :  { %p7142_p12 = scmp.ne.s32.totalorder %s7702_s21, %s7141_s29  ;;  %p7145_p13 = scmp.lt.u32.totalorder %s7141_s29, %s7702_s21 }
  0x94   :  { %p7147_p0 = pnand %p7145_p13, %p7142_p12 }
  0x96   :  { %7150 = shalt.err (!%p7147_p0)
}
  0x97   :  { %s7151_s16 = scalar_lea.vmem %s7780_s7, 16  ;;  %s7155_s18 = scalar_lea.vmem %s7780_s7, 32 }
  0x98   :  { %p7152_p1 = scmp.ne.s32.totalorder %s7780_s7, %s7151_s16  ;;  %p7156_p2 = scmp.lt.s32.totalorder %s7780_s7, %s7780_s7 }
  0x99   :  { %p7157_p3 = scmp.lt.s32.totalorder %s7155_s18, %s7151_s16 }
  0x9b   :  { %p7158_p4 = por %p7157_p3, %p7156_p2 }
  0x9d   :  { %p7159_p5 = pnand %p7158_p4, %p7152_p1 }
  0x9f   :  { %7162 = shalt.err (!%p7159_p5)
}
  0xa0   :  { %219 = dma.hbm_to_vmem [thread:$0]  %s7702_s21, 16, %s7780_s7, [#allocation21]  }
  0xa1   :  { %s7578_s4 = smov [#allocation23]   ;;  %s7163_s23 = scalar_lea.hbm %s7712_s24, 6144 }
  0xa2   :  { %s235_s22 = sshll.u32 %s7578_s4, 4  ;;  %p7164_p6 = scmp.ne.s32.totalorder %s7712_s24, %s7163_s23  ;;  %s236_s22 = int_to_ptr.vmem [resolvable:$true] %s235_s22 }
  0xa3   :  { %p7167_p7 = scmp.lt.u32.totalorder %s7163_s23, %s7712_s24 }
  0xa5   :  { %p7169_p8 = pnand %p7167_p7, %p7164_p6 }
  0xa7   :  { %7172 = shalt.err (!%p7169_p8)
}
  0xa8   :  { %s7173_s26 = scalar_lea.vmem %s236_s22, 6144  ;;  %p7178_p10 = scmp.lt.s32.totalorder %s236_s22, %s236_s22 }
  0xa9   :  { %p7174_p9 = scmp.ne.s32.totalorder %s236_s22, %s7173_s26  ;;  %p7179_p11 = scmp.lt.s32.totalorder %s7173_s26, %s7173_s26 }
  0xab   :  { %p7180_p12 = por %p7179_p11, %p7178_p10 }
  0xad   :  { %p7181_p13 = pnand %p7180_p12, %p7174_p9 }
  0xaf   :  { %7184 = shalt.err (!%p7181_p13)
}
  0xb0   :  { %s7579_s14 = smov 384   ;;  %s7580_s21 = smov 24  }
  0xb1   :  { %241 = dma.hbm_to_vmem [thread:$0]  %s7712_s24, 6144, %s236_s22, [#allocation24], %s7579_s14, %s7579_s14, %s7580_s21  }
  0xb2   :  { %s7581_s0 = smov [#allocation26]   ;;  %s7582_s1 = smov [#allocation29]  }
  0xb3   :  { %s257_s28 = sshll.u32 %s7581_s0, 4  ;;  %s280_s30 = sshll.u32 %s7582_s1, 4  ;;  %s258_s28 = int_to_ptr.vmem [resolvable:$true] %s257_s28  ;;  %s281_s30 = int_to_ptr.vmem [resolvable:$true] %s280_s30 }
  0xb4   :  { %s7185_s2 = scalar_lea.hbm %s7722_s3, 2048 }
  0xb5   :  { %p7186_p0 = scmp.ne.s32.totalorder %s7722_s3, %s7185_s2  ;;  %p7189_p1 = scmp.lt.u32.totalorder %s7185_s2, %s7722_s3 }
  0xb7   :  { %p7191_p2 = pnand %p7189_p1, %p7186_p0 }
  0xb9   :  { %7194 = shalt.err (!%p7191_p2)
}
  0xba   :  { %s7195_s7 = scalar_lea.vmem %s258_s28, 2048  ;;  %p7200_p4 = scmp.lt.s32.totalorder %s258_s28, %s258_s28 }
  0xbb   :  { %p7196_p3 = scmp.ne.s32.totalorder %s258_s28, %s7195_s7  ;;  %p7201_p5 = scmp.lt.s32.totalorder %s7195_s7, %s7195_s7 }
  0xbd   :  { %p7202_p6 = por %p7201_p5, %p7200_p4 }
  0xbf   :  { %p7203_p7 = pnand %p7202_p6, %p7196_p3 }
  0xc1   :  { %7206 = shalt.err (!%p7203_p7)
}
  0xc2   :  { %263 = dma.hbm_to_vmem [thread:$0]  %s7722_s3, 2048, %s258_s28, [#allocation27], %s7576_s12, %s7576_s12, %s7577_s15  }
  0xc3   :  { %s7207_s24 = scalar_lea.hbm %s7732_s25, 16 }
  0xc4   :  { %p7208_p8 = scmp.ne.s32.totalorder %s7732_s25, %s7207_s24  ;;  %p7211_p9 = scmp.lt.u32.totalorder %s7207_s24, %s7732_s25 }
  0xc6   :  { %p7213_p10 = pnand %p7211_p9, %p7208_p8 }
  0xc8   :  { %7216 = shalt.err (!%p7213_p10)
}
  0xc9   :  { %s7217_s10 = scalar_lea.vmem %s281_s30, 16  ;;  %s7221_s11 = scalar_lea.vmem %s281_s30, 32 }
  0xca   :  { %p7218_p11 = scmp.ne.s32.totalorder %s281_s30, %s7217_s10  ;;  %p7222_p12 = scmp.lt.s32.totalorder %s281_s30, %s281_s30 }
  0xcb   :  { %p7223_p13 = scmp.lt.s32.totalorder %s7221_s11, %s7217_s10 }
  0xcd   :  { %p7224_p0 = por %p7223_p13, %p7222_p12 }
  0xcf   :  { %p7225_p1 = pnand %p7224_p0, %p7218_p11 }
  0xd1   :  { %7228 = shalt.err (!%p7225_p1)
}
  0xd2   :  { %283 = dma.hbm_to_vmem [thread:$0]  %s7732_s25, 16, %s281_s30, [#allocation30]  }
  0xd3   :  { %s7583_s3 = smov [#allocation32]   ;;  %s7584_s16 = smov [#allocation2]  }
  0xd4   :  { %s302_s29 = sshll.u32 %s7583_s3, 4  ;;  %s89_s18 = sshll.u32 %s7584_s16, 4  ;;  %s303_s29 = int_to_ptr.vmem [resolvable:$true] %s302_s29  ;;  %s90_s18 = int_to_ptr.vmem [resolvable:$true] %s89_s18 }
  0xd5   :  { %s7229_s4 = scalar_lea.hbm %s7747_s5, 16 }
  0xd6   :  { %p7230_p2 = scmp.ne.s32.totalorder %s7747_s5, %s7229_s4  ;;  %p7233_p3 = scmp.lt.u32.totalorder %s7229_s4, %s7747_s5 }
  0xd8   :  { %p7235_p4 = pnand %p7233_p3, %p7230_p2 }
  0xda   :  { %7238 = shalt.err (!%p7235_p4)
}
  0xdb   :  { %s7239_s22 = scalar_lea.vmem %s303_s29, 16  ;;  %s7243_s23 = scalar_lea.vmem %s303_s29, 32 }
  0xdc   :  { %p7240_p5 = scmp.ne.s32.totalorder %s303_s29, %s7239_s22  ;;  %p7244_p6 = scmp.lt.s32.totalorder %s303_s29, %s303_s29 }
  0xdd   :  { %p7245_p7 = scmp.lt.s32.totalorder %s7243_s23, %s7239_s22 }
  0xdf   :  { %p7246_p8 = por %p7245_p7, %p7244_p6 }
  0xe1   :  { %p7247_p9 = pnand %p7246_p8, %p7240_p5 }
  0xe3   :  { %7250 = shalt.err (!%p7247_p9)
}
  0xe4   :  { %305 = dma.hbm_to_vmem [thread:$0]  %s7747_s5, 16, %s303_s29, [#allocation33]  }
  0xe5   :  { %s7251_s25 = scalar_lea.hbm %s7617_s13, 1024 }
  0xe6   :  { %p7252_p10 = scmp.ne.s32.totalorder %s7617_s13, %s7251_s25  ;;  %p7255_p11 = scmp.lt.u32.totalorder %s7251_s25, %s7617_s13 }
  0xe8   :  { %p7257_p12 = pnand %p7255_p11, %p7252_p10 }
  0xea   :  { %7260 = shalt.err (!%p7257_p12)
}
  0xeb   :  { %s7261_s26 = scalar_lea.vmem %s90_s18, 1024  ;;  %p7266_p0 = scmp.lt.s32.totalorder %s90_s18, %s90_s18 }
  0xec   :  { %p7262_p13 = scmp.ne.s32.totalorder %s90_s18, %s7261_s26  ;;  %p7267_p1 = scmp.lt.s32.totalorder %s7261_s26, %s7261_s26 }
  0xee   :  { %p7268_p2 = por %p7267_p1, %p7266_p0 }
  0xf0   :  { %p7269_p3 = pnand %p7268_p2, %p7262_p13 }
  0xf2   :  { %7272 = shalt.err (!%p7269_p3)
}
  0xf3   :  { %95 = dma.hbm_to_vmem [thread:$0]  %s7617_s13, 1024, %s90_s18, [#allocation3], %s7576_s12, %s7576_s12, %s7577_s15  }
  0xf4   :  { %s7585_s5 = smov [#allocation7]   ;;  %s7586_s21 = smov [#allocation10]  }
  0xf5   :  { %s120_s14 = sshll.u32 %s7585_s5, 4  ;;  %s140_s0 = sshll.u32 %s7586_s21, 4  ;;  %s121_s14 = int_to_ptr.vmem [resolvable:$true] %s120_s14  ;;  %s141_s0 = int_to_ptr.vmem [resolvable:$true] %s140_s0 }
  0xf6   :  { %s7273_s28 = scalar_lea.hbm %s7647_s8, 16 }
  0xf7   :  { %p7274_p4 = scmp.ne.s32.totalorder %s7647_s8, %s7273_s28  ;;  %p7277_p5 = scmp.lt.u32.totalorder %s7273_s28, %s7647_s8 }
  0xf9   :  { %p7279_p6 = pnand %p7277_p5, %p7274_p4 }
  0xfb   :  { %7282 = shalt.err (!%p7279_p6)
}
  0xfc   :  { %s7283_s1 = scalar_lea.vmem %s121_s14, 16  ;;  %s7287_s30 = scalar_lea.vmem %s121_s14, 32 }
  0xfd   :  { %p7284_p7 = scmp.ne.s32.totalorder %s121_s14, %s7283_s1  ;;  %p7288_p8 = scmp.lt.s32.totalorder %s121_s14, %s121_s14 }
  0xfe   :  { %p7289_p9 = scmp.lt.s32.totalorder %s7287_s30, %s7283_s1 }
 0x100   :  { %p7290_p10 = por %p7289_p9, %p7288_p8 }
 0x102   :  { %p7291_p11 = pnand %p7290_p10, %p7284_p7 }
 0x104   :  { %7294 = shalt.err (!%p7291_p11)
}
 0x105   :  { %123 = dma.hbm_to_vmem [thread:$0]  %s7647_s8, 16, %s121_s14, [#allocation6]  }
 0x106   :  { %s7295_s13 = scalar_lea.hbm %s7657_s19, 16 }
 0x107   :  { %p7296_p12 = scmp.ne.s32.totalorder %s7657_s19, %s7295_s13  ;;  %p7299_p13 = scmp.lt.u32.totalorder %s7295_s13, %s7657_s19 }
 0x109   :  { %p7301_p0 = pnand %p7299_p13, %p7296_p12 }
 0x10b   :  { %7304 = shalt.err (!%p7301_p0)
}
 0x10c   :  { %s7305_s12 = scalar_lea.vmem %s141_s0, 16  ;;  %s7309_s15 = scalar_lea.vmem %s141_s0, 32 }
 0x10d   :  { %p7306_p1 = scmp.ne.s32.totalorder %s141_s0, %s7305_s12  ;;  %p7310_p2 = scmp.lt.s32.totalorder %s141_s0, %s141_s0 }
 0x10e   :  { %p7311_p3 = scmp.lt.s32.totalorder %s7309_s15, %s7305_s12 }
 0x110   :  { %p7312_p4 = por %p7311_p3, %p7310_p2 }
 0x112   :  { %p7313_p5 = pnand %p7312_p4, %p7306_p1 }
 0x114   :  { %7316 = shalt.err (!%p7313_p5)
}
 0x115   :  { %143 = dma.hbm_to_vmem [thread:$0]  %s7657_s19, 16, %s141_s0, [#allocation9]  }
 0x116   :  { %s7587_s8 = smov [#allocation13]   ;;  %s7588_s7 = smov [#allocation16]  }
 0x117   :  { %s162_s2 = sshll.u32 %s7587_s8, 4  ;;  %s184_s24 = sshll.u32 %s7588_s7, 4  ;;  %s163_s2 = int_to_ptr.vmem [resolvable:$true] %s162_s2  ;;  %s185_s24 = int_to_ptr.vmem [resolvable:$true] %s184_s24 }
 0x118   :  { %s7317_s10 = scalar_lea.hbm %s7672_s6, 16 }
 0x119   :  { %p7318_p6 = scmp.ne.s32.totalorder %s7672_s6, %s7317_s10  ;;  %p7321_p7 = scmp.lt.u32.totalorder %s7317_s10, %s7672_s6 }
 0x11b   :  { %p7323_p8 = pnand %p7321_p7, %p7318_p6 }
 0x11d   :  { %7326 = shalt.err (!%p7323_p8)
}
 0x11e   :  { %s7327_s11 = scalar_lea.vmem %s163_s2, 16  ;;  %s7331_s3 = scalar_lea.vmem %s163_s2, 32 }
 0x11f   :  { %p7328_p9 = scmp.ne.s32.totalorder %s163_s2, %s7327_s11  ;;  %p7332_p10 = scmp.lt.s32.totalorder %s163_s2, %s163_s2 }
 0x120   :  { %p7333_p11 = scmp.lt.s32.totalorder %s7331_s3, %s7327_s11 }
 0x122   :  { %p7334_p12 = por %p7333_p11, %p7332_p10 }
 0x124   :  { %p7335_p13 = pnand %p7334_p12, %p7328_p9 }
 0x126   :  { %7338 = shalt.err (!%p7335_p13)
}
 0x127   :  { %165 = dma.hbm_to_vmem [thread:$0]  %s7672_s6, 16, %s163_s2, [#allocation12]  }
 0x128   :  { %s7339_s19 = scalar_lea.hbm %s7687_s27, 48 }
 0x129   :  { %p7340_p0 = scmp.ne.s32.totalorder %s7687_s27, %s7339_s19  ;;  %p7343_p1 = scmp.lt.u32.totalorder %s7339_s19, %s7687_s27 }
 0x12b   :  { %p7345_p2 = pnand %p7343_p1, %p7340_p0 }
 0x12d   :  { %7348 = shalt.err (!%p7345_p2)
}
 0x12e   :  { %s7349_s29 = scalar_lea.vmem %s185_s24, 48  ;;  %s7353_s16 = scalar_lea.vmem %s185_s24, 64 }
 0x12f   :  { %p7350_p3 = scmp.ne.s32.totalorder %s185_s24, %s7349_s29  ;;  %p7354_p4 = scmp.lt.s32.totalorder %s185_s24, %s185_s24 }
 0x130   :  { %p7355_p5 = scmp.lt.s32.totalorder %s7353_s16, %s7349_s29 }
 0x132   :  { %p7356_p6 = por %p7355_p5, %p7354_p4 }
 0x134   :  { %p7357_p7 = pnand %p7356_p6, %p7350_p3 }
 0x136   :  { %7360 = shalt.err (!%p7357_p7)
}
 0x137   :  { %s9354_s18 = sld [smem:[#allocation56_spill]]  ;;  %s7589_s6 = smov [#allocation19]  }
 0x138   :  { %187 = dma.hbm_to_vmem [thread:$0]  %s7687_s27, 48, %s185_s24, [#allocation15]  }
 0x139   :  { %s206_s4 = sshll.u32 %s7589_s6, 4  ;;  %s7590_s22 = smov [#allocation22]   ;;  %s207_s4 = int_to_ptr.vmem [resolvable:$true] %s206_s4 }
 0x13a   :  { %s226_s23 = sshll.u32 %s7590_s22, 4  ;;  %s227_s23 = int_to_ptr.vmem [resolvable:$true] %s226_s23 }
 0x13d   :  { %s7361_s25 = scalar_lea.hbm %s9354_s18, 16 }
 0x13e   :  { %p7362_p8 = scmp.ne.s32.totalorder %s9354_s18, %s7361_s25  ;;  %p7365_p9 = scmp.lt.u32.totalorder %s7361_s25, %s9354_s18 }
 0x140   :  { %p7367_p10 = pnand %p7365_p9, %p7362_p8 }
 0x142   :  { %7370 = shalt.err (!%p7367_p10)
}
 0x143   :  { %s7371_s26 = scalar_lea.vmem %s207_s4, 16  ;;  %s7375_s5 = scalar_lea.vmem %s207_s4, 32 }
 0x144   :  { %p7372_p11 = scmp.ne.s32.totalorder %s207_s4, %s7371_s26  ;;  %p7376_p12 = scmp.lt.s32.totalorder %s207_s4, %s207_s4 }
 0x145   :  { %p7377_p13 = scmp.lt.s32.totalorder %s7375_s5, %s7371_s26 }
 0x147   :  { %p7378_p0 = por %p7377_p13, %p7376_p12 }
 0x149   :  { %p7379_p1 = pnand %p7378_p0, %p7372_p11 }
 0x14b   :  { %7382 = shalt.err (!%p7379_p1)
}
 0x14c   :  { %s9355_s27 = sld [smem:[#allocation57_spill]] }
 0x14d   :  { %209 = dma.hbm_to_vmem [thread:$0]  %s9354_s18, 16, %s207_s4, [#allocation18]  }
 0x152   :  { %s7383_s14 = scalar_lea.hbm %s9355_s27, 16 }
 0x153   :  { %p7384_p2 = scmp.ne.s32.totalorder %s9355_s27, %s7383_s14  ;;  %p7387_p3 = scmp.lt.u32.totalorder %s7383_s14, %s9355_s27 }
 0x155   :  { %p7389_p4 = pnand %p7387_p3, %p7384_p2 }
 0x157   :  { %7392 = shalt.err (!%p7389_p4)
}
 0x158   :  { %s7393_s21 = scalar_lea.vmem %s227_s23, 16  ;;  %s7397_s0 = scalar_lea.vmem %s227_s23, 32 }
 0x159   :  { %p7394_p5 = scmp.ne.s32.totalorder %s227_s23, %s7393_s21  ;;  %p7398_p6 = scmp.lt.s32.totalorder %s227_s23, %s227_s23 }
 0x15a   :  { %p7399_p7 = scmp.lt.s32.totalorder %s7397_s0, %s7393_s21 }
 0x15c   :  { %p7400_p8 = por %p7399_p7, %p7398_p6 }
 0x15e   :  { %p7401_p9 = pnand %p7400_p8, %p7394_p5 }
 0x160   :  { %7404 = shalt.err (!%p7401_p9)
}
 0x161   :  { %s9356_s28 = sld [smem:[#allocation58_spill]]  ;;  %s7591_s1 = smov [#allocation25]  }
 0x162   :  { %229 = dma.hbm_to_vmem [thread:$0]  %s9355_s27, 16, %s227_s23, [#allocation21]  }
 0x163   :  { %s248_s30 = sshll.u32 %s7591_s1, 4  ;;  %s7592_s13 = smov [#allocation28]   ;;  %s249_s30 = int_to_ptr.vmem [resolvable:$true] %s248_s30 }
 0x164   :  { %s270_s12 = sshll.u32 %s7592_s13, 4  ;;  %s271_s12 = int_to_ptr.vmem [resolvable:$true] %s270_s12 }
 0x167   :  { %s7405_s15 = scalar_lea.hbm %s9356_s28, 48 }
 0x168   :  { %p7406_p10 = scmp.ne.s32.totalorder %s9356_s28, %s7405_s15  ;;  %p7409_p11 = scmp.lt.u32.totalorder %s7405_s15, %s9356_s28 }
 0x16a   :  { %p7411_p12 = pnand %p7409_p11, %p7406_p10 }
 0x16c   :  { %7414 = shalt.err (!%p7411_p12)
}
 0x16d   :  { %s7415_s8 = scalar_lea.vmem %s249_s30, 48  ;;  %s7419_s2 = scalar_lea.vmem %s249_s30, 64 }
 0x16e   :  { %p7416_p13 = scmp.ne.s32.totalorder %s249_s30, %s7415_s8  ;;  %p7420_p0 = scmp.lt.s32.totalorder %s249_s30, %s249_s30 }
 0x16f   :  { %p7421_p1 = scmp.lt.s32.totalorder %s7419_s2, %s7415_s8 }
 0x171   :  { %p7422_p2 = por %p7421_p1, %p7420_p0 }
 0x173   :  { %p7423_p3 = pnand %p7422_p2, %p7416_p13 }
 0x175   :  { %7426 = shalt.err (!%p7423_p3)
}
 0x176   :  { %s9357_s7 = sld [smem:[#allocation59_spill]] }
 0x177   :  { %251 = dma.hbm_to_vmem [thread:$0]  %s9356_s28, 48, %s249_s30, [#allocation24]  }
 0x17c   :  { %s7427_s24 = scalar_lea.hbm %s9357_s7, 16 }
 0x17d   :  { %p7428_p4 = scmp.ne.s32.totalorder %s9357_s7, %s7427_s24  ;;  %p7431_p5 = scmp.lt.u32.totalorder %s7427_s24, %s9357_s7 }
 0x17f   :  { %p7433_p6 = pnand %p7431_p5, %p7428_p4 }
 0x181   :  { %7436 = shalt.err (!%p7433_p6)
}
 0x182   :  { %s7437_s10 = scalar_lea.vmem %s271_s12, 16  ;;  %s7441_s11 = scalar_lea.vmem %s271_s12, 32 }
 0x183   :  { %p7438_p7 = scmp.ne.s32.totalorder %s271_s12, %s7437_s10  ;;  %p7442_p8 = scmp.lt.s32.totalorder %s271_s12, %s271_s12 }
 0x184   :  { %p7443_p9 = scmp.lt.s32.totalorder %s7441_s11, %s7437_s10 }
 0x186   :  { %p7444_p10 = por %p7443_p9, %p7442_p8 }
 0x188   :  { %p7445_p11 = pnand %p7444_p10, %p7438_p7 }
 0x18a   :  { %7448 = shalt.err (!%p7445_p11)
}
 0x18b   :  { %s9358_s3 = sld [smem:[#allocation60_spill]]  ;;  %s7593_s19 = smov [#allocation31]  }
 0x18c   :  { %273 = dma.hbm_to_vmem [thread:$0]  %s9357_s7, 16, %s271_s12, [#allocation27]  }
 0x18d   :  { %s290_s29 = sshll.u32 %s7593_s19, 4  ;;  %s7594_s16 = smov [#allocation34]   ;;  %s291_s29 = int_to_ptr.vmem [resolvable:$true] %s290_s29 }
 0x18e   :  { %s314_s18 = sshll.u32 %s7594_s16, 4  ;;  %s315_s18 = int_to_ptr.vmem [resolvable:$true] %s314_s18 }
 0x191   :  { %s7449_s6 = scalar_lea.hbm %s9358_s3, 16 }
 0x192   :  { %p7450_p12 = scmp.ne.s32.totalorder %s9358_s3, %s7449_s6  ;;  %p7453_p13 = scmp.lt.u32.totalorder %s7449_s6, %s9358_s3 }
 0x194   :  { %p7455_p0 = pnand %p7453_p13, %p7450_p12 }
 0x196   :  { %7458 = shalt.err (!%p7455_p0)
}
 0x197   :  { %s7459_s4 = scalar_lea.vmem %s291_s29, 16  ;;  %s7463_s22 = scalar_lea.vmem %s291_s29, 32 }
 0x198   :  { %p7460_p1 = scmp.ne.s32.totalorder %s291_s29, %s7459_s4  ;;  %p7464_p2 = scmp.lt.s32.totalorder %s291_s29, %s291_s29 }
 0x199   :  { %p7465_p3 = scmp.lt.s32.totalorder %s7463_s22, %s7459_s4 }
 0x19b   :  { %p7466_p4 = por %p7465_p3, %p7464_p2 }
 0x19d   :  { %p7467_p5 = pnand %p7466_p4, %p7460_p1 }
 0x19f   :  { %7470 = shalt.err (!%p7467_p5)
}
 0x1a0   :  { %293 = dma.hbm_to_vmem [thread:$0]  %s9358_s3, 16, %s291_s29, [#allocation30]  }
 0x1a1   :  { %s7471_s23 = scalar_lea.hbm %s7757_s9, 16 }
 0x1a2   :  { %p7472_p6 = scmp.ne.s32.totalorder %s7757_s9, %s7471_s23  ;;  %p7475_p7 = scmp.lt.u32.totalorder %s7471_s23, %s7757_s9 }
 0x1a4   :  { %p7477_p8 = pnand %p7475_p7, %p7472_p6 }
 0x1a6   :  { %7480 = shalt.err (!%p7477_p8)
}
 0x1a7   :  { %s7481_s25 = scalar_lea.vmem %s315_s18, 16  ;;  %s7485_s26 = scalar_lea.vmem %s315_s18, 32 }
 0x1a8   :  { %p7482_p9 = scmp.ne.s32.totalorder %s315_s18, %s7481_s25  ;;  %p7486_p10 = scmp.lt.s32.totalorder %s315_s18, %s315_s18 }
 0x1a9   :  { %p7487_p11 = scmp.lt.s32.totalorder %s7485_s26, %s7481_s25 }
 0x1ab   :  { %p7488_p12 = por %p7487_p11, %p7486_p10 }
 0x1ad   :  { %p7489_p13 = pnand %p7488_p12, %p7482_p9 }
 0x1af   :  { %7492 = shalt.err (!%p7489_p13)
}
 0x1b0   :  { %317 = dma.hbm_to_vmem [thread:$0]  %s7757_s9, 16, %s315_s18, [#allocation33]  }
 0x1b1   :  { %7515 = dma.done.wait [#allocation3], 1024  }
 0x1b2   :  { %7516 = vsyncadd [#allocation3], 4294966272 }
 0x1b3   :  { %7517 = dma.done.wait [#allocation6], 32  }
 0x1b4   :  { %7518 = vsyncadd [#allocation6], 4294967264 }
 0x1b5   :  { %7519 = dma.done.wait [#allocation9], 32  }
 0x1b6   :  { %7520 = vsyncadd [#allocation9], 4294967264 }
 0x1b7   :  { %7521 = dma.done.wait [#allocation12], 32  }
 0x1b8   :  { %7522 = vsyncadd [#allocation12], 4294967264 }
 0x1b9   :  { %7523 = dma.done.wait [#allocation15], 64  }
 0x1ba   :  { %7524 = vsyncadd [#allocation15], 4294967232 }
 0x1bb   :  { %7525 = dma.done.wait [#allocation18], 2064  }
 0x1bc   :  { %7526 = vsyncadd [#allocation18], 4294965232 }
 0x1bd   :  { %7527 = dma.done.wait [#allocation21], 32  }
 0x1be   :  { %7528 = vsyncadd [#allocation21], 4294967264 }
 0x1bf   :  { %7529 = dma.done.wait [#allocation24], 6192  }
 0x1c0   :  { %7530 = vsyncadd [#allocation24], 4294961104 }
 0x1c1   :  { %7531 = dma.done.wait [#allocation27], 2064  }
 0x1c2   :  { %7532 = vsyncadd [#allocation27], 4294965232 }
 0x1c3   :  { %7533 = dma.done.wait [#allocation30], 32  }
 0x1c4   :  { %7534 = vsyncadd [#allocation30], 4294967264 }
 0x1c5   :  { %7535 = dma.done.wait [#allocation33], 32  }
 0x1c6   :  { %7536 = vsyncadd [#allocation33], 4294967264  ;;  %s9359_s9 = sld [smem:[#allocation52_spill]]  ;;  %s9360_s5 = sld [smem:[#allocation48_spill]]  ;;  %vm447_vm0 = vcmask 1044480   ;;  %vm422_vm1 = vcmask 39936  }
 0x1c7   :  { %s9361_s27 = sld [smem:[#allocation53_spill]]  ;;  %v5037_v33 = vld [vmem:[#allocation5] ss:$0 sm:$0xff]  ;;  %s9362_s14 = sld [smem:[#allocation49_spill]]  ;;  %vm684_vm2 = vcmask 523264  }
 0x1c8   :  { %s9363_s21 = sld [smem:[#allocation54_spill]]  ;;  %s9364_s0 = sld [smem:[#allocation55_spill]] }
 0x1c9   :  { %s9365_s28 = sld [smem:[#allocation51_spill]]  ;;  %s9366_s1 = sld [smem:[#allocation50_spill]] }
 0x1ca   :  { %s9367_s30 = sld [smem:[#allocation61_spill]] }
 0x1cc   :  { %v414_v0 = vld [vmem:[%s9359_s9] sm:$0x1f]  ;;  %v407_v2 = vld [vmem:[%s9360_s5 + $0x8] sm:$0xff]  ;;  %v408_v3 = vld [vmem:[%s9360_s5 + $0x10] sm:$0xff] }
 0x1cd   :  { %v406_v1 = vld [vmem:[%s9360_s5] sm:$0xff]  ;;  %5525 = vmatprep.subr.msk.mxu1 %vm447_vm0, %v414_v0  ;;  %v557_v5 = vld [vmem:[%s9361_s27 + $0x8] sm:$0xff]  ;;  %v558_v6 = vld [vmem:[%s9361_s27 + $0x10] sm:$0xff] }
 0x1ce   :  { %5527 = vmatprep.mubr.msk.f32.mxu1 %vm422_vm1, %v406_v1  ;;  %5526 = vmatpush3.msk.msra.mxu1 %vm447_vm0, %v414_v0  ;;  %v556_v4 = vld [vmem:[%s9361_s27] sm:$0xff]  ;;  %v409_v7 = vld [vmem:[%s9360_s5 + $0x18] sm:$0xff]  ;;  %v561_v13 = vld [vmem:[%s9361_s27 + $0x28] sm:$0xff] }
 0x1cf   :  { %5528 = vmatmul.mubr.msk.f32.vlgmr.msra.gmra.mrb[0].mxu1 %vm422_vm1, %v407_v2  ;;  %v6217_v8 = vpack.c.bf16 %v557_v5, %v556_v4  ;;  %v559_v9 = vld [vmem:[%s9361_s27 + $0x18] sm:$0xff]  ;;  %v410_v10 = vld [vmem:[%s9360_s5 + $0x20] sm:$0xff]  ;;  %v411_v14 = vld [vmem:[%s9360_s5 + $0x28] sm:$0xff] }
 0x1d0   :  { %5530 = vmatprep.mubr.msk.f32.mxu1 %vm422_vm1, %v408_v3  ;;  %v6221_v11 = vpack.c.bf16 %v559_v9, %v558_v6  ;;  %v560_v12 = vld [vmem:[%s9361_s27 + $0x20] sm:$0xff]  ;;  %v412_v15 = vld [vmem:[%s9360_s5 + $0x30] sm:$0xff]  ;;  %v563_v18 = vld [vmem:[%s9361_s27 + $0x38] sm:$0xff] }
 0x1d1   :  { %6218 = vmatprep.subr.bf16.mxu1 %v6217_v8  ;;  %v6225_v16 = vpack.c.bf16 %v561_v13, %v560_v12  ;;  %v562_v17 = vld [vmem:[%s9361_s27 + $0x30] sm:$0xff]  ;;  %v413_v19 = vld [vmem:[%s9360_s5 + $0x38] sm:$0xff]  ;;  %v564_v21 = vld [vmem:[%s9361_s27 + $0x40] sm:$0xff] }
 0x1d2   :  { %6220 = vmatpush3.bf16.msra.mxu1 %v6217_v8  ;;  %v6229_v20 = vpack.c.bf16 %v563_v18, %v562_v17  ;;  %v565_v22 = vld [vmem:[%s9361_s27 + $0x48] sm:$0xff]  ;;  %v566_v24 = vld [vmem:[%s9361_s27 + $0x50] sm:$0xff]  ;;  %v567_v25 = vld [vmem:[%s9361_s27 + $0x58] sm:$0xff] }
 0x1d3   :  { %5531 = vmatmul.mubr.msk.f32.gmra.mrb[2].mxu1 %vm422_vm1, %v409_v7  ;;  %6222 = vmatprep.subr.bf16.mxu1 %v6221_v11  ;;  %v6233_v23 = vpack.c.bf16 %v565_v22, %v564_v21  ;;  %v6237_v26 = vpack.c.bf16 %v567_v25, %v566_v24  ;;  %v568_v27 = vld [vmem:[%s9361_s27 + $0x60] sm:$0xff]  ;;  %v569_v28 = vld [vmem:[%s9361_s27 + $0x68] sm:$0xff]  ;;  %v570_v30 = vld [vmem:[%s9361_s27 + $0x70] sm:$0xff] }
 0x1d4   :  { %5533 = vmatprep.mubr.msk.f32.mxu1 %vm422_vm1, %v410_v10  ;;  %v6241_v29 = vpack.c.bf16 %v569_v28, %v568_v27  ;;  %v571_v31 = vld [vmem:[%s9361_s27 + $0x78] sm:$0xff]  ;;  %v381_v50 = vld [vmem:[%s9362_s14] sm:$0xff]  ;;  %v7902_v63 = vld [vmem:[%s9362_s14 + $0x8] sm:$0xff] }
 0x1d5   :  { %v6245_v32 = vpack.c.bf16 %v571_v31, %v570_v30  ;;  %5599 = vmatprep.mubr.msk.f32.mxu0 %vm684_vm2, %v381_v50  ;;  %v7905_v0 = vld [vmem:[%s9362_s14 + $0x10] sm:$0xff]  ;;  %v7912_v1 = vld [vmem:[%s9362_s14 + $0x18] sm:$0xff]  ;;  %v7915_v2 = vld [vmem:[%s9362_s14 + $0x20] sm:$0xff] }
 0x1d6   :  { %6224 = vmatpush3.bf16.msra.mxu1 %v6221_v11  ;;  %v7922_v3 = vld [vmem:[%s9362_s14 + $0x28] sm:$0xff]  ;;  %v7925_v4 = vld [vmem:[%s9362_s14 + $0x30] sm:$0xff]  ;;  %v7932_v5 = vld [vmem:[%s9362_s14 + $0x38] sm:$0xff] }
 0x1d7   :  { %5534 = vmatmul.mubr.msk.f32.gmra.mrb[4].mxu1 %vm422_vm1, %v411_v14  ;;  %6226 = vmatprep.subr.bf16.mxu1 %v6225_v16  ;;  %v1115_v6 = vld [vmem:[%s9363_s21] sm:$0xff]  ;;  %v1116_v7 = vld [vmem:[%s9363_s21 + $0x8] sm:$0xff]  ;;  %v1117_v8 = vld [vmem:[%s9363_s21 + $0x10] sm:$0xff] }
 0x1d8   :  { %5536 = vmatprep.mubr.msk.f32.mxu1 %vm422_vm1, %v412_v15  ;;  %v6265_v9 = vpack.c.bf16 %v1116_v7, %v1115_v6  ;;  %v1118_v10 = vld [vmem:[%s9363_s21 + $0x18] sm:$0xff]  ;;  %v1119_v12 = vld [vmem:[%s9363_s21 + $0x20] sm:$0xff]  ;;  %v1120_v13 = vld [vmem:[%s9363_s21 + $0x28] sm:$0xff] }
 0x1d9   :  { %v6269_v11 = vpack.c.bf16 %v1118_v10, %v1117_v8  ;;  %v6273_v14 = vpack.c.bf16 %v1120_v13, %v1119_v12  ;;  %v1121_v15 = vld [vmem:[%s9363_s21 + $0x30] sm:$0xff]  ;;  %v1123_v18 = vld [vmem:[%s9363_s21 + $0x40] sm:$0xff]  ;;  %v1126_v22 = vld [vmem:[%s9363_s21 + $0x58] sm:$0xff] }
 0x1da   :  { %6228 = vmatpush3.bf16.msra.mxu1 %v6225_v16  ;;  %v1122_v16 = vld [vmem:[%s9363_s21 + $0x38] sm:$0xff]  ;;  %v1125_v21 = vld [vmem:[%s9363_s21 + $0x50] sm:$0xff]  ;;  %v1127_v24 = vld [vmem:[%s9363_s21 + $0x60] sm:$0xff] }
 0x1db   :  { %5537 = vmatmul.mubr.msk.f32.gmra.mrb[6].mxu1 %vm422_vm1, %v413_v19  ;;  %6230 = vmatprep.subr.bf16.mxu1 %v6229_v20  ;;  %v6277_v17 = vpack.c.bf16 %v1122_v16, %v1121_v15  ;;  %v1124_v19 = vld [vmem:[%s9363_s21 + $0x48] sm:$0xff]  ;;  %v1129_v27 = vld [vmem:[%s9363_s21 + $0x70] sm:$0xff]  ;;  %v1130_v28 = vld [vmem:[%s9363_s21 + $0x78] sm:$0xff] }
 0x1dc   :  { %v1128_v25 = vld [vmem:[%s9363_s21 + $0x68] sm:$0xff]  ;;  %v5047_v30 = vld [vmem:[#allocation7] ss:$0 sm:$0xff] }
 0x1de   :  { %6232 = vmatpush3.bf16.msra.mxu1 %v6229_v20  ;;  %v6281_v20 = vpack.c.bf16 %v1124_v19, %v1123_v18 }
 0x1df   :  { %6234 = vmatprep.subr.bf16.mxu1 %v6233_v23 }
 0x1e2   :  { %6236 = vmatpush3.bf16.msra.mxu1 %v6233_v23  ;;  %v6285_v23 = vpack.c.bf16 %v1126_v22, %v1125_v21 }
 0x1e3   :  { %6238 = vmatprep.subr.bf16.mxu1 %v6237_v26 }
 0x1e6   :  { %6240 = vmatpush3.bf16.msra.mxu1 %v6237_v26  ;;  %v6289_v26 = vpack.c.bf16 %v1128_v25, %v1127_v24 }
 0x1e7   :  { %6242 = vmatprep.subr.bf16.mxu1 %v6241_v29 }
 0x1ea   :  { %6244 = vmatpush3.bf16.msra.mxu1 %v6241_v29  ;;  %v6293_v29 = vpack.c.bf16 %v1130_v28, %v1129_v27 }
 0x1eb   :  { %6246 = vmatprep.subr.bf16.mxu1 %v6245_v32 }
 0x1ee   :  { %6248 = vmatpush3.bf16.msra.mxu1 %v6245_v32 }
 0x2a2   :  { %v5529_v34 = vpop.f32.mrb[0].mxu1 }
 0x2a3   :  { %v517_v35 = vpop.f32.mrb[1].mxu1  ;;  %v523_v37 = vadd.f32 %v5529_v34, %v5037_v33 }
 0x2a4   :  { %v518_v36 = vadd.f32 %v5037_v33, %v517_v35 }
 0x2a6   :  { %v5532_v38 = vpop.f32.mrb[2].mxu1  ;;  %5571 = vmatprep.mubr.f32.mxu1 %v518_v36 }
 0x2a7   :  { %v527_v39 = vpop.f32.mrb[3].mxu1  ;;  %5572 = vmatmul.mubr.f32.vlgmr.msra.gmra.mrb[8].mxu1 %v523_v37  ;;  %v533_v41 = vadd.f32 %v5532_v38, %v5037_v33 }
 0x2a8   :  { %v528_v40 = vadd.f32 %v5037_v33, %v527_v39 }
 0x2aa   :  { %v5535_v42 = vpop.f32.mrb[4].mxu1  ;;  %5574 = vmatprep.mubr.f32.mxu1 %v528_v40 }
 0x2ab   :  { %v537_v43 = vpop.f32.mrb[5].mxu1  ;;  %5575 = vmatmul.mubr.f32.gmra.mrb[10].mxu1 %v533_v41  ;;  %v543_v45 = vadd.f32 %v5535_v42, %v5037_v33 }
 0x2ac   :  { %v538_v44 = vadd.f32 %v5037_v33, %v537_v43 }
 0x2ae   :  { %v5538_v46 = vpop.f32.mrb[6].mxu1  ;;  %5577 = vmatprep.mubr.f32.mxu1 %v538_v44 }
 0x2af   :  { %v547_v47 = vpop.f32.mrb[7].mxu1  ;;  %5578 = vmatmul.mubr.f32.gmra.mrb[12].mxu1 %v543_v45  ;;  %v553_v49 = vadd.f32 %v5538_v46, %v5037_v33 }
 0x2b0   :  { %v548_v48 = vadd.f32 %v5037_v33, %v547_v47 }
 0x2b2   :  { %5580 = vmatprep.mubr.f32.mxu1 %v548_v48 }
 0x2b3   :  { %5581 = vmatmul.mubr.f32.gmra.mrb[14].mxu1 %v553_v49 }
 0x2b4   :  { %5671 = vmatprep.mubr.msk.f32.mxu1 %vm684_vm2, %v381_v50 }
 0x37a   :  { %v5573_v51 = vpop.f32.mrb[8].mxu1 }
 0x37b   :  { %v638_v52 = vpop.f32.mrb[9].mxu1 }
 0x37c   :  { %v6249_v53 = vpack.c.bf16 %v5573_v51, %v638_v52 }
 0x37e   :  { %v5576_v54 = vpop.f32.mrb[10].mxu1  ;;  %6250 = vmatprep.subr.bf16.mxu0 %v6249_v53 }
 0x37f   :  { %v648_v55 = vpop.f32.mrb[11].mxu1  ;;  %6252 = vmatpush3.bf16.msra.mxu0 %v6249_v53 }
 0x380   :  { %v6253_v56 = vpack.c.bf16 %v5576_v54, %v648_v55 }
 0x382   :  { %v5579_v57 = vpop.f32.mrb[12].mxu1  ;;  %6254 = vmatprep.subr.bf16.mxu0 %v6253_v56 }
 0x383   :  { %v658_v58 = vpop.f32.mrb[13].mxu1  ;;  %6256 = vmatpush3.bf16.msra.mxu0 %v6253_v56 }
 0x384   :  { %v6257_v59 = vpack.c.bf16 %v5579_v57, %v658_v58 }
 0x386   :  { %v5582_v60 = vpop.f32.mrb[14].mxu1  ;;  %6258 = vmatprep.subr.bf16.mxu0 %v6257_v59 }
 0x387   :  { %v668_v61 = vpop.f32.mrb[15].mxu1  ;;  %6260 = vmatpush3.bf16.msra.mxu0 %v6257_v59 }
 0x388   :  { %v6261_v62 = vpack.c.bf16 %v5582_v60, %v668_v61 }
 0x38a   :  { %6262 = vmatprep.subr.bf16.mxu0 %v6261_v62 }
 0x38b   :  { %6264 = vmatpush3.bf16.msra.mxu0 %v6261_v62 }
 0x38c   :  { %6266 = vmatprep.subr.bf16.mxu0 %v6265_v9 }
 0x38e   :  { %5600 = vmatmul.mubr.msk.f32.vlgmr.msra.gmra.mrb[0].mxu0 %vm684_vm2, %v7902_v63 }
 0x38f   :  { %5602 = vmatprep.mubr.msk.f32.mxu0 %vm684_vm2, %v7905_v0  ;;  %6268 = vmatpush3.bf16.msra.mxu0 %v6265_v9 }
 0x390   :  { %6270 = vmatprep.subr.bf16.mxu0 %v6269_v11 }
 0x392   :  { %5603 = vmatmul.mubr.msk.f32.gmra.mrb[2].mxu0 %vm684_vm2, %v7912_v1 }
 0x393   :  { %5605 = vmatprep.mubr.msk.f32.mxu0 %vm684_vm2, %v7915_v2  ;;  %6272 = vmatpush3.bf16.msra.mxu0 %v6269_v11 }
 0x394   :  { %6274 = vmatprep.subr.bf16.mxu0 %v6273_v14 }
 0x396   :  { %5606 = vmatmul.mubr.msk.f32.gmra.mrb[4].mxu0 %vm684_vm2, %v7922_v3 }
 0x397   :  { %5608 = vmatprep.mubr.msk.f32.mxu0 %vm684_vm2, %v7925_v4  ;;  %6276 = vmatpush3.bf16.msra.mxu0 %v6273_v14 }
 0x398   :  { %6278 = vmatprep.subr.bf16.mxu0 %v6277_v17 }
 0x39a   :  { %5609 = vmatmul.mubr.msk.f32.gmra.mrb[6].mxu0 %vm684_vm2, %v7932_v5 }
 0x39b   :  { %6280 = vmatpush3.bf16.msra.mxu0 %v6277_v17 }
 0x39c   :  { %6282 = vmatprep.subr.bf16.mxu0 %v6281_v20 }
 0x39f   :  { %6284 = vmatpush3.bf16.msra.mxu0 %v6281_v20 }
 0x3a0   :  { %6286 = vmatprep.subr.bf16.mxu0 %v6285_v23 }
 0x3a3   :  { %6288 = vmatpush3.bf16.msra.mxu0 %v6285_v23 }
 0x3a4   :  { %6290 = vmatprep.subr.bf16.mxu0 %v6289_v26 }
 0x3a7   :  { %6292 = vmatpush3.bf16.msra.mxu0 %v6289_v26 }
 0x3a8   :  { %6294 = vmatprep.subr.bf16.mxu0 %v6293_v29 }
 0x3ab   :  { %6296 = vmatpush3.bf16.msra.mxu0 %v6293_v29 }
 0x461   :  { %v5601_v31 = vpop.f32.mrb[0].mxu0 }
 0x462   :  { %v781_v32 = vadd.f32 %v5601_v31, %v5047_v30  ;;  %v775_v33 = vpop.f32.mrb[1].mxu0 }
 0x463   :  { %v776_v34 = vadd.f32 %v5047_v30, %v775_v33 }
 0x465   :  { %v816_v35 = vadd.f32 %v781_v32, %v776_v34  ;;  %v5604_v36 = vpop.f32.mrb[2].mxu0 }
 0x466   :  { %v785_v37 = vpop.f32.mrb[3].mxu0  ;;  %v791_v39 = vadd.f32 %v5604_v36, %v5047_v30  ;;  %v5056_v36 = vld [vmem:[#allocation8] ss:$0 sm:$0xff] }
 0x467   :  { %v786_v38 = vadd.f32 %v5047_v30, %v785_v37 }
 0x469   :  { %v817_v40 = vadd.f32 %v816_v35, %v786_v38  ;;  %v5607_v41 = vpop.f32.mrb[4].mxu0 }
 0x46a   :  { %v795_v42 = vpop.f32.mrb[5].mxu0  ;;  %v801_v45 = vadd.f32 %v5607_v41, %v5047_v30  ;;  %v5057_v41 = vld [vmem:[#allocation10] ss:$0 sm:$0xff] }
 0x46b   :  { %v796_v43 = vadd.f32 %v5047_v30, %v795_v42  ;;  %v818_v44 = vadd.f32 %v817_v40, %v791_v39 }
 0x46d   :  { %v819_v46 = vadd.f32 %v818_v44, %v796_v43  ;;  %v5610_v47 = vpop.f32.mrb[6].mxu0 }
 0x46e   :  { %v805_v48 = vpop.f32.mrb[7].mxu0  ;;  %v811_v51 = vadd.f32 %v5610_v47, %v5047_v30 }
 0x46f   :  { %v806_v49 = vadd.f32 %v5047_v30, %v805_v48  ;;  %v820_v50 = vadd.f32 %v819_v46, %v801_v45 }
 0x471   :  { %v821_v52 = vadd.f32 %v820_v50, %v806_v49 }
 0x473   :  { %v822_v53 = vadd.f32 %v821_v52, %v811_v51 }
 0x475   :  { %v823_v54 = vrot.slane %v822_v53, 4 }
 0x477   :  { %v824_v55 = vadd.f32 %v823_v54, %v822_v53 }
 0x479   :  { %v825_v56 = vrot.slane %v824_v55, 2 }
 0x47b   :  { %v826_v57 = vadd.f32 %v825_v56, %v824_v55 }
 0x47d   :  { %v827_v58 = vrot.slane %v826_v57, 1 }
 0x47f   :  { %v828_v59 = vadd.f32 %v827_v58, %v826_v57 }
 0x481   :  { %v830_v60 = vmul.f32 0.015625, %v828_v59 }
 0x483   :  { %v831_v61 = vsub.f32 %v776_v34, %v830_v60  ;;  %v832_v62 = vsub.f32 %v781_v32, %v830_v60  ;;  %v833_v6 = vsub.f32 %v786_v38, %v830_v60  ;;  %v834_v7 = vsub.f32 %v791_v39, %v830_v60 }
 0x484   :  { %v835_v8 = vsub.f32 %v796_v43, %v830_v60  ;;  %v836_v9 = vsub.f32 %v801_v45, %v830_v60  ;;  %v837_v10 = vsub.f32 %v806_v49, %v830_v60  ;;  %v838_v11 = vsub.f32 %v811_v51, %v830_v60 }
 0x485   :  { %v839_v12 = vmul.f32 %v831_v61, %v831_v61  ;;  %v840_v13 = vmul.f32 %v832_v62, %v832_v62  ;;  %v841_v14 = vmul.f32 %v833_v6, %v833_v6  ;;  %v842_v16 = vmul.f32 %v834_v7, %v834_v7 }
 0x486   :  { %v843_v18 = vmul.f32 %v835_v8, %v835_v8  ;;  %v844_v20 = vmul.f32 %v836_v9, %v836_v9  ;;  %v845_v22 = vmul.f32 %v837_v10, %v837_v10  ;;  %v846_v24 = vmul.f32 %v838_v11, %v838_v11 }
 0x487   :  { %v847_v15 = vadd.f32 %v840_v13, %v839_v12 }
 0x489   :  { %v848_v17 = vadd.f32 %v847_v15, %v841_v14 }
 0x48b   :  { %v849_v19 = vadd.f32 %v848_v17, %v842_v16 }
 0x48d   :  { %v850_v21 = vadd.f32 %v849_v19, %v843_v18 }
 0x48f   :  { %v851_v23 = vadd.f32 %v850_v21, %v844_v20 }
 0x491   :  { %v852_v25 = vadd.f32 %v851_v23, %v845_v22 }
 0x493   :  { %v853_v26 = vadd.f32 %v852_v25, %v846_v24 }
 0x495   :  { %v854_v27 = vrot.slane %v853_v26, 4 }
 0x497   :  { %v855_v28 = vadd.f32 %v854_v27, %v853_v26 }
 0x499   :  { %v856_v29 = vrot.slane %v855_v28, 2 }
 0x49b   :  { %v857_v30 = vadd.f32 %v856_v29, %v855_v28 }
 0x49d   :  { %v858_v31 = vrot.slane %v857_v30, 1 }
 0x49f   :  { %v859_v32 = vadd.f32 %v858_v31, %v857_v30 }
 0x4a1   :  { %v860_v33 = vmul.f32 0.015625, %v859_v32 }
 0x4a3   :  { %v861_v34 = vadd.f32 1e-05, %v860_v33 }
 0x4a5   :  { %6745 = vrsqrt.f32 %v861_v34 }
 0x4af   :  { %v6746_v35 = vpop.eup %6745 }
 0x4b0   :  { %v869_v37 = vmul.f32 %v6746_v35, %v837_v10  ;;  %v863_v38 = vmul.f32 %v6746_v35, %v831_v61  ;;  %v864_v39 = vmul.f32 %v6746_v35, %v832_v62  ;;  %v865_v40 = vmul.f32 %v6746_v35, %v833_v6 }
 0x4b1   :  { %v866_v42 = vmul.f32 %v6746_v35, %v834_v7  ;;  %v867_v43 = vmul.f32 %v6746_v35, %v835_v8  ;;  %v868_v44 = vmul.f32 %v6746_v35, %v836_v9  ;;  %v870_v45 = vmul.f32 %v6746_v35, %v838_v11 }
 0x4b2   :  { %v877_v46 = vmul.f32 %v5056_v36, %v863_v38  ;;  %v878_v47 = vmul.f32 %v5056_v36, %v864_v39  ;;  %v879_v48 = vmul.f32 %v5056_v36, %v865_v40  ;;  %v883_v62 = vmul.f32 %v5056_v36, %v869_v37 }
 0x4b3   :  { %v880_v49 = vmul.f32 %v5056_v36, %v866_v42  ;;  %v881_v58 = vmul.f32 %v5056_v36, %v867_v43  ;;  %v882_v61 = vmul.f32 %v5056_v36, %v868_v44  ;;  %v884_v18 = vmul.f32 %v5056_v36, %v870_v45 }
 0x4b4   :  { %v891_v50 = vadd.f32 %v5057_v41, %v877_v46  ;;  %v892_v51 = vadd.f32 %v5057_v41, %v878_v47  ;;  %v893_v52 = vadd.f32 %v5057_v41, %v879_v48  ;;  %v7971_v16 = vadd.f32 %v5057_v41, %v883_v62 }
 0x4b5   :  { %v7952_v53 = vadd.f32 %v5057_v41, %v880_v49  ;;  %v7967_v11 = vadd.f32 %v5057_v41, %v881_v58  ;;  %v7969_v15 = vadd.f32 %v5057_v41, %v882_v61  ;;  %v7984_v26 = vadd.f32 %v5057_v41, %v884_v18 }
 0x4b6   :  { %v7954_v54 = vmul.f32 0.70710677, %v891_v50  ;;  %v7956_v55 = vmul.f32 0.70710677, %v892_v51  ;;  %v7958_v56 = vmul.f32 0.70710677, %v893_v52 }
 0x4b7   :  { %v7961_v57 = vmul.f32 0.70710677, %v7952_v53  ;;  %v7974_v19 = vmul.f32 0.70710677, %v7967_v11  ;;  %v7977_v21 = vmul.f32 0.70710677, %v7969_v15 }
 0x4b8   :  { %v915_v59 = vand.u32 2147483647, %v7954_v54  ;;  %v916_v60 = vand.u32 2147483647, %v7956_v55  ;;  %v917_v6 = vand.u32 2147483647, %v7958_v56 }
 0x4b9   :  { %v918_v7 = vand.u32 2147483647, %v7961_v57  ;;  %v919_v23 = vand.u32 2147483647, %v7974_v19  ;;  %v7981_v24 = vmul.f32 0.70710677, %v7971_v16 }
 0x4ba   :  { %v923_v8 = vmul.f32 0.3275911, %v915_v59  ;;  %v924_v9 = vmul.f32 0.3275911, %v916_v60  ;;  %v925_v10 = vmul.f32 0.3275911, %v917_v6 }
 0x4bb   :  { %v926_v14 = vmul.f32 0.3275911, %v918_v7  ;;  %v1027_v22 = vsub.f32 0.0, %v915_v59  ;;  %v920_v25 = vand.u32 2147483647, %v7977_v21  ;;  %v1028_v27 = vsub.f32 0.0, %v916_v60 }
 0x4bc   :  { %v931_v12 = vadd.f32 1.0, %v923_v8  ;;  %v932_v13 = vadd.f32 1.0, %v924_v9  ;;  %v933_v17 = vadd.f32 1.0, %v925_v10  ;;  %v1029_v28 = vsub.f32 0.0, %v917_v6 }
 0x4bd   :  { %v934_v20 = vadd.f32 1.0, %v926_v14  ;;  %v927_v29 = vmul.f32 0.3275911, %v919_v23  ;;  %v921_v30 = vand.u32 2147483647, %v7981_v24  ;;  %v1035_v32 = vmul.f32 %v1027_v22, %v915_v59 }
 0x4be   :  { %6747 = vrcp.f32 %v931_v12  ;;  %v928_v31 = vmul.f32 0.3275911, %v920_v25  ;;  %v1030_v33 = vsub.f32 0.0, %v918_v7  ;;  %v1031_v36 = vsub.f32 0.0, %v919_v23 }
 0x4bf   :  { %6749 = vrcp.f32 %v932_v13  ;;  %v935_v34 = vadd.f32 1.0, %v927_v29  ;;  %v929_v35 = vmul.f32 0.3275911, %v921_v30  ;;  %v7988_v38 = vmul.f32 0.70710677, %v7984_v26 }
 0x4c0   :  { %6751 = vrcp.f32 %v933_v17  ;;  %v936_v37 = vadd.f32 1.0, %v928_v31  ;;  %v1036_v39 = vmul.f32 %v1028_v27, %v916_v60  ;;  %v1037_v40 = vmul.f32 %v1029_v28, %v917_v6 }
 0x4c1   :  { %6753 = vrcp.f32 %v934_v20  ;;  %v937_v41 = vadd.f32 1.0, %v929_v35  ;;  %v7992_v43 = vmul.f32 0.5, %v891_v50  ;;  %v1032_v44 = vsub.f32 0.0, %v920_v25 }
 0x4c2   :  { %6755 = vrcp.f32 %v935_v34  ;;  %v922_v45 = vand.u32 2147483647, %v7988_v38  ;;  %v1043_v48 = vmul.f32 1.442695, %v1035_v32  ;;  %v7998_v49 = vmul.f32 0.5, %v892_v51 }
 0x4c3   :  { %6757 = vrcp.f32 %v936_v37  ;;  %v1038_v58 = vmul.f32 %v1030_v33, %v918_v7  ;;  %v8001_v60 = vmul.f32 0.5, %v893_v52  ;;  %v1039_v61 = vmul.f32 %v1031_v36, %v919_v23 }
 0x4c4   :  { %v930_v62 = vmul.f32 0.3275911, %v922_v45  ;;  %v1045_v6 = vmul.f32 1.442695, %v1036_v39  ;;  %v1047_v8 = vmul.f32 1.442695, %v1037_v40  ;;  %6759 = vrcp.f32 %v937_v41 }
 0x4c5   :  { %v1040_v12 = vmul.f32 %v1032_v44, %v920_v25  ;;  %v1033_v13 = vsub.f32 0.0, %v921_v30  ;;  %6761 = vpow2.f32 %v1043_v48  ;;  %v1049_v17 = vmul.f32 1.442695, %v1038_v58 }
 0x4c6   :  { %v938_v14 = vadd.f32 1.0, %v930_v62  ;;  %v1051_v20 = vmul.f32 1.442695, %v1039_v61  ;;  %v1034_v22 = vsub.f32 0.0, %v922_v45  ;;  %vm1075_vm3 = vcmp.ge.f32.partialorder %v7954_v54, 0.0 }
 0x4c7   :  { %v1053_v29 = vmul.f32 1.442695, %v1040_v12  ;;  %v1041_v31 = vmul.f32 %v1033_v13, %v921_v30  ;;  %vm1076_vm4 = vcmp.ge.f32.partialorder %v7956_v55, 0.0  ;;  %vm1077_vm5 = vcmp.ge.f32.partialorder %v7958_v56, 0.0 }
 0x4c8   :  { %v7990_v42 = vpop.eup %6747  ;;  %6763 = vrcp.f32 %v938_v14  ;;  %v1042_v40 = vmul.f32 %v1034_v22, %v922_v45  ;;  %vm1078_vm6 = vcmp.ge.f32.partialorder %v7961_v57, 0.0  ;;  %vm1079_vm7 = vcmp.ge.f32.partialorder %v7974_v19, 0.0 }
 0x4c9   :  { %v7995_v46 = vpop.eup %6749  ;;  %v955_v47 = vmul.f32 1.0614054, %v7990_v42  ;;  %6765 = vpow2.f32 %v1045_v6  ;;  %vm1080_vm8 = vcmp.ge.f32.partialorder %v7977_v21, 0.0  ;;  %v903_v57 = vmul.f32 0.5, %v7967_v11 }
 0x4ca   :  { %v956_v59 = vmul.f32 1.0614054, %v7995_v46  ;;  %v8003_v9 = vpop.eup %6751  ;;  %6767 = vpow2.f32 %v1047_v8  ;;  %v1057_v13 = vmul.f32 1.442695, %v1042_v40  ;;  %vm1081_vm9 = vcmp.ge.f32.partialorder %v7981_v24, 0.0 }
 0x4cb   :  { %v963_v50 = vadd.f32 -1.4531521, %v955_v47  ;;  %v957_v7 = vmul.f32 1.0614054, %v8003_v9  ;;  %v8007_v52 = vpop.eup %6753  ;;  %6769 = vpow2.f32 %v1049_v17  ;;  %v905_v21 = vmul.f32 0.5, %v7971_v16 }
 0x4cc   :  { %v964_v10 = vadd.f32 -1.4531521, %v956_v59  ;;  %v958_v25 = vmul.f32 1.0614054, %v8007_v52  ;;  %v8011_v32 = vpop.eup %6755  ;;  %6771 = vpow2.f32 %v1051_v20  ;;  %v1055_v59 = vmul.f32 1.442695, %v1041_v31 }
 0x4cd   :  { %v971_v51 = vmul.f32 %v7990_v42, %v963_v50  ;;  %v965_v27 = vadd.f32 -1.4531521, %v957_v7  ;;  %v8015_v36 = vpop.eup %6757  ;;  %v959_v39 = vmul.f32 1.0614054, %v8011_v32  ;;  %6773 = vpow2.f32 %v1053_v29 }
 0x4ce   :  { %v972_v18 = vmul.f32 %v7995_v46, %v964_v10  ;;  %v966_v35 = vadd.f32 -1.4531521, %v958_v25  ;;  %v960_v47 = vmul.f32 1.0614054, %v8015_v36  ;;  %v8021_v61 = vpop.eup %6759  ;;  %6775 = vpow2.f32 %v1055_v59 }
 0x4cf   :  { %v979_v23 = vadd.f32 1.4214138, %v971_v51  ;;  %v973_v34 = vmul.f32 %v8003_v9, %v965_v27  ;;  %v967_v58 = vadd.f32 -1.4531521, %v959_v39  ;;  %v961_v12 = vmul.f32 1.0614054, %v8021_v61  ;;  %v6762_v14 = vpop.eup %6761 }
 0x4d0   :  { %v980_v28 = vadd.f32 1.4214138, %v972_v18  ;;  %v974_v30 = vmul.f32 %v8007_v52, %v966_v35  ;;  %v968_v8 = vadd.f32 -1.4531521, %v960_v47  ;;  %6777 = vpow2.f32 %v1057_v13 }
 0x4d1   :  { %v987_v33 = vmul.f32 %v7990_v42, %v979_v23  ;;  %v981_v44 = vadd.f32 1.4214138, %v973_v34  ;;  %v975_v10 = vmul.f32 %v8011_v32, %v967_v58  ;;  %v969_v27 = vadd.f32 -1.4531521, %v961_v12 }
 0x4d2   :  { %v988_v37 = vmul.f32 %v7995_v46, %v980_v28  ;;  %v982_v6 = vadd.f32 1.4214138, %v974_v30  ;;  %v976_v18 = vmul.f32 %v8015_v36, %v968_v8  ;;  %v8030_v20 = vpop.eup %6763  ;;  %vm1082_vm10 = vcmp.ge.f32.partialorder %v7988_v38, 0.0 }
 0x4d3   :  { %v995_v41 = vadd.f32 -0.28449672, %v987_v33  ;;  %v989_v50 = vmul.f32 %v8003_v9, %v981_v44  ;;  %v983_v23 = vadd.f32 1.4214138, %v975_v10  ;;  %v6766_v25 = vpop.eup %6765  ;;  %v977_v39 = vmul.f32 %v8021_v61, %v969_v27 }
 0x4d4   :  { %v996_v48 = vadd.f32 -0.28449672, %v988_v37  ;;  %v990_v17 = vmul.f32 %v8007_v52, %v982_v6  ;;  %v984_v33 = vadd.f32 1.4214138, %v976_v18  ;;  %v6768_v34 = vpop.eup %6767  ;;  %v962_v40 = vmul.f32 1.0614054, %v8030_v20 }
 0x4d5   :  { %v1003_v62 = vmul.f32 %v7990_v42, %v995_v41  ;;  %v997_v7 = vadd.f32 -0.28449672, %v989_v50  ;;  %v991_v37 = vmul.f32 %v8011_v32, %v983_v23  ;;  %v6770_v41 = vpop.eup %6769  ;;  %v906_v24 = vmul.f32 0.5, %v7984_v26 }
 0x4d6   :  { %v1004_v45 = vmul.f32 %v7995_v46, %v996_v48  ;;  %v998_v31 = vadd.f32 -0.28449672, %v990_v17  ;;  %v992_v47 = vmul.f32 %v8015_v36, %v984_v33  ;;  %v6772_v48 = vpop.eup %6771 }
 0x4d7   :  { %v1011_v51 = vadd.f32 0.2548296, %v1003_v62  ;;  %v1005_v29 = vmul.f32 %v8003_v9, %v997_v7  ;;  %v999_v59 = vadd.f32 -0.28449672, %v991_v37  ;;  %v985_v62 = vadd.f32 1.4214138, %v977_v39  ;;  %v6774_v10 = vpop.eup %6773 }
 0x4d8   :  { %v1012_v22 = vadd.f32 0.2548296, %v1004_v45  ;;  %v1000_v45 = vadd.f32 -0.28449672, %v992_v47 }
 0x4d9   :  { %v1019_v28 = vmul.f32 %v7990_v42, %v1011_v51  ;;  %v1013_v30 = vadd.f32 0.2548296, %v1005_v29  ;;  %v1006_v42 = vmul.f32 %v8007_v52, %v998_v31  ;;  %v993_v51 = vmul.f32 %v8021_v61, %v985_v62 }
 0x4da   :  { %v1020_v35 = vmul.f32 %v7995_v46, %v1012_v22  ;;  %v970_v46 = vadd.f32 -1.4531521, %v962_v40  ;;  %v1008_v22 = vmul.f32 %v8015_v36, %v1000_v45 }
 0x4db   :  { %v1059_v44 = vmul.f32 %v6762_v14, %v1019_v28  ;;  %v1021_v6 = vmul.f32 %v8003_v9, %v1013_v30  ;;  %v1014_v8 = vadd.f32 0.2548296, %v1006_v42  ;;  %v1007_v14 = vmul.f32 %v8011_v32, %v999_v59 }
 0x4dc   :  { %v1060_v58 = vmul.f32 %v6766_v25, %v1020_v35  ;;  %v1001_v9 = vadd.f32 -0.28449672, %v993_v51  ;;  %v978_v25 = vmul.f32 %v8030_v20, %v970_v46  ;;  %v1016_v33 = vadd.f32 0.2548296, %v1008_v22  ;;  %v6776_v35 = vpop.eup %6775 }
 0x4dd   :  { %v1067_v50 = vsub.f32 1.0, %v1059_v44  ;;  %v1061_v17 = vmul.f32 %v6768_v34, %v1021_v6  ;;  %v1022_v18 = vmul.f32 %v8007_v52, %v1014_v8  ;;  %v1015_v27 = vadd.f32 0.2548296, %v1007_v14 }
 0x4de   :  { %v1068_v12 = vsub.f32 1.0, %v1060_v58  ;;  %v1009_v34 = vmul.f32 %v8021_v61, %v1001_v9  ;;  %v1024_v30 = vmul.f32 %v8015_v36, %v1016_v33 }
 0x4df   :  { %v1083_v7 = vsub.f32 0.0, %v1067_v50  ;;  %v1069_v29 = vsub.f32 1.0, %v1061_v17  ;;  %v1062_v31 = vmul.f32 %v6770_v41, %v1022_v18  ;;  %v1023_v52 = vmul.f32 %v8011_v32, %v1015_v27 }
 0x4e0   :  { %v1084_v23 = vsub.f32 0.0, %v1068_v12  ;;  %v1017_v47 = vadd.f32 0.2548296, %v1009_v34  ;;  %v986_v41 = vadd.f32 1.4214138, %v978_v25  ;;  %v1064_v62 = vmul.f32 %v6774_v10, %v1024_v30 }
 0x4e1   :  { %v1091_v28 = vsel %vm1075_vm3, %v1067_v50, %v1083_v7  ;;  %v1085_v40 = vsub.f32 0.0, %v1069_v29  ;;  %v1070_v44 = vsub.f32 1.0, %v1062_v31  ;;  %v1063_v42 = vmul.f32 %v6772_v48, %v1023_v52 }
 0x4e2   :  { %v1099_v37 = vadd.f32 1.0, %v1091_v28  ;;  %v1092_v13 = vsel %vm1076_vm4, %v1068_v12, %v1084_v23  ;;  %v1025_v50 = vmul.f32 %v8021_v61, %v1017_v47  ;;  %v994_v6 = vmul.f32 %v8030_v20, %v986_v41  ;;  %v5058_v47 = vld [vmem:[#allocation11] ss:$0 sm:$0xff] }
 0x4e3   :  { %v1100_v39 = vadd.f32 1.0, %v1092_v13  ;;  %v1093_v55 = vsel %vm1077_vm5, %v1069_v29, %v1085_v40  ;;  %v1086_v59 = vsub.f32 0.0, %v1070_v44  ;;  %v1071_v46 = vsub.f32 1.0, %v1063_v42 }
 0x4e4   :  { %v1107_v54 = vmul.f32 %v1099_v37, %v7992_v43  ;;  %v1101_v32 = vadd.f32 1.0, %v1093_v55  ;;  %v902_v43 = vmul.f32 0.5, %v7952_v53  ;;  %v1072_v48 = vsub.f32 1.0, %v1064_v62 }
 0x4e5   :  { %v1108_v58 = vmul.f32 %v1100_v39, %v7998_v49  ;;  %v1094_v36 = vsel %vm1078_vm6, %v1070_v44, %v1086_v59  ;;  %v6778_v49 = vpop.eup %6777  ;;  %v1087_v45 = vsub.f32 0.0, %v1071_v46  ;;  %v1065_v10 = vmul.f32 %v6776_v35, %v1025_v50 }
 0x4e6   :  { %5643 = vmatprep.mubr.f32.mxu0 %v1107_v54  ;;  %v1109_v56 = vmul.f32 %v1101_v32, %v8001_v60  ;;  %v1102_v8 = vadd.f32 1.0, %v1094_v36  ;;  %v1088_v12 = vsub.f32 0.0, %v1072_v48  ;;  %v1002_v14 = vadd.f32 -0.28449672, %v994_v6 }
 0x4e7   :  { %5644 = vmatmul.mubr.f32.vlgmr.msra.gmra.mrb[8].mxu0 %v1108_v58  ;;  %v1095_v51 = vsel %vm1079_vm7, %v1071_v46, %v1087_v45  ;;  %v1073_v53 = vsub.f32 1.0, %v1065_v10  ;;  %v904_v60 = vmul.f32 0.5, %v7969_v15  ;;  %vm2246_vm4 = vcmask 261120  }
 0x4e8   :  { %5646 = vmatprep.mubr.f32.mxu0 %v1109_v56  ;;  %v1110_v61 = vmul.f32 %v1102_v8, %v902_v43  ;;  %v1103_v7 = vadd.f32 1.0, %v1095_v51  ;;  %v1096_v17 = vsel %vm1080_vm8, %v1072_v48, %v1088_v12  ;;  %v1010_v18 = vmul.f32 %v8030_v20, %v1002_v14 }
 0x4e9   :  { %v1104_v22 = vadd.f32 1.0, %v1096_v17  ;;  %v1089_v23 = vsub.f32 0.0, %v1073_v53  ;;  %vm3979_vm5 = vcmask 1043456   ;;  %vm3894_vm6 = vcmask 31744  }
 0x4ea   :  { %v1111_v19 = vmul.f32 %v1103_v7, %v903_v57  ;;  %v1018_v27 = vadd.f32 0.2548296, %v1010_v18  ;;  %vm7597_vm7 = vmmov 0   ;;  %vm4778_vm8 = vcmask 1041409  }
 0x4eb   :  { %5647 = vmatmul.mubr.f32.gmra.mrb[10].mxu0 %v1110_v61  ;;  %v1112_v9 = vmul.f32 %v1104_v22, %v904_v60  ;;  %v1097_v25 = vsel %vm1081_vm9, %v1073_v53, %v1089_v23  ;;  %v1648_v61 = vld [vmem:[#allocation2] sm:$0xff] }
 0x4ec   :  { %5649 = vmatprep.mubr.f32.mxu0 %v1111_v19  ;;  %v1105_v28 = vadd.f32 1.0, %v1097_v25  ;;  %v1026_v11 = vmul.f32 %v8030_v20, %v1018_v27 }
 0x4ee   :  { %v1113_v29 = vmul.f32 %v1105_v28, %v905_v21  ;;  %v1066_v31 = vmul.f32 %v6778_v49, %v1026_v11 }
 0x4ef   :  { %5650 = vmatmul.mubr.f32.gmra.mrb[12].mxu0 %v1112_v9 }
 0x4f0   :  { %5652 = vmatprep.mubr.f32.mxu0 %v1113_v29  ;;  %v1074_v33 = vsub.f32 1.0, %v1066_v31 }
 0x4f2   :  { %v1090_v15 = vsub.f32 0.0, %v1074_v33 }
 0x4f4   :  { %v1098_v35 = vsel %vm1082_vm10, %v1074_v33, %v1090_v15  ;;  %v1786_v33 = vld [vmem:[%s9364_s0 + $0x8] sm:$0xff]  ;;  %v1789_v15 = vld [vmem:[%s9364_s0 + $0x20] sm:$0xff]  ;;  %vm4966_vm10 = vcmask 9216  }
 0x4f5   :  { %v1106_v37 = vadd.f32 1.0, %v1098_v35  ;;  %v1785_v35 = vld [vmem:[%s9364_s0] sm:$0xff] }
 0x4f7   :  { %v1114_v13 = vmul.f32 %v1106_v37, %v906_v24  ;;  %v6329_v24 = vpack.c.bf16 %v1789_v15, %v1786_v33  ;;  %v1788_v37 = vld [vmem:[%s9364_s0 + $0x18] sm:$0xff]  ;;  %v1831_v15 = vld [vmem:[%s9364_s0 + $0x170] sm:$0xff] }
 0x4f8   :  { %v1828_v33 = vld [vmem:[%s9364_s0 + $0x158] sm:$0xff] }
 0x4f9   :  { %5653 = vmatmul.mubr.f32.gmra.mrb[14].mxu0 %v1114_v13  ;;  %6330 = vmatprep.subr.bf16.mxu0 %v6329_v24 }
 0x5ba   :  { %v5645_v52 = vpop.f32.mrb[8].mxu0 }
 0x5bb   :  { %v1197_v34 = vpop.f32.mrb[9].mxu0 }
 0x5bc   :  { %v6297_v16 = vpack.c.bf16 %v5645_v52, %v1197_v34  ;;  %v6331_v34 = vpack.c.bf16 %v1788_v37, %v1785_v35  ;;  %v6357_v37 = vpack.c.bf16 %v1831_v15, %v1828_v33 }
 0x5be   :  { %6298 = vmatprep.subr.bf16.mxu1 %v6297_v16  ;;  %v5648_v39 = vpop.f32.mrb[10].mxu0  ;;  %6332 = vmatpush1.bf16.msra.mxu0 %v6331_v34 }
 0x5bf   :  { %6300 = vmatpush3.bf16.msra.mxu1 %v6297_v16  ;;  %v1207_v20 = vpop.f32.mrb[11].mxu0  ;;  %v1792_v16 = vld [vmem:[%s9364_s0 + $0x38] sm:$0xff] }
 0x5c0   :  { %v6301_v40 = vpack.c.bf16 %v5648_v39, %v1207_v20  ;;  %v1795_v39 = vld [vmem:[%s9364_s0 + $0x50] sm:$0xff] }
 0x5c1   :  { %v1791_v20 = vld [vmem:[%s9364_s0 + $0x30] sm:$0xff] }
 0x5c2   :  { %v5651_v44 = vpop.f32.mrb[12].mxu0  ;;  %6302 = vmatprep.subr.bf16.mxu1 %v6301_v40 }
 0x5c3   :  { %v1217_v30 = vpop.f32.mrb[13].mxu0  ;;  %6304 = vmatpush3.bf16.msra.mxu1 %v6301_v40  ;;  %v6333_v40 = vpack.c.bf16 %v1795_v39, %v1792_v16 }
 0x5c4   :  { %v6305_v54 = vpack.c.bf16 %v5651_v44, %v1217_v30  ;;  %v1794_v44 = vld [vmem:[%s9364_s0 + $0x48] sm:$0xff] }
 0x5c5   :  { %6334 = vmatprep.subr.bf16.mxu0 %v6333_v40 }
 0x5c6   :  { %6306 = vmatprep.subr.bf16.mxu1 %v6305_v54 }
 0x5c7   :  { %6308 = vmatpush3.bf16.msra.mxu1 %v6305_v54 }
 0x5cc   :  { %v5654_v38 = vpop.f32.mrb[14].mxu0 }
 0x5cd   :  { %v1227_v26 = vpop.f32.mrb[15].mxu0 }
 0x5ce   :  { %v6309_v42 = vpack.c.bf16 %v5654_v38, %v1227_v26  ;;  %v6335_v38 = vpack.c.bf16 %v1794_v44, %v1791_v20  ;;  %v1798_v26 = vld [vmem:[%s9364_s0 + $0x68] sm:$0xff] }
 0x5cf   :  { %v5067_v20 = vld [vmem:[#allocation13] ss:$0 sm:$0xff] }
 0x5d0   :  { %6310 = vmatprep.subr.bf16.mxu1 %v6309_v42  ;;  %6336 = vmatpush1.bf16.msra.mxu0 %v6335_v38  ;;  %v5068_v38 = vld [vmem:[#allocation14] ss:$0 sm:$0xff] }
 0x5d1   :  { %6312 = vmatpush3.bf16.msra.mxu1 %v6309_v42  ;;  %v1801_v42 = vld [vmem:[%s9364_s0 + $0x80] sm:$0xff] }
 0x5d4   :  { %5672 = vmatmul.mubr.msk.f32.vlgmr.msra.gmra.mrb[16].mxu1 %vm684_vm2, %v7902_v63 }
 0x5d5   :  { %5674 = vmatprep.mubr.msk.f32.mxu1 %vm684_vm2, %v7905_v0 }
 0x5d8   :  { %5675 = vmatmul.mubr.msk.f32.gmra.mrb[18].mxu1 %vm684_vm2, %v7912_v1 }
 0x5d9   :  { %5677 = vmatprep.mubr.msk.f32.mxu1 %vm684_vm2, %v7915_v2 }
 0x5dc   :  { %5678 = vmatmul.mubr.msk.f32.gmra.mrb[20].mxu1 %vm684_vm2, %v7922_v3 }
 0x5dd   :  { %5680 = vmatprep.mubr.msk.f32.mxu1 %vm684_vm2, %v7925_v4 }
 0x5e0   :  { %5681 = vmatmul.mubr.msk.f32.gmra.mrb[22].mxu1 %vm684_vm2, %v7932_v5 }
 0x5e1   :  { %5699 = vmatprep.mubr.msk.f32.mxu1 %vm684_vm2, %v1648_v61  ;;  %v1815_v61 = vld [vmem:[%s9364_s0 + $0xf0] sm:$0xff] }
 0x6a7   :  { %v5673_v63 = vpop.f32.mrb[16].mxu1 }
 0x6a8   :  { %v1315_v41 = vadd.f32 %v5673_v63, %v5058_v47  ;;  %v1309_v58 = vpop.f32.mrb[17].mxu1  ;;  %v1797_v63 = vld [vmem:[%s9364_s0 + $0x60] sm:$0xff] }
 0x6a9   :  { %v1310_v0 = vadd.f32 %v5058_v47, %v1309_v58 }
 0x6ab   :  { %v1350_v55 = vadd.f32 %v1315_v41, %v1310_v0  ;;  %v5676_v59 = vpop.f32.mrb[18].mxu1 }
 0x6ac   :  { %v1319_v1 = vpop.f32.mrb[19].mxu1  ;;  %v1325_v32 = vadd.f32 %v5676_v59, %v5058_v47  ;;  %v1807_v59 = vld [vmem:[%s9364_s0 + $0xb0] sm:$0xff] }
 0x6ad   :  { %v1320_v62 = vadd.f32 %v5058_v47, %v1319_v1 }
 0x6af   :  { %v1351_v2 = vadd.f32 %v1350_v55, %v1320_v62  ;;  %v5679_v46 = vpop.f32.mrb[20].mxu1  ;;  %v1804_v55 = vld [vmem:[%s9364_s0 + $0x98] sm:$0xff] }
 0x6b0   :  { %v1329_v50 = vpop.f32.mrb[21].mxu1  ;;  %v1335_v43 = vadd.f32 %v5679_v46, %v5058_v47  ;;  %v1803_v46 = vld [vmem:[%s9364_s0 + $0x90] sm:$0xff] }
 0x6b1   :  { %v1330_v3 = vadd.f32 %v5058_v47, %v1329_v50  ;;  %v1352_v6 = vadd.f32 %v1351_v2, %v1325_v32  ;;  %v6341_v2 = vpack.c.bf16 %v1807_v59, %v1804_v55  ;;  %v1806_v50 = vld [vmem:[%s9364_s0 + $0xa8] sm:$0xff] }
 0x6b3   :  { %v1353_v4 = vadd.f32 %v1352_v6, %v1330_v3  ;;  %v5682_v36 = vpop.f32.mrb[22].mxu1  ;;  %v1810_v6 = vld [vmem:[%s9364_s0 + $0xc8] sm:$0xff] }
 0x6b4   :  { %v1339_v48 = vpop.f32.mrb[23].mxu1  ;;  %v1345_v56 = vadd.f32 %v5682_v36, %v5058_v47  ;;  %v6343_v36 = vpack.c.bf16 %v1806_v50, %v1803_v46 }
 0x6b5   :  { %v1340_v5 = vadd.f32 %v5058_v47, %v1339_v48  ;;  %v1354_v49 = vadd.f32 %v1353_v4, %v1335_v43  ;;  %v6337_v47 = vpack.c.bf16 %v1801_v42, %v1798_v26 }
 0x6b7   :  { %v1355_v8 = vadd.f32 %v1354_v49, %v1340_v5  ;;  %6338 = vmatprep.subr.bf16.mxu0 %v6337_v47  ;;  %v1812_v49 = vld [vmem:[%s9364_s0 + $0xd8] sm:$0xff] }
 0x6b9   :  { %v1356_v45 = vadd.f32 %v1355_v8, %v1345_v56  ;;  %v1816_v8 = vld [vmem:[%s9364_s0 + $0xf8] sm:$0xff] }
 0x6bb   :  { %v1357_v10 = vrot.slane %v1356_v45, 4 }
 0x6bd   :  { %v1358_v12 = vadd.f32 %v1357_v10, %v1356_v45  ;;  %v1819_v45 = vld [vmem:[%s9364_s0 + $0x110] sm:$0xff] }
 0x6bf   :  { %v1359_v14 = vrot.slane %v1358_v12, 2 }
 0x6c1   :  { %v1360_v51 = vadd.f32 %v1359_v14, %v1358_v12  ;;  %v6349_v14 = vpack.c.bf16 %v1819_v45, %v1816_v8 }
 0x6c3   :  { %v1361_v53 = vrot.slane %v1360_v51, 1 }
 0x6c5   :  { %v1362_v57 = vadd.f32 %v1361_v53, %v1360_v51  ;;  %v1818_v51 = vld [vmem:[%s9364_s0 + $0x108] sm:$0xff] }
 0x6c7   :  { %v1363_v7 = vmul.f32 0.015625, %v1362_v57  ;;  %v1822_v57 = vld [vmem:[%s9364_s0 + $0x128] sm:$0xff] }
 0x6c9   :  { %v8092_v17 = vsub.f32 %v1310_v0, %v1363_v7  ;;  %v8094_v18 = vsub.f32 %v1315_v41, %v1363_v7  ;;  %v8096_v60 = vsub.f32 %v1320_v62, %v1363_v7  ;;  %v8098_v22 = vsub.f32 %v1325_v32, %v1363_v7  ;;  %v1800_v41 = vld [vmem:[%s9364_s0 + $0x78] sm:$0xff] }
 0x6ca   :  { %v8100_v23 = vsub.f32 %v1330_v3, %v1363_v7  ;;  %v8102_v19 = vsub.f32 %v1335_v43, %v1363_v7  ;;  %v8104_v27 = vsub.f32 %v1340_v5, %v1363_v7  ;;  %v8106_v9 = vsub.f32 %v1345_v56, %v1363_v7  ;;  %v1813_v43 = vld [vmem:[%s9364_s0 + $0xe0] sm:$0xff] }
 0x6cb   :  { %v1372_v25 = vmul.f32 %v8092_v17, %v8092_v17  ;;  %v1373_v21 = vmul.f32 %v8094_v18, %v8094_v18  ;;  %v1374_v28 = vmul.f32 %v8096_v60, %v8096_v60  ;;  %v1375_v29 = vmul.f32 %v8098_v22, %v8098_v22  ;;  %v1809_v5 = vld [vmem:[%s9364_s0 + $0xc0] sm:$0xff] }
 0x6cc   :  { %v1376_v13 = vmul.f32 %v8100_v23, %v8100_v23  ;;  %v1377_v30 = vmul.f32 %v8102_v19, %v8102_v19  ;;  %v1378_v58 = vmul.f32 %v8104_v27, %v8104_v27  ;;  %v1379_v1 = vmul.f32 %v8106_v9, %v8106_v9  ;;  %v1825_v7 = vld [vmem:[%s9364_s0 + $0x140] sm:$0xff] }
 0x6cd   :  { %v1380_v11 = vadd.f32 %v1373_v21, %v1372_v25  ;;  %v6339_v32 = vpack.c.bf16 %v1800_v41, %v1797_v63  ;;  %v6345_v48 = vpack.c.bf16 %v1813_v43, %v1810_v6  ;;  %v6347_v12 = vpack.c.bf16 %v1812_v49, %v1809_v5 }
 0x6ce   :  { %v6351_v21 = vpack.c.bf16 %v1818_v51, %v1815_v61 }
 0x6cf   :  { %v1381_v31 = vadd.f32 %v1380_v11, %v1374_v28  ;;  %6340 = vmatpush1.bf16.msra.mxu0 %v6339_v32  ;;  %v6353_v28 = vpack.c.bf16 %v1825_v7, %v1822_v57  ;;  %v1821_v11 = vld [vmem:[%s9364_s0 + $0x120] sm:$0xff] }
 0x6d0   :  { %6342 = vmatprep.subr.bf16.mxu0 %v6341_v2 }
 0x6d1   :  { %v1382_v52 = vadd.f32 %v1381_v31, %v1375_v29  ;;  %v1824_v29 = vld [vmem:[%s9364_s0 + $0x138] sm:$0xff] }
 0x6d2   :  { %v6355_v24 = vpack.c.bf16 %v1824_v29, %v1821_v11 }
 0x6d3   :  { %v1383_v54 = vadd.f32 %v1382_v52, %v1376_v13  ;;  %6344 = vmatpush1.bf16.msra.mxu0 %v6343_v36  ;;  %v1827_v13 = vld [vmem:[%s9364_s0 + $0x150] sm:$0xff]  ;;  %v1830_v52 = vld [vmem:[%s9364_s0 + $0x168] sm:$0xff] }
 0x6d4   :  { %6346 = vmatprep.subr.bf16.mxu0 %v6345_v48  ;;  %v6359_v16 = vpack.c.bf16 %v1830_v52, %v1827_v13 }
 0x6d5   :  { %v1384_v0 = vadd.f32 %v1383_v54, %v1377_v30 }
 0x6d7   :  { %v1385_v62 = vadd.f32 %v1384_v0, %v1378_v58  ;;  %6348 = vmatpush1.bf16.msra.mxu0 %v6347_v12 }
 0x6d8   :  { %6350 = vmatprep.subr.bf16.mxu0 %v6349_v14 }
 0x6d9   :  { %v1386_v3 = vadd.f32 %v1385_v62, %v1379_v1 }
 0x6db   :  { %v1387_v4 = vrot.slane %v1386_v3, 4  ;;  %6352 = vmatpush1.bf16.msra.mxu0 %v6351_v21 }
 0x6dc   :  { %6354 = vmatprep.subr.bf16.mxu0 %v6353_v28 }
 0x6dd   :  { %v1388_v56 = vadd.f32 %v1387_v4, %v1386_v3 }
 0x6df   :  { %v1389_v10 = vrot.slane %v1388_v56, 2  ;;  %6356 = vmatpush1.bf16.msra.mxu0 %v6355_v24 }
 0x6e0   :  { %6358 = vmatprep.subr.bf16.mxu0 %v6357_v37 }
 0x6e1   :  { %v1390_v53 = vadd.f32 %v1389_v10, %v1388_v56 }
 0x6e3   :  { %v1391_v25 = vrot.slane %v1390_v53, 1  ;;  %6360 = vmatpush1.bf16.msra.mxu0 %v6359_v16 }
 0x6e5   :  { %v1392_v31 = vadd.f32 %v1391_v25, %v1390_v53 }
 0x6e7   :  { %v1393_v35 = vmul.f32 0.015625, %v1392_v31 }
 0x6e9   :  { %v1394_v34 = vadd.f32 1e-05, %v1393_v35 }
 0x6eb   :  { %6779 = vrsqrt.f32 %v1394_v34 }
 0x6f5   :  { %v6780_v39 = vpop.eup %6779 }
 0x6f6   :  { %v1402_v40 = vmul.f32 %v6780_v39, %v8104_v27  ;;  %v1396_v44 = vmul.f32 %v6780_v39, %v8092_v17  ;;  %v1397_v30 = vmul.f32 %v6780_v39, %v8094_v18  ;;  %v1398_v54 = vmul.f32 %v6780_v39, %v8096_v60 }
 0x6f7   :  { %v1399_v26 = vmul.f32 %v6780_v39, %v8098_v22  ;;  %v1400_v42 = vmul.f32 %v6780_v39, %v8100_v23  ;;  %v1401_v47 = vmul.f32 %v6780_v39, %v8102_v19  ;;  %v1403_v63 = vmul.f32 %v6780_v39, %v8106_v9 }
 0x6f8   :  { %v1416_v41 = vmul.f32 %v5067_v20, %v1402_v40  ;;  %v1410_v58 = vmul.f32 %v5067_v20, %v1396_v44  ;;  %v1411_v0 = vmul.f32 %v5067_v20, %v1397_v30  ;;  %v1412_v55 = vmul.f32 %v5067_v20, %v1398_v54 }
 0x6f9   :  { %v1413_v27 = vmul.f32 %v5067_v20, %v1399_v26  ;;  %v1414_v2 = vmul.f32 %v5067_v20, %v1400_v42  ;;  %v1415_v3 = vmul.f32 %v5067_v20, %v1401_v47  ;;  %v1417_v12 = vmul.f32 %v5067_v20, %v1403_v63 }
 0x6fa   :  { %v8164_v59 = vadd.f32 %v5068_v38, %v1416_v41  ;;  %v1424_v17 = vadd.f32 %v5068_v38, %v1410_v58  ;;  %v1425_v18 = vadd.f32 %v5068_v38, %v1411_v0  ;;  %v8166_v1 = vadd.f32 %v5068_v38, %v1412_v55 }
 0x6fb   :  { %v8168_v60 = vadd.f32 %v5068_v38, %v1413_v27  ;;  %v8187_v49 = vadd.f32 %v5068_v38, %v1414_v2  ;;  %v8190_v10 = vadd.f32 %v5068_v38, %v1415_v3  ;;  %v8198_v21 = vadd.f32 %v5068_v38, %v1417_v12 }
 0x6fc   :  { %v8171_v22 = vmul.f32 0.70710677, %v8164_v59  ;;  %v8173_v23 = vmul.f32 0.70710677, %v1424_v17  ;;  %v8175_v19 = vmul.f32 0.70710677, %v1425_v18 }
 0x6fd   :  { %v8178_v9 = vmul.f32 0.70710677, %v8166_v1  ;;  %v8184_v50 = vmul.f32 0.70710677, %v8168_v60  ;;  %v8193_v57 = vmul.f32 0.70710677, %v8187_v49 }
 0x6fe   :  { %v1454_v62 = vand.u32 2147483647, %v8171_v22  ;;  %v1448_v32 = vand.u32 2147483647, %v8173_v23  ;;  %v1449_v46 = vand.u32 2147483647, %v8175_v19 }
 0x6ff   :  { %v1450_v36 = vand.u32 2147483647, %v8178_v9  ;;  %v1451_v8 = vand.u32 2147483647, %v8184_v50  ;;  %v8196_v7 = vmul.f32 0.70710677, %v8190_v10 }
 0x700   :  { %v1462_v6 = vmul.f32 0.3275911, %v1454_v62  ;;  %v1456_v43 = vmul.f32 0.3275911, %v1448_v32  ;;  %v1457_v4 = vmul.f32 0.3275911, %v1449_v46 }
 0x701   :  { %v1458_v45 = vmul.f32 0.3275911, %v1450_v36  ;;  %v1459_v14 = vmul.f32 0.3275911, %v1451_v8  ;;  %v1566_v61 = vsub.f32 0.0, %v1454_v62  ;;  %v1560_v25 = vsub.f32 0.0, %v1448_v32 }
 0x702   :  { %v1470_v48 = vadd.f32 1.0, %v1462_v6  ;;  %v1464_v5 = vadd.f32 1.0, %v1456_v43  ;;  %v1465_v56 = vadd.f32 1.0, %v1457_v4  ;;  %v1561_v28 = vsub.f32 0.0, %v1449_v46 }
 0x703   :  { %v1466_v51 = vadd.f32 1.0, %v1458_v45  ;;  %v1467_v53 = vadd.f32 1.0, %v1459_v14  ;;  %v1452_v11 = vand.u32 2147483647, %v8193_v57  ;;  %v1453_v29 = vand.u32 2147483647, %v8196_v7 }
 0x704   :  { %6781 = vrcp.f32 %v1470_v48  ;;  %v1574_v31 = vmul.f32 %v1566_v61, %v1454_v62  ;;  %v1562_v33 = vsub.f32 0.0, %v1450_v36  ;;  %v1568_v24 = vmul.f32 %v1560_v25, %v1448_v32 }
 0x705   :  { %6783 = vrcp.f32 %v1464_v5  ;;  %v1460_v15 = vmul.f32 0.3275911, %v1452_v11  ;;  %v1461_v35 = vmul.f32 0.3275911, %v1453_v29  ;;  %v1563_v37 = vsub.f32 0.0, %v1451_v8 }
 0x706   :  { %6785 = vrcp.f32 %v1465_v56  ;;  %v8203_v13 = vmul.f32 0.70710677, %v8198_v21  ;;  %v1569_v52 = vmul.f32 %v1561_v28, %v1449_v46  ;;  %v1564_v39 = vsub.f32 0.0, %v1452_v11 }
 0x707   :  { %6787 = vrcp.f32 %v1466_v51  ;;  %v1468_v34 = vadd.f32 1.0, %v1460_v15  ;;  %v1469_v16 = vadd.f32 1.0, %v1461_v35  ;;  %v1588_v40 = vmul.f32 1.442695, %v1574_v31 }
 0x708   :  { %6789 = vrcp.f32 %v1467_v53  ;;  %v8207_v44 = vmul.f32 0.5, %v1424_v17  ;;  %v8209_v30 = vmul.f32 0.5, %v1425_v18  ;;  %v8212_v54 = vand.u32 2147483647, %v8203_v13 }
 0x709   :  { %v1570_v26 = vmul.f32 %v1562_v33, %v1450_v36  ;;  %6791 = vrcp.f32 %v1468_v34  ;;  %v1565_v42 = vsub.f32 0.0, %v1453_v29  ;;  %v1571_v41 = vmul.f32 %v1563_v37, %v1451_v8 }
 0x70a   :  { %6793 = vrcp.f32 %v1469_v16  ;;  %v1463_v58 = vmul.f32 0.3275911, %v8212_v54  ;;  %v1576_v55 = vmul.f32 1.442695, %v1568_v24  ;;  %v1578_v27 = vmul.f32 1.442695, %v1569_v52 }
 0x70b   :  { %v1572_v17 = vmul.f32 %v1564_v39, %v1452_v11  ;;  %v8223_v2 = vmul.f32 0.5, %v8166_v1  ;;  %6795 = vpow2.f32 %v1588_v40  ;;  %v1580_v3 = vmul.f32 1.442695, %v1570_v26 }
 0x70c   :  { %v1471_v46 = vadd.f32 1.0, %v1463_v58  ;;  %v1573_v6 = vmul.f32 %v1565_v42, %v1453_v29  ;;  %v1582_v5 = vmul.f32 1.442695, %v1571_v41  ;;  %v1567_v35 = vsub.f32 0.0, %v8212_v54 }
 0x70d   :  { %v1584_v1 = vmul.f32 1.442695, %v1572_v17  ;;  %vm1608_vm11 = vcmp.ge.f32.partialorder %v8173_v23, 0.0  ;;  %vm1609_vm12 = vcmp.ge.f32.partialorder %v8175_v19, 0.0  ;;  %vm1610_vm13 = vcmp.ge.f32.partialorder %v8178_v9, 0.0 }
 0x70e   :  { %v8205_v20 = vpop.eup %6781  ;;  %6797 = vrcp.f32 %v1471_v46  ;;  %v1586_v53 = vmul.f32 1.442695, %v1573_v6  ;;  %vm1611_vm14 = vcmp.ge.f32.partialorder %v8184_v50, 0.0  ;;  %vm1612_vm15 = vcmp.ge.f32.partialorder %v8193_v57, 0.0 }
 0x70f   :  { %v8214_v38 = vpop.eup %6783  ;;  %v1494_v47 = vmul.f32 1.0614054, %v8205_v20  ;;  %6799 = vpow2.f32 %v1576_v55  ;;  %vm1614_vm0 = vcmp.ge.f32.partialorder %v8171_v22, 0.0  ;;  %vm1613_vm1 = vcmp.ge.f32.partialorder %v8196_v7, 0.0 }
 0x710   :  { %v1488_v63 = vmul.f32 1.0614054, %v8214_v38  ;;  %v8219_v0 = vpop.eup %6785  ;;  %6801 = vpow2.f32 %v1578_v27  ;;  %vm1615_vm3 = vcmp.ge.f32.partialorder %v8203_v13, 0.0  ;;  %v1650_v13 = vld [vmem:[#allocation2 + $0x10] sm:$0xff] }
 0x711   :  { %v1502_v18 = vadd.f32 -1.4531521, %v1494_v47  ;;  %v1489_v62 = vmul.f32 1.0614054, %v8219_v0  ;;  %v8226_v4 = vpop.eup %6787  ;;  %6803 = vpow2.f32 %v1580_v3 }
 0x712   :  { %v1496_v32 = vadd.f32 -1.4531521, %v1488_v63  ;;  %v8229_v56 = vpop.eup %6789  ;;  %v1490_v8 = vmul.f32 1.0614054, %v8226_v4  ;;  %6805 = vpow2.f32 %v1582_v5 }
 0x713   :  { %v1510_v43 = vmul.f32 %v8205_v20, %v1502_v18  ;;  %v1497_v36 = vadd.f32 -1.4531521, %v1489_v62  ;;  %v1491_v61 = vmul.f32 1.0614054, %v8229_v56  ;;  %v8236_v31 = vpop.eup %6791  ;;  %6807 = vpow2.f32 %v1584_v1 }
 0x714   :  { %v1504_v48 = vmul.f32 %v8214_v38, %v1496_v32  ;;  %v1498_v51 = vadd.f32 -1.4531521, %v1490_v8  ;;  %v8240_v24 = vpop.eup %6793  ;;  %v1492_v16 = vmul.f32 1.0614054, %v8236_v31  ;;  %6809 = vpow2.f32 %v1586_v53 }
 0x715   :  { %v1518_v45 = vadd.f32 1.4214138, %v1510_v43  ;;  %v1505_v12 = vmul.f32 %v8219_v0, %v1497_v36  ;;  %v1499_v29 = vadd.f32 -1.4531521, %v1491_v61  ;;  %v1493_v40 = vmul.f32 1.0614054, %v8240_v24  ;;  %v6796_v58 = vpop.eup %6795 }
 0x716   :  { %v1512_v14 = vadd.f32 1.4214138, %v1504_v48  ;;  %v1506_v33 = vmul.f32 %v8226_v4, %v1498_v51  ;;  %v1500_v41 = vadd.f32 -1.4531521, %v1492_v16  ;;  %v1575_v18 = vmul.f32 %v1567_v35, %v8212_v54 }
 0x717   :  { %v1526_v25 = vmul.f32 %v8205_v20, %v1518_v45  ;;  %v1513_v28 = vadd.f32 1.4214138, %v1505_v12  ;;  %v1507_v34 = vmul.f32 %v8229_v56, %v1499_v29  ;;  %v1501_v27 = vadd.f32 -1.4531521, %v1493_v40 }
 0x718   :  { %v1520_v11 = vmul.f32 %v8214_v38, %v1512_v14  ;;  %v1514_v39 = vadd.f32 1.4214138, %v1506_v33  ;;  %v8250_v62 = vpop.eup %6797  ;;  %v1508_v6 = vmul.f32 %v8236_v31, %v1500_v41 }
 0x719   :  { %v1534_v15 = vadd.f32 -0.28449672, %v1526_v25  ;;  %v1521_v37 = vmul.f32 %v8219_v0, %v1513_v28  ;;  %v1515_v63 = vadd.f32 1.4214138, %v1507_v34  ;;  %v6800_v43 = vpop.eup %6799  ;;  %v1509_v48 = vmul.f32 %v8240_v24, %v1501_v27 }
 0x71a   :  { %v1528_v52 = vadd.f32 -0.28449672, %v1520_v11  ;;  %v1522_v55 = vmul.f32 %v8226_v4, %v1514_v39  ;;  %v1495_v5 = vmul.f32 1.0614054, %v8250_v62  ;;  %v6802_v54 = vpop.eup %6801  ;;  %v1516_v14 = vadd.f32 1.4214138, %v1508_v6 }
 0x71b   :  { %v1542_v26 = vmul.f32 %v8205_v20, %v1534_v15  ;;  %v1529_v42 = vadd.f32 -0.28449672, %v1521_v37  ;;  %v1523_v3 = vmul.f32 %v8229_v56, %v1515_v63  ;;  %v6804_v61 = vpop.eup %6803  ;;  %v1517_v53 = vadd.f32 1.4214138, %v1509_v48 }
 0x71c   :  { %v1536_v47 = vmul.f32 %v8214_v38, %v1528_v52  ;;  %v1530_v36 = vadd.f32 -0.28449672, %v1522_v55  ;;  %v1503_v25 = vadd.f32 -1.4531521, %v1495_v5  ;;  %v1590_v28 = vmul.f32 1.442695, %v1575_v18  ;;  %v6806_v11 = vpop.eup %6805 }
 0x71d   :  { %v1550_v17 = vadd.f32 0.2548296, %v1542_v26  ;;  %v1537_v32 = vmul.f32 %v8219_v0, %v1529_v42  ;;  %v1531_v12 = vadd.f32 -0.28449672, %v1523_v3  ;;  %v1524_v15 = vmul.f32 %v8236_v31, %v1516_v14  ;;  %v6808_v35 = vpop.eup %6807 }
 0x71e   :  { %v1544_v46 = vadd.f32 0.2548296, %v1536_v47  ;;  %v1538_v51 = vmul.f32 %v8226_v4, %v1530_v36  ;;  %v1525_v37 = vmul.f32 %v8240_v24, %v1517_v53  ;;  %v1511_v52 = vmul.f32 %v8250_v62, %v1503_v25  ;;  %v6810_v42 = vpop.eup %6809 }
 0x71f   :  { %v1558_v8 = vmul.f32 %v8205_v20, %v1550_v17  ;;  %v1545_v1 = vadd.f32 0.2548296, %v1537_v32  ;;  %v1539_v20 = vmul.f32 %v8229_v56, %v1531_v12  ;;  %v1532_v26 = vadd.f32 -0.28449672, %v1524_v15 }
 0x720   :  { %v1552_v45 = vmul.f32 %v8214_v38, %v1544_v46  ;;  %v1546_v38 = vadd.f32 0.2548296, %v1538_v51  ;;  %v1533_v47 = vadd.f32 -0.28449672, %v1525_v37  ;;  %v1519_v63 = vadd.f32 1.4214138, %v1511_v52 }
 0x721   :  { %v1553_v29 = vmul.f32 %v8219_v0, %v1545_v1  ;;  %v8267_v34 = vmul.f32 %v6796_v58, %v1558_v8  ;;  %v1547_v40 = vadd.f32 0.2548296, %v1539_v20  ;;  %6811 = vpow2.f32 %v1590_v28 }
 0x722   :  { %v1592_v33 = vmul.f32 %v6800_v43, %v1552_v45  ;;  %v1554_v0 = vmul.f32 %v8226_v4, %v1546_v38  ;;  %v1540_v17 = vmul.f32 %v8236_v31, %v1532_v26  ;;  %v1541_v58 = vmul.f32 %v8240_v24, %v1533_v47 }
 0x723   :  { %v1593_v16 = vmul.f32 %v6802_v54, %v1553_v29  ;;  %v1555_v27 = vmul.f32 %v8229_v56, %v1547_v40  ;;  %v1527_v32 = vmul.f32 %v8250_v62, %v1519_v63  ;;  %v1606_v46 = vsub.f32 1.0, %v8267_v34 }
 0x724   :  { %v1600_v39 = vsub.f32 1.0, %v1592_v33  ;;  %v1594_v18 = vmul.f32 %v6804_v61, %v1554_v0  ;;  %v1548_v43 = vadd.f32 0.2548296, %v1540_v17  ;;  %v1549_v5 = vadd.f32 0.2548296, %v1541_v58  ;;  %v1787_v17 = vld [vmem:[%s9364_s0 + $0x10] sm:$0xff] }
 0x725   :  { %v1601_v41 = vsub.f32 1.0, %v1593_v16  ;;  %v1595_v6 = vmul.f32 %v6806_v11, %v1555_v27  ;;  %v1535_v8 = vadd.f32 -0.28449672, %v1527_v32  ;;  %v1622_v11 = vsub.f32 0.0, %v1606_v46 }
 0x726   :  { %v1616_v55 = vsub.f32 0.0, %v1600_v39  ;;  %v1602_v48 = vsub.f32 1.0, %v1594_v18  ;;  %v1556_v1 = vmul.f32 %v8236_v31, %v1548_v43  ;;  %v1557_v23 = vmul.f32 %v8240_v24, %v1549_v5  ;;  %v1790_v18 = vld [vmem:[%s9364_s0 + $0x28] sm:$0xff] }
 0x727   :  { %v1617_v3 = vsub.f32 0.0, %v1601_v41  ;;  %v1603_v54 = vsub.f32 1.0, %v1595_v6  ;;  %v1543_v53 = vmul.f32 %v8250_v62, %v1535_v8  ;;  %v1435_v15 = vmul.f32 0.5, %v8168_v60  ;;  %v1799_v6 = vld [vmem:[%s9364_s0 + $0x70] sm:$0xff]  ;;  %v1802_v43 = vld [vmem:[%s9364_s0 + $0x88] sm:$0xff]  ;;  %v1805_v8 = vld [vmem:[%s9364_s0 + $0xa0] sm:$0xff] }
 0x728   :  { %v1624_v4 = vsel %vm1608_vm11, %v1600_v39, %v1616_v55  ;;  %v1618_v14 = vsub.f32 0.0, %v1602_v48  ;;  %v1596_v51 = vmul.f32 %v6808_v35, %v1556_v1  ;;  %v1597_v28 = vmul.f32 %v6810_v42, %v1557_v23  ;;  %v1654_v1 = vld [vmem:[#allocation2 + $0x30] sm:$0xff]  ;;  %v1655_v23 = vld [vmem:[#allocation2 + $0x38] sm:$0xff] }
 0x729   :  { %v1632_v36 = vadd.f32 1.0, %v1624_v4  ;;  %v1625_v56 = vsel %vm1609_vm12, %v1601_v41, %v1617_v3  ;;  %v1619_v61 = vsub.f32 0.0, %v1603_v54  ;;  %v1551_v33 = vadd.f32 0.2548296, %v1543_v53  ;;  %v1793_v3 = vld [vmem:[%s9364_s0 + $0x40] sm:$0xff]  ;;  %v1796_v4 = vld [vmem:[%s9364_s0 + $0x58] sm:$0xff] }
 0x72a   :  { %v1633_v45 = vadd.f32 1.0, %v1625_v56  ;;  %v1626_v25 = vsel %vm1610_vm13, %v1602_v48, %v1618_v14  ;;  %v1604_v31 = vsub.f32 1.0, %v1596_v51  ;;  %v1605_v38 = vsub.f32 1.0, %v1597_v28  ;;  %v1652_v48 = vld [vmem:[#allocation2 + $0x20] sm:$0xff]  ;;  %v1808_v56 = vld [vmem:[%s9364_s0 + $0xb8] sm:$0xff]  ;;  %v1814_v14 = vld [vmem:[%s9364_s0 + $0xe8] sm:$0xff] }
 0x72b   :  { %v1640_v12 = vmul.f32 %v1632_v36, %v8207_v44  ;;  %v1627_v9 = vsel %vm1611_vm14, %v1603_v54, %v1619_v61  ;;  %v1634_v29 = vadd.f32 1.0, %v1626_v25  ;;  %v6812_v20 = vpop.eup %6811  ;;  %v1559_v37 = vmul.f32 %v8250_v62, %v1551_v33  ;;  %v1651_v36 = vld [vmem:[#allocation2 + $0x18] sm:$0xff]  ;;  %v1653_v54 = vld [vmem:[#allocation2 + $0x28] sm:$0xff]  ;;  %v1817_v51 = vld [vmem:[%s9364_s0 + $0x100] sm:$0xff] }
 0x72c   :  { %v1641_v19 = vmul.f32 %v1633_v45, %v8209_v30  ;;  %v1635_v24 = vadd.f32 1.0, %v1627_v9  ;;  %v1620_v35 = vsub.f32 0.0, %v1604_v31  ;;  %v1621_v52 = vsub.f32 0.0, %v1605_v38  ;;  %v1820_v53 = vld [vmem:[%s9364_s0 + $0x118] sm:$0xff]  ;;  %v1823_v25 = vld [vmem:[%s9364_s0 + $0x130] sm:$0xff]  ;;  %v1826_v28 = vld [vmem:[%s9364_s0 + $0x148] sm:$0xff] }
 0x72d   :  { %v1642_v50 = vmul.f32 %v1634_v29, %v8223_v2  ;;  %v1599_v16 = vmul.f32 %v6812_v20, %v1559_v37  ;;  %v1630_v60 = vsel %vm1614_vm0, %v1606_v46, %v1622_v11  ;;  %v1436_v40 = vmul.f32 0.5, %v8187_v49  ;;  %v1829_v9 = vld [vmem:[%s9364_s0 + $0x160] sm:$0xff]  ;;  %v1832_v29 = vld [vmem:[%s9364_s0 + $0x178] sm:$0xff] }
 0x72e   :  { %v6313_v44 = vpack.c.bf16 %v1641_v19, %v1640_v12  ;;  %v1643_v30 = vmul.f32 %v1635_v24, %v1435_v15  ;;  %v1628_v34 = vsel %vm1612_vm15, %v1604_v31, %v1620_v35  ;;  %v1629_v2 = vsel %vm1613_vm1, %v1605_v38, %v1621_v52  ;;  %v1811_v12 = vld [vmem:[%s9364_s0 + $0xd0] sm:$0xff] }
 0x72f   :  { %v1636_v26 = vadd.f32 1.0, %v1628_v34  ;;  %v1437_v62 = vmul.f32 0.5, %v8190_v10  ;;  %v1637_v42 = vadd.f32 1.0, %v1629_v2  ;;  %v1607_v0 = vsub.f32 1.0, %v1599_v16  ;;  %v405_v34 = vld [vmem:[%s9365_s28] sm:$0xf] }
 0x730   :  { %6314 = vmatprep.subr.bf16.mxu1 %v6313_v44  ;;  %v6317_v39 = vpack.c.bf16 %v1643_v30, %v1642_v50  ;;  %v1638_v22 = vadd.f32 1.0, %v1630_v60  ;;  %v1438_v63 = vmul.f32 0.5, %v8164_v59  ;;  %v1439_v10 = vmul.f32 0.5, %v8198_v21  ;;  %v1649_v59 = vld [vmem:[#allocation2 + $0x8] sm:$0xff] }
 0x731   :  { %6316 = vmatpush3.bf16.msra.mxu1 %v6313_v44  ;;  %v1644_v57 = vmul.f32 %v1636_v26, %v1436_v40  ;;  %v1645_v47 = vmul.f32 %v1637_v42, %v1437_v62  ;;  %v1623_v7 = vsub.f32 0.0, %v1607_v0  ;;  %v6361_v46 = vpack.c.bf16 %v1790_v18, %v1787_v17  ;;  %v1833_v60 = vld [vmem:[#allocation16] sm:$0x7] }
 0x732   :  { %6318 = vmatprep.subr.bf16.mxu1 %v6317_v39  ;;  %v1646_v27 = vmul.f32 %v1638_v22, %v1438_v63  ;;  %v6365_v21 = vpack.c.bf16 %v1796_v4, %v1793_v3  ;;  %v6369_v5 = vpack.c.bf16 %v1802_v43, %v1799_v6  ;;  %v6373_v45 = vpack.c.bf16 %v1808_v56, %v1805_v8 }
 0x733   :  { %v6321_v49 = vpack.c.bf16 %v1645_v47, %v1644_v57  ;;  %v1631_v41 = vsel %vm1615_vm3, %v1607_v0, %v1623_v7  ;;  %v6377_v61 = vpack.c.bf16 %v1814_v14, %v1811_v12  ;;  %v6381_v19 = vpack.c.bf16 %v1820_v53, %v1817_v51 }
 0x734   :  { %v1639_v55 = vadd.f32 1.0, %v1631_v41  ;;  %v6385_v11 = vpack.c.bf16 %v1826_v28, %v1823_v25  ;;  %v6389_v31 = vpack.c.bf16 %v1832_v29, %v1829_v9  ;;  %v9338_v33 = vmov 0.0  }
 0x735   :  { %6320 = vmatpush3.bf16.msra.mxu1 %v6317_v39  ;;  %1914 = vmatprep.mubr.f32.mxu0 %v9338_v33  ;;  %v1835_v30 = vlaneseq  ;;  %v8369_v40 = vmul.f32 0.17677669, %v405_v34 }
 0x736   :  { %6322 = vmatprep.subr.bf16.mxu1 %v6321_v49  ;;  %v1647_v58 = vmul.f32 %v1639_v55, %v1439_v10 }
 0x737   :  { %v8360_v52 = vshrl.u32 %v1835_v30, 7 }
 0x738   :  { %v6325_v32 = vpack.c.bf16 %v1647_v58, %v1646_v27 }
 0x739   :  { %6324 = vmatpush3.bf16.msra.mxu1 %v6321_v49  ;;  %v8364_v16 = vsub.s32 0, %v8360_v52  ;;  %v8367_v39 = vsub.s32 2, %v8360_v52  ;;  %v8375_v26 = vsub.s32 1, %v8360_v52 }
 0x73a   :  { %6326 = vmatprep.subr.bf16.mxu1 %v6325_v32 }
 0x73b   :  { %v8372_v2 = vrot.slane %v1833_v60, %v8364_v16  ;;  %v1846_v62 = vrot.slane %v1833_v60, %v8367_v39  ;;  %v8380_v42 = vrot.slane %v8369_v40, %v8364_v16  ;;  %v8386_v7 = vrot.slane %v1833_v60, %v8375_v26 }
 0x73d   :  { %6328 = vmatpush3.bf16.msra.mxu1 %v6325_v32 }
 0x73e   :  { %6362 = vmatprep.subr.bf16.mxu1 %v6361_v46 }
 0x740   :  { %5700 = vmatmul.mubr.msk.f32.vlgmr.msra.gmra.mrb[24].mxu1 %vm684_vm2, %v1649_v59 }
 0x741   :  { %5702 = vmatprep.mubr.msk.f32.mxu1 %vm684_vm2, %v1650_v13  ;;  %6364 = vmatpush3.bf16.msra.mxu1 %v6361_v46 }
 0x742   :  { %6366 = vmatprep.subr.bf16.mxu1 %v6365_v21 }
 0x744   :  { %5703 = vmatmul.mubr.msk.f32.gmra.mrb[26].mxu1 %vm684_vm2, %v1651_v36 }
 0x745   :  { %5705 = vmatprep.mubr.msk.f32.mxu1 %vm684_vm2, %v1652_v48  ;;  %6368 = vmatpush3.bf16.msra.mxu1 %v6365_v21 }
 0x746   :  { %6370 = vmatprep.subr.bf16.mxu1 %v6369_v5 }
 0x748   :  { %5706 = vmatmul.mubr.msk.f32.gmra.mrb[28].mxu1 %vm684_vm2, %v1653_v54 }
 0x749   :  { %5708 = vmatprep.mubr.msk.f32.mxu1 %vm684_vm2, %v1654_v1  ;;  %6372 = vmatpush3.bf16.msra.mxu1 %v6369_v5 }
 0x74a   :  { %6374 = vmatprep.subr.bf16.mxu1 %v6373_v45 }
 0x74c   :  { %5709 = vmatmul.mubr.msk.f32.gmra.mrb[30].mxu1 %vm684_vm2, %v1655_v23 }
 0x74d   :  { %6376 = vmatpush3.bf16.msra.mxu1 %v6373_v45 }
 0x74e   :  { %6378 = vmatprep.subr.bf16.mxu1 %v6377_v61 }
 0x751   :  { %6380 = vmatpush3.bf16.msra.mxu1 %v6377_v61 }
 0x752   :  { %6382 = vmatprep.subr.bf16.mxu1 %v6381_v19 }
 0x755   :  { %6384 = vmatpush3.bf16.msra.mxu1 %v6381_v19 }
 0x756   :  { %6386 = vmatprep.subr.bf16.mxu1 %v6385_v11 }
 0x759   :  { %6388 = vmatpush3.bf16.msra.mxu1 %v6385_v11 }
 0x75a   :  { %6390 = vmatprep.subr.bf16.mxu1 %v6389_v31 }
 0x75d   :  { %6392 = vmatpush3.bf16.msra.mxu1 %v6389_v31 }
 0x813   :  { %v8321_v20 = vpop.f32.mrb[24].mxu1 }
 0x814   :  { %v8323_v44 = vpop.f32.mrb[25].mxu1 }
 0x815   :  { %1915 = vmatmul.mubr.f32.vlgmr.msra.gmra.mrb[16].mxu0 %v8323_v44  ;;  %5743 = vmatprep.mubr.f32.mxu1 %v8323_v44 }
 0x816   :  { %5744 = vmatmul.mubr.f32.vlgmr.msra.gmra.mrb[32].mxu1 %v8321_v20  ;;  %1920 = vmatprep.mubr.f32.mxu0 %v9338_v33 }
 0x817   :  { %v8329_v15 = vpop.f32.mrb[26].mxu1 }
 0x818   :  { %v8331_v24 = vpop.f32.mrb[27].mxu1 }
 0x819   :  { %1921 = vmatmul.mubr.f32.gmra.mrb[18].mxu0 %v8321_v20  ;;  %5746 = vmatprep.mubr.f32.mxu1 %v8331_v24 }
 0x81a   :  { %5747 = vmatmul.mubr.f32.gmra.mrb[34].mxu1 %v8329_v15  ;;  %1926 = vmatprep.mubr.f32.mxu0 %v9338_v33 }
 0x81b   :  { %v8337_v38 = vpop.f32.mrb[28].mxu1 }
 0x81c   :  { %v8339_v50 = vpop.f32.mrb[29].mxu1 }
 0x81d   :  { %1927 = vmatmul.mubr.f32.gmra.mrb[20].mxu0 %v8331_v24  ;;  %5749 = vmatprep.mubr.f32.mxu1 %v8339_v50 }
 0x81e   :  { %1932 = vmatprep.mubr.f32.mxu0 %v9338_v33  ;;  %5750 = vmatmul.mubr.f32.gmra.mrb[36].mxu1 %v8337_v38 }
 0x81f   :  { %v8345_v35 = vpop.f32.mrb[30].mxu1 }
 0x820   :  { %v8347_v37 = vpop.f32.mrb[31].mxu1 }
 0x821   :  { %1933 = vmatmul.mubr.f32.gmra.mrb[22].mxu0 %v8329_v15  ;;  %5752 = vmatprep.mubr.f32.mxu1 %v8347_v37 }
 0x822   :  { %1938 = vmatprep.mubr.f32.mxu0 %v9338_v33  ;;  %5753 = vmatmul.mubr.f32.gmra.mrb[38].mxu1 %v8345_v35 }
 0x825   :  { %1939 = vmatmul.mubr.f32.gmra.mrb[24].mxu0 %v8339_v50 }
 0x826   :  { %1944 = vmatprep.mubr.f32.mxu0 %v9338_v33 }
 0x829   :  { %1945 = vmatmul.mubr.f32.gmra.mrb[26].mxu0 %v8337_v38 }
 0x82a   :  { %1950 = vmatprep.mubr.f32.mxu0 %v9338_v33 }
 0x82d   :  { %1951 = vmatmul.mubr.f32.gmra.mrb[28].mxu0 %v8347_v37 }
 0x82e   :  { %1956 = vmatprep.mubr.f32.mxu0 %v9338_v33 }
 0x831   :  { %1957 = vmatmul.mubr.f32.gmra.mrb[30].mxu0 %v8345_v35 }
 0x8e8   :  { %v1916_v0 = vpop.f32.mrb[16].mxu0 }
 0x8e9   :  { %v8383_v57 = vadd.f32 %v1916_v0, %v8372_v2  ;;  %v1918_v22 = vpop.f32.mrb[17].mxu0  ;;  %v5745_v47 = vpop.f32.mrb[32].mxu1 }
 0x8ea   :  { %v2035_v63 = vadd.f32 %v5745_v47, %v1846_v62  ;;  %v2029_v49 = vpop.f32.mrb[33].mxu1  ;;  %v1919_v58 = vadd.f32 %v1918_v22, %v8386_v7 }
 0x8eb   :  { %v2030_v41 = vadd.f32 %v2029_v49, %v1846_v62  ;;  %v2073_v10 = vmul.f32 %v8380_v42, %v8383_v57 }
 0x8ec   :  { %v1922_v55 = vpop.f32.mrb[18].mxu0 }
 0x8ed   :  { %v6401_v27 = vpack.c.bf16 %v2035_v63, %v2030_v41  ;;  %v1924_v17 = vpop.f32.mrb[19].mxu0  ;;  %v5748_v18 = vpop.f32.mrb[34].mxu1  ;;  %5763 = vmatprep.mubr.f32.mxu1 %v2073_v10  ;;  %v1923_v28 = vadd.f32 %v1922_v55, %v8372_v2  ;;  %v2080_v63 = vrot.slane %v8369_v40, %v8375_v26 }
 0x8ee   :  { %v1925_v32 = vadd.f32 %v1924_v17, %v8386_v7  ;;  %v2045_v46 = vadd.f32 %v5748_v18, %v1846_v62  ;;  %v2039_v3 = vpop.f32.mrb[35].mxu1 }
 0x8ef   :  { %v2040_v4 = vadd.f32 %v2039_v3, %v1846_v62  ;;  %6402 = vmatprep.subr.bf16.mxu0 %v6401_v27  ;;  %v2074_v34 = vmul.f32 %v8380_v42, %v1923_v28  ;;  %v2081_v55 = vmul.f32 %v2080_v63, %v8383_v57 }
 0x8f0   :  { %v6393_v59 = vpack.c.bf16 %v1925_v32, %v1919_v58  ;;  %v1928_v13 = vpop.f32.mrb[20].mxu0  ;;  %6404 = vmatpush3.bf16.msra.mxu0 %v6401_v27  ;;  %v2082_v58 = vmul.f32 %v2080_v63, %v1923_v28 }
 0x8f1   :  { %v6405_v21 = vpack.c.bf16 %v2045_v46, %v2040_v4  ;;  %v1930_v6 = vpop.f32.mrb[21].mxu0  ;;  %v5751_v43 = vpop.f32.mrb[36].mxu1  ;;  %v1929_v29 = vadd.f32 %v1928_v13, %v8372_v2  ;;  %v2088_v46 = vrot.slane %v8369_v40, %v8367_v39 }
 0x8f2   :  { %6394 = vmatprep.subr.bf16.mxu1 %v6393_v59  ;;  %v2055_v36 = vadd.f32 %v5751_v43, %v1846_v62  ;;  %v2049_v48 = vpop.f32.mrb[37].mxu1  ;;  %v1931_v45 = vadd.f32 %v1930_v6, %v8386_v7 }
 0x8f3   :  { %6396 = vmatpush3.bf16.xpose.msra.mxu1 %v6393_v59  ;;  %6406 = vmatprep.subr.bf16.mxu0 %v6405_v21  ;;  %v2050_v5 = vadd.f32 %v2049_v48, %v1846_v62  ;;  %v2075_v22 = vmul.f32 %v8380_v42, %v1929_v29  ;;  %v2083_v32 = vmul.f32 %v2080_v63, %v1929_v29  ;;  %v2095_v59 = vsub.s32 3, %v8360_v52 }
 0x8f4   :  { %v1934_v8 = vpop.f32.mrb[22].mxu0  ;;  %6408 = vmatpush3.bf16.msra.mxu0 %v6405_v21  ;;  %v2089_v4 = vmul.f32 %v2088_v46, %v8383_v57  ;;  %v2090_v13 = vmul.f32 %v2088_v46, %v1923_v28 }
 0x8f5   :  { %v1936_v56 = vpop.f32.mrb[23].mxu0  ;;  %v8392_v54 = vpack.c.bf16 %v2055_v36, %v2050_v5  ;;  %v5754_v1 = vpop.f32.mrb[38].mxu1  ;;  %v1935_v60 = vadd.f32 %v1934_v8, %v8372_v2  ;;  %v2096_v21 = vrot.slane %v8369_v40, %v2095_v59 }
 0x8f6   :  { %v1937_v12 = vadd.f32 %v1936_v56, %v8386_v7  ;;  %v2065_v14 = vadd.f32 %v5754_v1, %v1846_v62  ;;  %v2059_v23 = vpop.f32.mrb[39].mxu1 }
 0x8f7   :  { %6418 = vmatprep.subr.bf16.mxu0 %v8392_v54  ;;  %v2060_v61 = vadd.f32 %v2059_v23, %v1846_v62  ;;  %v2076_v49 = vmul.f32 %v8380_v42, %v1935_v60  ;;  %v2084_v3 = vmul.f32 %v2080_v63, %v1935_v60  ;;  %v2092_v6 = vmul.f32 %v2088_v46, %v1935_v60 }
 0x8f8   :  { %v6397_v51 = vpack.c.bf16 %v1937_v12, %v1931_v45  ;;  %v1940_v53 = vpop.f32.mrb[24].mxu0  ;;  %v2097_v43 = vmul.f32 %v2096_v21, %v8383_v57  ;;  %v2098_v36 = vmul.f32 %v2096_v21, %v1923_v28  ;;  %v2099_v5 = vmul.f32 %v2096_v21, %v1929_v29 }
 0x8f9   :  { %v1942_v19 = vpop.f32.mrb[25].mxu0  ;;  %v8397_v25 = vpack.c.bf16 %v2065_v14, %v2060_v61  ;;  %v1941_v48 = vadd.f32 %v1940_v53, %v8372_v2  ;;  %v2100_v56 = vmul.f32 %v2096_v21, %v1935_v60 }
 0x8fa   :  { %6398 = vmatprep.subr.bf16.mxu1 %v6397_v51  ;;  %v1943_v11 = vadd.f32 %v1942_v19, %v8386_v7 }
 0x8fb   :  { %6400 = vmatpush3.bf16.xpose.msra.mxu1 %v6397_v51  ;;  %v2660_v40 = vmul.f32 %v8380_v42, %v1941_v48  ;;  %v2664_v23 = vmul.f32 %v2080_v63, %v1941_v48  ;;  %v2668_v19 = vmul.f32 %v2088_v46, %v1941_v48 }
 0x8fc   :  { %v1946_v9 = vpop.f32.mrb[26].mxu0 }
 0x8fd   :  { %v1948_v31 = vpop.f32.mrb[27].mxu0  ;;  %v1947_v8 = vadd.f32 %v1946_v9, %v8372_v2  ;;  %v2672_v9 = vmul.f32 %v2096_v21, %v1941_v48 }
 0x8fe   :  { %v1949_v30 = vadd.f32 %v1948_v31, %v8386_v7 }
 0x8ff   :  { %v2661_v45 = vmul.f32 %v8380_v42, %v1947_v8  ;;  %v2665_v61 = vmul.f32 %v2080_v63, %v1947_v8  ;;  %v2669_v28 = vmul.f32 %v2088_v46, %v1947_v8 }
 0x900   :  { %v6409_v62 = vpack.c.bf16 %v1949_v30, %v1943_v11  ;;  %v1952_v0 = vpop.f32.mrb[28].mxu0 }
 0x901   :  { %v1954_v47 = vpop.f32.mrb[29].mxu0  ;;  %v1953_v1 = vadd.f32 %v1952_v0, %v8372_v2 }
 0x902   :  { %5764 = vmatmul.mubr.f32.vlgmr.msra.gmra.mrb[40].mxu1 %v2074_v34  ;;  %6410 = vmatprep.subr.bf16.mxu1 %v6409_v62  ;;  %v1955_v41 = vadd.f32 %v1954_v47, %v8386_v7 }
 0x903   :  { %5766 = vmatprep.mubr.f32.mxu1 %v2075_v22  ;;  %6412 = vmatpush3.bf16.xpose.msra.mxu1 %v6409_v62  ;;  %v2662_v12 = vmul.f32 %v8380_v42, %v1953_v1  ;;  %v2666_v51 = vmul.f32 %v2080_v63, %v1953_v1  ;;  %v2670_v11 = vmul.f32 %v2088_v46, %v1953_v1 }
 0x904   :  { %v1958_v10 = vpop.f32.mrb[30].mxu0 }
 0x905   :  { %v1960_v27 = vpop.f32.mrb[31].mxu0  ;;  %v1959_v57 = vadd.f32 %v1958_v10, %v8372_v2 }
 0x906   :  { %5767 = vmatmul.mubr.f32.gmra.mrb[42].mxu1 %v2076_v49  ;;  %v1961_v17 = vadd.f32 %v1960_v27, %v8386_v7  ;;  %v2091_v7 = vmul.f32 %v2088_v46, %v1929_v29  ;;  %v2674_v29 = vmul.f32 %v2096_v21, %v1953_v1 }
 0x907   :  { %5769 = vmatprep.mubr.f32.mxu1 %v2081_v55  ;;  %v2663_v14 = vmul.f32 %v8380_v42, %v1959_v57  ;;  %v2667_v53 = vmul.f32 %v2080_v63, %v1959_v57  ;;  %v2671_v2 = vmul.f32 %v2088_v46, %v1959_v57  ;;  %v2673_v42 = vmul.f32 %v2096_v21, %v1947_v8 }
 0x908   :  { %v6413_v18 = vpack.c.bf16 %v1961_v17, %v1955_v41  ;;  %v2675_v31 = vmul.f32 %v2096_v21, %v1959_v57 }
 0x90a   :  { %5770 = vmatmul.mubr.f32.gmra.mrb[44].mxu1 %v2082_v58  ;;  %6414 = vmatprep.subr.bf16.mxu1 %v6413_v18 }
 0x90b   :  { %5772 = vmatprep.mubr.f32.mxu1 %v2083_v32  ;;  %6416 = vmatpush3.bf16.xpose.msra.mxu1 %v6413_v18 }
 0x90e   :  { %5773 = vmatmul.mubr.f32.gmra.mrb[46].mxu1 %v2084_v3 }
 0x90f   :  { %5775 = vmatprep.mubr.f32.mxu1 %v2089_v4 }
 0x912   :  { %5776 = vmatmul.mubr.f32.gmra.mrb[48].mxu1 %v2090_v13 }
 0x913   :  { %5778 = vmatprep.mubr.f32.mxu1 %v2091_v7 }
 0x916   :  { %5779 = vmatmul.mubr.f32.gmra.mrb[50].mxu1 %v2092_v6 }
 0x917   :  { %5781 = vmatprep.mubr.f32.mxu1 %v2097_v43 }
 0x91a   :  { %5782 = vmatmul.mubr.f32.gmra.mrb[52].mxu1 %v2098_v36 }
 0x91b   :  { %5784 = vmatprep.mubr.f32.mxu1 %v2099_v5 }
 0x91e   :  { %5785 = vmatmul.mubr.f32.gmra.mrb[54].mxu1 %v2100_v56 }
 0x91f   :  { %5827 = vmatprep.mubr.f32.mxu1 %v2660_v40 }
 0x922   :  { %5828 = vmatmul.mubr.f32.vlgmr.msra.gmra.mrb[56].mxu1 %v2661_v45 }
 0x923   :  { %5830 = vmatprep.mubr.f32.mxu1 %v2662_v12 }
 0x926   :  { %5831 = vmatmul.mubr.f32.gmra.mrb[58].mxu1 %v2663_v14 }
 0x927   :  { %5833 = vmatprep.mubr.f32.mxu1 %v2664_v23 }
 0x92a   :  { %5834 = vmatmul.mubr.f32.gmra.mrb[60].mxu1 %v2665_v61 }
 0x92b   :  { %5836 = vmatprep.mubr.f32.mxu1 %v2666_v51 }
 0x92e   :  { %5837 = vmatmul.mubr.f32.gmra.mrb[62].mxu1 %v2667_v53 }
 0x92f   :  { %5839 = vmatprep.mubr.f32.mxu1 %v2668_v19 }
 0x932   :  { %5840 = vmatmul.mubr.f32.gmra.mrb[64].mxu1 %v2669_v28 }
 0x933   :  { %5842 = vmatprep.mubr.f32.mxu1 %v2670_v11 }
 0x936   :  { %5843 = vmatmul.mubr.f32.gmra.mrb[66].mxu1 %v2671_v2 }
 0x937   :  { %5845 = vmatprep.mubr.f32.mxu1 %v2672_v9 }
 0x93a   :  { %5846 = vmatmul.mubr.f32.gmra.mrb[68].mxu1 %v2673_v42 }
 0x93b   :  { %5848 = vmatprep.mubr.f32.mxu1 %v2674_v29 }
 0x93e   :  { %5849 = vmatmul.mubr.f32.gmra.mrb[70].mxu1 %v2675_v31 }
 0x9d5   :  { %v8428_v30 = vpop.f32.mrb[40].mxu1 }
 0x9d6   :  { %v8430_v34 = vpop.f32.mrb[41].mxu1  ;;  %v2250_v22 = vsel %vm2246_vm4, %v8428_v30, -inf }
 0x9d7   :  { %v2247_v60 = vsel %vm2246_vm4, %v8430_v34, -inf }
 0x9d8   :  { %2248 = vmax.xlane.f32.xlu0 %v2247_v60 }
 0x9d9   :  { %v8434_v62 = vpop.f32.mrb[42].mxu1 }
 0x9da   :  { %v8436_v0 = vpop.f32.mrb[43].mxu1  ;;  %v2256_v41 = vsel %vm2246_vm4, %v8434_v62, -inf }
 0x9db   :  { %v2253_v47 = vsel %vm2246_vm4, %v8436_v0, -inf }
 0x9dc   :  { %2251 = vmax.xlane.f32.xlu0 %v2250_v22  ;;  %2254 = vmax.xlane.f32.xlu1 %v2253_v47 }
 0x9dd   :  { %v8442_v63 = vpop.f32.mrb[44].mxu1 }
 0x9de   :  { %v8444_v49 = vpop.f32.mrb[45].mxu1  ;;  %v2262_v17 = vsel %vm2246_vm4, %v8442_v63, -inf }
 0x9df   :  { %v2259_v10 = vsel %vm2246_vm4, %v8444_v49, -inf }
 0x9e0   :  { %2257 = vmax.xlane.f32.xlu1 %v2256_v41  ;;  %2260 = vmax.xlane.f32.xlu0 %v2259_v10 }
 0x9e1   :  { %v8450_v55 = vpop.f32.mrb[46].mxu1 }
 0x9e2   :  { %v8452_v27 = vpop.f32.mrb[47].mxu1  ;;  %v2268_v46 = vsel %vm2246_vm4, %v8450_v55, -inf }
 0x9e3   :  { %v2265_v18 = vsel %vm2246_vm4, %v8452_v27, -inf }
 0x9e4   :  { %2263 = vmax.xlane.f32.xlu1 %v2262_v17  ;;  %2266 = vmax.xlane.f32.xlu0 %v2265_v18 }
 0x9e5   :  { %v8458_v58 = vpop.f32.mrb[48].mxu1 }
 0x9e6   :  { %v8460_v32 = vpop.f32.mrb[49].mxu1  ;;  %v2274_v7 = vsel %vm2246_vm4, %v8458_v58, -inf }
 0x9e7   :  { %v2271_v3 = vsel %vm2246_vm4, %v8460_v32, -inf }
 0x9e8   :  { %2269 = vmax.xlane.f32.xlu1 %v2268_v46  ;;  %2272 = vmax.xlane.f32.xlu0 %v2271_v3 }
 0x9e9   :  { %v8466_v4 = vpop.f32.mrb[50].mxu1 }
 0x9ea   :  { %v8468_v13 = vpop.f32.mrb[51].mxu1  ;;  %v2280_v36 = vsel %vm2246_vm4, %v8466_v4, -inf }
 0x9eb   :  { %v2277_v21 = vsel %vm2246_vm4, %v8468_v13, -inf }
 0x9ec   :  { %2275 = vmax.xlane.f32.xlu1 %v2274_v7  ;;  %2278 = vmax.xlane.f32.xlu0 %v2277_v21 }
 0x9ed   :  { %v8474_v6 = vpop.f32.mrb[52].mxu1 }
 0x9ee   :  { %v8476_v43 = vpop.f32.mrb[53].mxu1  ;;  %v2286_v56 = vsel %vm2246_vm4, %v8474_v6, -inf }
 0x9ef   :  { %v2283_v48 = vsel %vm2246_vm4, %v8476_v43, -inf }
 0x9f0   :  { %2281 = vmax.xlane.f32.xlu1 %v2280_v36  ;;  %2284 = vmax.xlane.f32.xlu0 %v2283_v48 }
 0x9f1   :  { %v8482_v5 = vpop.f32.mrb[54].mxu1 }
 0x9f2   :  { %v8484_v8 = vpop.f32.mrb[55].mxu1  ;;  %v2292_v57 = vsel %vm2246_vm4, %v8482_v5, -inf }
 0x9f3   :  { %v2289_v1 = vsel %vm2246_vm4, %v8484_v8, -inf }
 0x9f4   :  { %2287 = vmax.xlane.f32.xlu1 %v2286_v56  ;;  %2290 = vmax.xlane.f32.xlu0 %v2289_v1 }
 0x9f5   :  { %v8490_v40 = vpop.f32.mrb[56].mxu1 }
 0x9f6   :  { %v8492_v45 = vpop.f32.mrb[57].mxu1  ;;  %v2824_v61 = vsel %vm2246_vm4, %v8490_v40, -inf }
 0x9f7   :  { %v2821_v12 = vsel %vm2246_vm4, %v8492_v45, -inf }
 0x9f8   :  { %2293 = vmax.xlane.f32.xlu1 %v2292_v57  ;;  %2822 = vmax.xlane.f32.xlu0 %v2821_v12 }
 0x9f9   :  { %v8498_v14 = vpop.f32.mrb[58].mxu1 }
 0x9fa   :  { %v8500_v23 = vpop.f32.mrb[59].mxu1  ;;  %v2830_v28 = vsel %vm2246_vm4, %v8498_v14, -inf }
 0x9fb   :  { %v2827_v51 = vsel %vm2246_vm4, %v8500_v23, -inf }
 0x9fc   :  { %2825 = vmax.xlane.f32.xlu1 %v2824_v61  ;;  %2828 = vmax.xlane.f32.xlu0 %v2827_v51 }
 0x9fd   :  { %v8506_v53 = vpop.f32.mrb[60].mxu1 }
 0x9fe   :  { %v8508_v19 = vpop.f32.mrb[61].mxu1  ;;  %v2836_v42 = vsel %vm2246_vm4, %v8506_v53, -inf }
 0x9ff   :  { %v2833_v11 = vsel %vm2246_vm4, %v8508_v19, -inf }
 0xa00   :  { %2831 = vmax.xlane.f32.xlu1 %v2830_v28  ;;  %2834 = vmax.xlane.f32.xlu0 %v2833_v11 }
 0xa01   :  { %v8514_v2 = vpop.f32.mrb[62].mxu1 }
 0xa02   :  { %v8516_v9 = vpop.f32.mrb[63].mxu1  ;;  %v2842_v22 = vsel %vm2246_vm4, %v8514_v2, -inf }
 0xa03   :  { %v2839_v29 = vsel %vm2246_vm4, %v8516_v9, -inf }
 0xa04   :  { %2837 = vmax.xlane.f32.xlu1 %v2836_v42  ;;  %2840 = vmax.xlane.f32.xlu0 %v2839_v29 }
 0xa05   :  { %v8522_v31 = vpop.f32.mrb[64].mxu1 }
 0xa06   :  { %v8524_v60 = vpop.f32.mrb[65].mxu1  ;;  %v2848_v17 = vsel %vm2246_vm4, %v8522_v31, -inf }
 0xa07   :  { %v2845_v47 = vsel %vm2246_vm4, %v8524_v60, -inf }
 0xa08   :  { %2843 = vmax.xlane.f32.xlu1 %v2842_v22  ;;  %2846 = vmax.xlane.f32.xlu0 %v2845_v47 }
 0xa09   :  { %v8530_v41 = vpop.f32.mrb[66].mxu1 }
 0xa0a   :  { %v8532_v10 = vpop.f32.mrb[67].mxu1  ;;  %v2854_v7 = vsel %vm2246_vm4, %v8530_v41, -inf }
 0xa0b   :  { %v2851_v18 = vsel %vm2246_vm4, %v8532_v10, -inf }
 0xa0c   :  { %2849 = vmax.xlane.f32.xlu1 %v2848_v17  ;;  %2852 = vmax.xlane.f32.xlu0 %v2851_v18 }
 0xa0d   :  { %v8538_v46 = vpop.f32.mrb[68].mxu1 }
 0xa0e   :  { %v8540_v3 = vpop.f32.mrb[69].mxu1  ;;  %v2860_v56 = vsel %vm2246_vm4, %v8538_v46, -inf }
 0xa0f   :  { %v2857_v21 = vsel %vm2246_vm4, %v8540_v3, -inf }
 0xa10   :  { %2855 = vmax.xlane.f32.xlu1 %v2854_v7  ;;  %2858 = vmax.xlane.f32.xlu0 %v2857_v21 }
 0xa11   :  { %v8546_v36 = vpop.f32.mrb[70].mxu1 }
 0xa12   :  { %v8548_v48 = vpop.f32.mrb[71].mxu1  ;;  %v2866_v57 = vsel %vm2246_vm4, %v8546_v36, -inf }
 0xa13   :  { %v2863_v1 = vsel %vm2246_vm4, %v8548_v48, -inf }
 0xa14   :  { %2861 = vmax.xlane.f32.xlu1 %v2860_v56  ;;  %2864 = vmax.xlane.f32.xlu0 %v2863_v1 }
 0xa18   :  { %2867 = vmax.xlane.f32.xlu1 %v2866_v57 }
 0xa65   :  { %v2249_v12 = vpop.xlane.xlu0 %2248 }
 0xa66   :  { %v2295_v61 = vsub.f32 %v8430_v34, %v2249_v12 }
 0xa68   :  { %v2311_v51 = vmul.f32 1.442695, %v2295_v61 }
 0xa69   :  { %v2252_v28 = vpop.xlane.xlu0 %2251  ;;  %v2255_v11 = vpop.xlane.xlu1 %2254 }
 0xa6a   :  { %6813 = vpow2.f32 %v2311_v51  ;;  %v2296_v42 = vsub.f32 %v8428_v30, %v2252_v28  ;;  %v2297_v29 = vsub.f32 %v8436_v0, %v2255_v11 }
 0xa6c   :  { %v2313_v22 = vmul.f32 1.442695, %v2296_v42  ;;  %v2315_v47 = vmul.f32 1.442695, %v2297_v29 }
 0xa6d   :  { %v2258_v17 = vpop.xlane.xlu1 %2257  ;;  %v2261_v18 = vpop.xlane.xlu0 %2260 }
 0xa6e   :  { %6815 = vpow2.f32 %v2313_v22  ;;  %v2298_v7 = vsub.f32 %v8434_v62, %v2258_v17  ;;  %v2299_v21 = vsub.f32 %v8444_v49, %v2261_v18 }
 0xa6f   :  { %6817 = vpow2.f32 %v2315_v47 }
 0xa70   :  { %v2317_v56 = vmul.f32 1.442695, %v2298_v7  ;;  %v2319_v34 = vmul.f32 1.442695, %v2299_v21 }
 0xa71   :  { %v2264_v1 = vpop.xlane.xlu1 %2263  ;;  %v2267_v57 = vpop.xlane.xlu0 %2266 }
 0xa72   :  { %6819 = vpow2.f32 %v2317_v56  ;;  %v2300_v12 = vsub.f32 %v8442_v63, %v2264_v1  ;;  %v2301_v30 = vsub.f32 %v8452_v27, %v2267_v57 }
 0xa73   :  { %6821 = vpow2.f32 %v2319_v34 }
 0xa74   :  { %v8563_v0 = vpop.eup %6813  ;;  %v2321_v61 = vmul.f32 1.442695, %v2300_v12  ;;  %v2323_v51 = vmul.f32 1.442695, %v2301_v30 }
 0xa75   :  { %v2270_v28 = vpop.xlane.xlu1 %2269  ;;  %v2273_v11 = vpop.xlane.xlu0 %2272  ;;  %v2343_v62 = vsel %vm2246_vm4, %v8563_v0, 0.0 }
 0xa76   :  { %6823 = vpow2.f32 %v2321_v61  ;;  %v2302_v49 = vsub.f32 %v8450_v55, %v2270_v28  ;;  %v2303_v42 = vsub.f32 %v8460_v32, %v2273_v11  ;;  %2344 = vadd.xlane.f32.xlu0 %v2343_v62 }
 0xa77   :  { %6825 = vpow2.f32 %v2323_v51 }
 0xa78   :  { %v8569_v63 = vpop.eup %6815  ;;  %v2325_v27 = vmul.f32 1.442695, %v2302_v49  ;;  %v2327_v29 = vmul.f32 1.442695, %v2303_v42 }
 0xa79   :  { %v8571_v22 = vpop.eup %6817  ;;  %v2276_v47 = vpop.xlane.xlu1 %2275  ;;  %v2346_v18 = vsel %vm2246_vm4, %v8569_v63, 0.0 }
 0xa7a   :  { %v2279_v17 = vpop.xlane.xlu0 %2278  ;;  %6827 = vpow2.f32 %v2325_v27  ;;  %v2304_v7 = vsub.f32 %v8458_v58, %v2276_v47  ;;  %2347 = vadd.xlane.f32.xlu1 %v2346_v18  ;;  %v2349_v32 = vsel %vm2246_vm4, %v8571_v22, 0.0 }
 0xa7b   :  { %v2305_v55 = vsub.f32 %v8468_v13, %v2279_v17  ;;  %6829 = vpow2.f32 %v2327_v29  ;;  %2350 = vadd.xlane.f32.xlu0 %v2349_v32 }
 0xa7c   :  { %v8579_v21 = vpop.eup %6819  ;;  %v2329_v56 = vmul.f32 1.442695, %v2304_v7 }
 0xa7d   :  { %v2331_v34 = vmul.f32 1.442695, %v2305_v55  ;;  %v8581_v1 = vpop.eup %6821  ;;  %v2282_v57 = vpop.xlane.xlu1 %2281  ;;  %v2352_v30 = vsel %vm2246_vm4, %v8579_v21, 0.0 }
 0xa7e   :  { %v2285_v12 = vpop.xlane.xlu0 %2284  ;;  %6831 = vpow2.f32 %v2329_v56  ;;  %v2306_v58 = vsub.f32 %v8466_v4, %v2282_v57  ;;  %2353 = vadd.xlane.f32.xlu1 %v2352_v30  ;;  %v2355_v61 = vsel %vm2246_vm4, %v8581_v1, 0.0 }
 0xa7f   :  { %v2307_v13 = vsub.f32 %v8476_v43, %v2285_v12  ;;  %6833 = vpow2.f32 %v2331_v34  ;;  %2356 = vadd.xlane.f32.xlu0 %v2355_v61 }
 0xa80   :  { %v8589_v51 = vpop.eup %6823  ;;  %v2333_v28 = vmul.f32 1.442695, %v2306_v58 }
 0xa81   :  { %v2335_v11 = vmul.f32 1.442695, %v2307_v13  ;;  %v8591_v62 = vpop.eup %6825  ;;  %v2288_v49 = vpop.xlane.xlu1 %2287  ;;  %v2358_v27 = vsel %vm2246_vm4, %v8589_v51, 0.0 }
 0xa82   :  { %v2291_v42 = vpop.xlane.xlu0 %2290  ;;  %6835 = vpow2.f32 %v2333_v28  ;;  %v2308_v4 = vsub.f32 %v8474_v6, %v2288_v49  ;;  %2359 = vadd.xlane.f32.xlu1 %v2358_v27  ;;  %v2361_v29 = vsel %vm2246_vm4, %v8591_v62, 0.0 }
 0xa83   :  { %v2309_v43 = vsub.f32 %v8484_v8, %v2291_v42  ;;  %6837 = vpow2.f32 %v2335_v11  ;;  %2362 = vadd.xlane.f32.xlu0 %v2361_v29 }
 0xa84   :  { %v8599_v47 = vpop.eup %6827  ;;  %v2337_v17 = vmul.f32 1.442695, %v2308_v4 }
 0xa85   :  { %v2339_v18 = vmul.f32 1.442695, %v2309_v43  ;;  %v8601_v7 = vpop.eup %6829  ;;  %v2294_v55 = vpop.xlane.xlu1 %2293  ;;  %v2364_v56 = vsel %vm2246_vm4, %v8599_v47, 0.0 }
 0xa86   :  { %v2823_v32 = vpop.xlane.xlu0 %2822  ;;  %6839 = vpow2.f32 %v2337_v17  ;;  %v2310_v6 = vsub.f32 %v8482_v5, %v2294_v55  ;;  %2365 = vadd.xlane.f32.xlu1 %v2364_v56  ;;  %v2367_v34 = vsel %vm2246_vm4, %v8601_v7, 0.0 }
 0xa87   :  { %v2869_v8 = vsub.f32 %v8492_v45, %v2823_v32  ;;  %6841 = vpow2.f32 %v2339_v18  ;;  %2368 = vadd.xlane.f32.xlu0 %v2367_v34 }
 0xa88   :  { %v8609_v57 = vpop.eup %6831  ;;  %v2341_v12 = vmul.f32 1.442695, %v2310_v6 }
 0xa89   :  { %v2885_v30 = vmul.f32 1.442695, %v2869_v8  ;;  %v8611_v58 = vpop.eup %6833  ;;  %v2826_v13 = vpop.xlane.xlu1 %2825  ;;  %v2370_v28 = vsel %vm2246_vm4, %v8609_v57, 0.0 }
 0xa8a   :  { %v2829_v61 = vpop.xlane.xlu0 %2828  ;;  %6843 = vpow2.f32 %v2341_v12  ;;  %v2870_v5 = vsub.f32 %v8490_v40, %v2826_v13  ;;  %2371 = vadd.xlane.f32.xlu1 %v2370_v28  ;;  %v2373_v11 = vsel %vm2246_vm4, %v8611_v58, 0.0 }
 0xa8b   :  { %v2871_v45 = vsub.f32 %v8500_v23, %v2829_v61  ;;  %6845 = vpow2.f32 %v2885_v30  ;;  %2374 = vadd.xlane.f32.xlu0 %v2373_v11 }
 0xa8c   :  { %v8619_v49 = vpop.eup %6835  ;;  %v2887_v42 = vmul.f32 1.442695, %v2870_v5 }
 0xa8d   :  { %v2889_v27 = vmul.f32 1.442695, %v2871_v45  ;;  %v8621_v4 = vpop.eup %6837  ;;  %v2832_v43 = vpop.xlane.xlu1 %2831  ;;  %v2376_v17 = vsel %vm2246_vm4, %v8619_v49, 0.0 }
 0xa8e   :  { %v2835_v29 = vpop.xlane.xlu0 %2834  ;;  %6847 = vpow2.f32 %v2887_v42  ;;  %v2872_v40 = vsub.f32 %v8498_v14, %v2832_v43  ;;  %2377 = vadd.xlane.f32.xlu1 %v2376_v17  ;;  %v2379_v18 = vsel %vm2246_vm4, %v8621_v4, 0.0 }
 0xa8f   :  { %v2873_v23 = vsub.f32 %v8508_v19, %v2835_v29  ;;  %6849 = vpow2.f32 %v2889_v27  ;;  %2380 = vadd.xlane.f32.xlu0 %v2379_v18 }
 0xa90   :  { %v8629_v55 = vpop.eup %6839  ;;  %v2891_v32 = vmul.f32 1.442695, %v2872_v40 }
 0xa91   :  { %v2893_v56 = vmul.f32 1.442695, %v2873_v23  ;;  %v8631_v6 = vpop.eup %6841  ;;  %v2838_v8 = vpop.xlane.xlu1 %2837  ;;  %v2382_v12 = vsel %vm2246_vm4, %v8629_v55, 0.0 }
 0xa92   :  { %v2841_v34 = vpop.xlane.xlu0 %2840  ;;  %6851 = vpow2.f32 %v2891_v32  ;;  %v2874_v14 = vsub.f32 %v8506_v53, %v2838_v8  ;;  %2383 = vadd.xlane.f32.xlu1 %v2382_v12  ;;  %v2385_v30 = vsel %vm2246_vm4, %v8631_v6, 0.0 }
 0xa93   :  { %v2875_v19 = vsub.f32 %v8516_v9, %v2841_v34  ;;  %6853 = vpow2.f32 %v2893_v56  ;;  %2386 = vadd.xlane.f32.xlu0 %v2385_v30 }
 0xa94   :  { %v8639_v13 = vpop.eup %6843  ;;  %v2895_v61 = vmul.f32 1.442695, %v2874_v14 }
 0xa95   :  { %v2897_v28 = vmul.f32 1.442695, %v2875_v19  ;;  %v8641_v5 = vpop.eup %6845  ;;  %v2844_v45 = vpop.xlane.xlu1 %2843  ;;  %v2388_v42 = vsel %vm2246_vm4, %v8639_v13, 0.0 }
 0xa96   :  { %v2847_v11 = vpop.xlane.xlu0 %2846  ;;  %6855 = vpow2.f32 %v2895_v61  ;;  %v2876_v53 = vsub.f32 %v8514_v2, %v2844_v45  ;;  %2389 = vadd.xlane.f32.xlu1 %v2388_v42  ;;  %v2917_v27 = vsel %vm2246_vm4, %v8641_v5, 0.0 }
 0xa97   :  { %v2877_v9 = vsub.f32 %v8524_v60, %v2847_v11  ;;  %6857 = vpow2.f32 %v2897_v28  ;;  %2918 = vadd.xlane.f32.xlu0 %v2917_v27 }
 0xa98   :  { %v8649_v43 = vpop.eup %6847  ;;  %v2899_v29 = vmul.f32 1.442695, %v2876_v53 }
 0xa99   :  { %v2901_v17 = vmul.f32 1.442695, %v2877_v9  ;;  %v8651_v40 = vpop.eup %6849  ;;  %v2850_v23 = vpop.xlane.xlu1 %2849  ;;  %v2920_v32 = vsel %vm2246_vm4, %v8649_v43, 0.0 }
 0xa9a   :  { %v2853_v18 = vpop.xlane.xlu0 %2852  ;;  %6859 = vpow2.f32 %v2899_v29  ;;  %v2878_v2 = vsub.f32 %v8522_v31, %v2850_v23  ;;  %2921 = vadd.xlane.f32.xlu1 %v2920_v32  ;;  %v2923_v56 = vsel %vm2246_vm4, %v8651_v40, 0.0 }
 0xa9b   :  { %v2879_v60 = vsub.f32 %v8532_v10, %v2853_v18  ;;  %6861 = vpow2.f32 %v2901_v17  ;;  %2924 = vadd.xlane.f32.xlu0 %v2923_v56 }
 0xa9c   :  { %v8659_v8 = vpop.eup %6851  ;;  %v2903_v34 = vmul.f32 1.442695, %v2878_v2 }
 0xa9d   :  { %v2905_v12 = vmul.f32 1.442695, %v2879_v60  ;;  %v8661_v14 = vpop.eup %6853  ;;  %v2856_v19 = vpop.xlane.xlu1 %2855  ;;  %v2926_v61 = vsel %vm2246_vm4, %v8659_v8, 0.0 }
 0xa9e   :  { %v2859_v30 = vpop.xlane.xlu0 %2858  ;;  %6863 = vpow2.f32 %v2903_v34  ;;  %v2880_v31 = vsub.f32 %v8530_v41, %v2856_v19  ;;  %2927 = vadd.xlane.f32.xlu1 %v2926_v61  ;;  %v2929_v28 = vsel %vm2246_vm4, %v8661_v14, 0.0 }
 0xa9f   :  { %v2881_v10 = vsub.f32 %v8540_v3, %v2859_v30  ;;  %6865 = vpow2.f32 %v2905_v12  ;;  %2930 = vadd.xlane.f32.xlu0 %v2929_v28 }
 0xaa0   :  { %v8669_v45 = vpop.eup %6855  ;;  %v2907_v11 = vmul.f32 1.442695, %v2880_v31 }
 0xaa1   :  { %v2909_v42 = vmul.f32 1.442695, %v2881_v10  ;;  %v8671_v53 = vpop.eup %6857  ;;  %v2862_v9 = vpop.xlane.xlu1 %2861  ;;  %v2932_v29 = vsel %vm2246_vm4, %v8669_v45, 0.0 }
 0xaa2   :  { %v2865_v27 = vpop.xlane.xlu0 %2864  ;;  %6867 = vpow2.f32 %v2907_v11  ;;  %v2882_v41 = vsub.f32 %v8538_v46, %v2862_v9  ;;  %2933 = vadd.xlane.f32.xlu1 %v2932_v29  ;;  %v2935_v17 = vsel %vm2246_vm4, %v8671_v53, 0.0 }
 0xaa3   :  { %v2883_v3 = vsub.f32 %v8548_v48, %v2865_v27  ;;  %6869 = vpow2.f32 %v2909_v42  ;;  %2936 = vadd.xlane.f32.xlu0 %v2935_v17  ;;  %v3219_v17 = vld [vmem:[#allocation17 + $0x8] sm:$0xff] }
 0xaa4   :  { %v8679_v23 = vpop.eup %6859  ;;  %v2911_v18 = vmul.f32 1.442695, %v2882_v41 }
 0xaa5   :  { %v2913_v32 = vmul.f32 1.442695, %v2883_v3  ;;  %v8681_v2 = vpop.eup %6861  ;;  %v2868_v60 = vpop.xlane.xlu1 %2867  ;;  %v2938_v56 = vsel %vm2246_vm4, %v8679_v23, 0.0  ;;  %v3218_v3 = vld [vmem:[#allocation17] sm:$0xff] }
 0xaa6   :  { %6871 = vpow2.f32 %v2911_v18  ;;  %v2884_v46 = vsub.f32 %v8546_v36, %v2868_v60  ;;  %2939 = vadd.xlane.f32.xlu1 %v2938_v56  ;;  %v2941_v48 = vsel %vm2246_vm4, %v8681_v2, 0.0  ;;  %v6425_v18 = vpack.c.bf16 %v3219_v17, %v3218_v3 }
 0xaa7   :  { %6873 = vpow2.f32 %v2913_v32  ;;  %2942 = vadd.xlane.f32.xlu0 %v2941_v48 }
 0xaa8   :  { %v8688_v34 = vpop.eup %6863  ;;  %v2915_v12 = vmul.f32 1.442695, %v2884_v46  ;;  %6426 = vmatprep.subr.bf16.mxu1 %v6425_v18 }
 0xaa9   :  { %v8690_v19 = vpop.eup %6865  ;;  %v2944_v30 = vsel %vm2246_vm4, %v8688_v34, 0.0  ;;  %6428 = vmatpush3.bf16.msra.mxu1 %v6425_v18 }
 0xaaa   :  { %6875 = vpow2.f32 %v2915_v12  ;;  %2945 = vadd.xlane.f32.xlu1 %v2944_v30  ;;  %v2947_v61 = vsel %vm2246_vm4, %v8690_v19, 0.0 }
 0xaab   :  { %2948 = vadd.xlane.f32.xlu0 %v2947_v61 }
 0xaac   :  { %v8696_v36 = vpop.eup %6867 }
 0xaad   :  { %v8698_v31 = vpop.eup %6869  ;;  %v2950_v10 = vsel %vm2246_vm4, %v8696_v36, 0.0 }
 0xaae   :  { %2951 = vadd.xlane.f32.xlu1 %v2950_v10  ;;  %v2953_v28 = vsel %vm2246_vm4, %v8698_v31, 0.0 }
 0xaaf   :  { %2954 = vadd.xlane.f32.xlu0 %v2953_v28 }
 0xab0   :  { %v8704_v11 = vpop.eup %6871 }
 0xab1   :  { %v8706_v42 = vpop.eup %6873  ;;  %v2956_v9 = vsel %vm2246_vm4, %v8704_v11, 0.0 }
 0xab2   :  { %2957 = vadd.xlane.f32.xlu1 %v2956_v9  ;;  %v2959_v27 = vsel %vm2246_vm4, %v8706_v42, 0.0 }
 0xab3   :  { %2960 = vadd.xlane.f32.xlu0 %v2959_v27 }
 0xab4   :  { %v8712_v29 = vpop.eup %6875 }
 0xab5   :  { %v2962_v41 = vsel %vm2246_vm4, %v8712_v29, 0.0 }
 0xab6   :  { %2963 = vadd.xlane.f32.xlu1 %v2962_v41 }
 0xb03   :  { %v2345_v32 = vpop.xlane.xlu0 %2344 }
 0xb04   :  { %6877 = vrcp.f32 %v2345_v32 }
 0xb07   :  { %v2348_v60 = vpop.xlane.xlu1 %2347 }
 0xb08   :  { %6879 = vrcp.f32 %v2348_v60  ;;  %v2351_v56 = vpop.xlane.xlu0 %2350 }
 0xb09   :  { %6881 = vrcp.f32 %v2351_v56 }
 0xb0b   :  { %v2354_v46 = vpop.xlane.xlu1 %2353 }
 0xb0c   :  { %6883 = vrcp.f32 %v2354_v46  ;;  %v2357_v48 = vpop.xlane.xlu0 %2356 }
 0xb0d   :  { %6885 = vrcp.f32 %v2357_v48 }
 0xb0e   :  { %v6878_v12 = vpop.eup %6877 }
 0xb0f   :  { %v2360_v30 = vpop.xlane.xlu1 %2359  ;;  %v2392_v61 = vmul.f32 %v6878_v12, %v8563_v0 }
 0xb10   :  { %6887 = vrcp.f32 %v2360_v30  ;;  %v2363_v10 = vpop.xlane.xlu0 %2362 }
 0xb11   :  { %6889 = vrcp.f32 %v2363_v10  ;;  %5795 = vmatprep.mubr.msk.f32.mxu0 %vm2246_vm4, %v2392_v61 }
 0xb12   :  { %v6880_v28 = vpop.eup %6879 }
 0xb13   :  { %v6882_v9 = vpop.eup %6881  ;;  %v2394_v27 = vmul.f32 %v6880_v28, %v8569_v63  ;;  %v2366_v41 = vpop.xlane.xlu1 %2365 }
 0xb14   :  { %6891 = vrcp.f32 %v2366_v41  ;;  %v2369_v3 = vpop.xlane.xlu0 %2368  ;;  %v2396_v17 = vmul.f32 %v6882_v9, %v8571_v22 }
 0xb15   :  { %6893 = vrcp.f32 %v2369_v3  ;;  %5796 = vmatmul.mubr.msk.f32.vlgmr.msra.gmra.mrb[32].mxu0 %vm2246_vm4, %v2394_v27 }
 0xb16   :  { %v6884_v18 = vpop.eup %6883  ;;  %6420 = vmatpush3.bf16.msra.mxu0 %v8392_v54  ;;  %5798 = vmatprep.mubr.msk.f32.mxu0 %vm2246_vm4, %v2396_v17 }
 0xb17   :  { %v6886_v0 = vpop.eup %6885  ;;  %6422 = vmatprep.subr.bf16.mxu0 %v8397_v25  ;;  %v2372_v32 = vpop.xlane.xlu1 %2371  ;;  %v2398_v60 = vmul.f32 %v6884_v18, %v8579_v21 }
 0xb18   :  { %6895 = vrcp.f32 %v2372_v32  ;;  %v2375_v63 = vpop.xlane.xlu0 %2374  ;;  %v2400_v56 = vmul.f32 %v6886_v0, %v8581_v1 }
 0xb19   :  { %6897 = vrcp.f32 %v2375_v63  ;;  %5799 = vmatmul.mubr.msk.f32.gmra.mrb[34].mxu0 %vm2246_vm4, %v2398_v60 }
 0xb1a   :  { %v6888_v22 = vpop.eup %6887  ;;  %6424 = vmatpush3.bf16.msra.mxu0 %v8397_v25  ;;  %5801 = vmatprep.mubr.msk.f32.mxu0 %vm2246_vm4, %v2400_v56 }
 0xb1b   :  { %v6890_v54 = vpop.eup %6889  ;;  %v2378_v46 = vpop.xlane.xlu1 %2377  ;;  %v2402_v48 = vmul.f32 %v6888_v22, %v8589_v51 }
 0xb1c   :  { %6899 = vrcp.f32 %v2378_v46  ;;  %v2381_v12 = vpop.xlane.xlu0 %2380  ;;  %v2404_v21 = vmul.f32 %v6890_v54, %v8591_v62 }
 0xb1d   :  { %6901 = vrcp.f32 %v2381_v12  ;;  %5802 = vmatmul.mubr.msk.f32.gmra.mrb[36].mxu0 %vm2246_vm4, %v2402_v48 }
 0xb1e   :  { %v6892_v1 = vpop.eup %6891  ;;  %5804 = vmatprep.mubr.msk.f32.mxu0 %vm2246_vm4, %v2404_v21 }
 0xb1f   :  { %v6894_v30 = vpop.eup %6893  ;;  %v2384_v61 = vpop.xlane.xlu1 %2383  ;;  %v2406_v25 = vmul.f32 %v6892_v1, %v8599_v47 }
 0xb20   :  { %6903 = vrcp.f32 %v2384_v61  ;;  %v2387_v10 = vpop.xlane.xlu0 %2386  ;;  %v2408_v28 = vmul.f32 %v6894_v30, %v8601_v7 }
 0xb21   :  { %6905 = vrcp.f32 %v2387_v10  ;;  %5805 = vmatmul.mubr.msk.f32.gmra.mrb[38].mxu0 %vm2246_vm4, %v2406_v25 }
 0xb22   :  { %v6896_v51 = vpop.eup %6895  ;;  %5807 = vmatprep.mubr.msk.f32.mxu0 %vm2246_vm4, %v2408_v28 }
 0xb23   :  { %v6898_v62 = vpop.eup %6897  ;;  %v2390_v9 = vpop.xlane.xlu1 %2389  ;;  %v2410_v27 = vmul.f32 %v6896_v51, %v8609_v57 }
 0xb24   :  { %6907 = vrcp.f32 %v2390_v9  ;;  %v2919_v41 = vpop.xlane.xlu0 %2918  ;;  %v2412_v3 = vmul.f32 %v6898_v62, %v8611_v58 }
 0xb25   :  { %6909 = vrcp.f32 %v2919_v41  ;;  %5808 = vmatmul.mubr.msk.f32.gmra.mrb[40].mxu0 %vm2246_vm4, %v2410_v27 }
 0xb26   :  { %v6900_v47 = vpop.eup %6899  ;;  %5810 = vmatprep.mubr.msk.f32.mxu0 %vm2246_vm4, %v2412_v3 }
 0xb27   :  { %v6902_v7 = vpop.eup %6901  ;;  %v2922_v17 = vpop.xlane.xlu1 %2921  ;;  %v2414_v18 = vmul.f32 %v6900_v47, %v8619_v49 }
 0xb28   :  { %6911 = vrcp.f32 %v2922_v17  ;;  %v2925_v0 = vpop.xlane.xlu0 %2924  ;;  %v2416_v32 = vmul.f32 %v6902_v7, %v8621_v4 }
 0xb29   :  { %6913 = vrcp.f32 %v2925_v0  ;;  %5811 = vmatmul.mubr.msk.f32.gmra.mrb[42].mxu0 %vm2246_vm4, %v2414_v18 }
 0xb2a   :  { %v6904_v57 = vpop.eup %6903  ;;  %5813 = vmatprep.mubr.msk.f32.mxu0 %vm2246_vm4, %v2416_v32 }
 0xb2b   :  { %v6906_v58 = vpop.eup %6905  ;;  %v2928_v60 = vpop.xlane.xlu1 %2927  ;;  %v2418_v63 = vmul.f32 %v6904_v57, %v8629_v55 }
 0xb2c   :  { %6915 = vrcp.f32 %v2928_v60  ;;  %v2931_v56 = vpop.xlane.xlu0 %2930  ;;  %v2420_v22 = vmul.f32 %v6906_v58, %v8631_v6 }
 0xb2d   :  { %6917 = vrcp.f32 %v2931_v56  ;;  %5814 = vmatmul.mubr.msk.f32.gmra.mrb[44].mxu0 %vm2246_vm4, %v2418_v63 }
 0xb2e   :  { %v6908_v49 = vpop.eup %6907  ;;  %5816 = vmatprep.mubr.msk.f32.mxu0 %vm2246_vm4, %v2420_v22 }
 0xb2f   :  { %v6910_v4 = vpop.eup %6909  ;;  %v2934_v54 = vpop.xlane.xlu1 %2933  ;;  %v2422_v46 = vmul.f32 %v6908_v49, %v8639_v13 }
 0xb30   :  { %6919 = vrcp.f32 %v2934_v54  ;;  %v2937_v48 = vpop.xlane.xlu0 %2936  ;;  %v2966_v12 = vmul.f32 %v6910_v4, %v8641_v5  ;;  %v3222_v4 = vld [vmem:[#allocation17 + $0x20] sm:$0xff] }
 0xb31   :  { %6921 = vrcp.f32 %v2937_v48  ;;  %5817 = vmatmul.mubr.msk.f32.gmra.mrb[46].mxu0 %vm2246_vm4, %v2422_v46  ;;  %v3225_v46 = vld [vmem:[#allocation17 + $0x38] sm:$0xff] }
 0xb32   :  { %v6912_v55 = vpop.eup %6911  ;;  %5859 = vmatprep.mubr.msk.f32.mxu0 %vm2246_vm4, %v2966_v12  ;;  %v3227_v12 = vld [vmem:[#allocation17 + $0x48] sm:$0xff] }
 0xb33   :  { %v6914_v6 = vpop.eup %6913  ;;  %v2968_v21 = vmul.f32 %v6912_v55, %v8649_v43  ;;  %v2940_v1 = vpop.xlane.xlu1 %2939 }
 0xb34   :  { %6923 = vrcp.f32 %v2940_v1  ;;  %v2943_v30 = vpop.xlane.xlu0 %2942  ;;  %v2970_v61 = vmul.f32 %v6914_v6, %v8651_v40  ;;  %v3228_v6 = vld [vmem:[#allocation17 + $0x50] sm:$0xff] }
 0xb35   :  { %6925 = vrcp.f32 %v2943_v30  ;;  %5860 = vmatmul.mubr.msk.f32.vlgmr.msra.gmra.mrb[48].mxu0 %vm2246_vm4, %v2968_v21  ;;  %v3229_v21 = vld [vmem:[#allocation17 + $0x58] sm:$0xff]  ;;  %v3230_v30 = vld [vmem:[#allocation17 + $0x60] sm:$0xff] }
 0xb36   :  { %v6916_v13 = vpop.eup %6915  ;;  %5862 = vmatprep.mubr.msk.f32.mxu0 %vm2246_vm4, %v2970_v61  ;;  %v6445_v1 = vpack.c.bf16 %v3229_v21, %v3228_v6  ;;  %v3231_v61 = vld [vmem:[#allocation17 + $0x68] sm:$0xff] }
 0xb37   :  { %v6918_v5 = vpop.eup %6917  ;;  %v2946_v25 = vpop.xlane.xlu1 %2945  ;;  %v2972_v10 = vmul.f32 %v6916_v13, %v8659_v8  ;;  %v6449_v13 = vpack.c.bf16 %v3231_v61, %v3230_v30 }
 0xb38   :  { %6927 = vrcp.f32 %v2946_v25  ;;  %v2949_v28 = vpop.xlane.xlu0 %2948  ;;  %v2974_v51 = vmul.f32 %v6918_v5, %v8661_v14  ;;  %v3232_v5 = vld [vmem:[#allocation17 + $0x70] sm:$0xff]  ;;  %v3233_v25 = vld [vmem:[#allocation17 + $0x78] sm:$0xff] }
 0xb39   :  { %6929 = vrcp.f32 %v2949_v28  ;;  %5863 = vmatmul.mubr.msk.f32.gmra.mrb[50].mxu0 %vm2246_vm4, %v2972_v10  ;;  %v6453_v10 = vpack.c.bf16 %v3233_v25, %v3232_v5 }
 0xb3a   :  { %v6920_v43 = vpop.eup %6919  ;;  %5865 = vmatprep.mubr.msk.f32.mxu0 %vm2246_vm4, %v2974_v51 }
 0xb3b   :  { %v6922_v40 = vpop.eup %6921  ;;  %v2952_v62 = vpop.xlane.xlu1 %2951  ;;  %v2976_v9 = vmul.f32 %v6920_v43, %v8669_v45 }
 0xb3c   :  { %6931 = vrcp.f32 %v2952_v62  ;;  %v2955_v27 = vpop.xlane.xlu0 %2954  ;;  %v2978_v41 = vmul.f32 %v6922_v40, %v8671_v53  ;;  %v8785_v40 = vld [vmem:[%s9365_s28] sm:$0xf] }
 0xb3d   :  { %6933 = vrcp.f32 %v2955_v27  ;;  %5866 = vmatmul.mubr.msk.f32.gmra.mrb[52].mxu0 %vm2246_vm4, %v2976_v9  ;;  %v8789_v62 = vrot.slane %v8785_v40, %v8364_v16  ;;  %v8793_v27 = vrot.slane %v8785_v40, %v8375_v26 }
 0xb3e   :  { %v6924_v8 = vpop.eup %6923  ;;  %5868 = vmatprep.mubr.msk.f32.mxu0 %vm2246_vm4, %v2978_v41 }
 0xb3f   :  { %v6926_v14 = vpop.eup %6925  ;;  %v2958_v3 = vpop.xlane.xlu1 %2957  ;;  %v2980_v47 = vmul.f32 %v6924_v8, %v8679_v23 }
 0xb40   :  { %6935 = vrcp.f32 %v2958_v3  ;;  %v2961_v7 = vpop.xlane.xlu0 %2960  ;;  %v2982_v17 = vmul.f32 %v6926_v14, %v8681_v2 }
 0xb41   :  { %6937 = vrcp.f32 %v2961_v7  ;;  %5869 = vmatmul.mubr.msk.f32.gmra.mrb[54].mxu0 %vm2246_vm4, %v2980_v47 }
 0xb42   :  { %v6928_v45 = vpop.eup %6927  ;;  %5871 = vmatprep.mubr.msk.f32.mxu0 %vm2246_vm4, %v2982_v17 }
 0xb43   :  { %v6930_v53 = vpop.eup %6929  ;;  %v2964_v18 = vpop.xlane.xlu1 %2963  ;;  %v2984_v0 = vmul.f32 %v6928_v45, %v8688_v34 }
 0xb44   :  { %6939 = vrcp.f32 %v2964_v18  ;;  %v2986_v32 = vmul.f32 %v6930_v53, %v8690_v19 }
 0xb45   :  { %5872 = vmatmul.mubr.msk.f32.gmra.mrb[56].mxu0 %vm2246_vm4, %v2984_v0 }
 0xb46   :  { %v6932_v23 = vpop.eup %6931  ;;  %5874 = vmatprep.mubr.msk.f32.mxu0 %vm2246_vm4, %v2986_v32 }
 0xb47   :  { %v6934_v57 = vpop.eup %6933  ;;  %v2988_v2 = vmul.f32 %v6932_v23, %v8696_v36  ;;  %v3220_v36 = vld [vmem:[#allocation17 + $0x10] sm:$0xff]  ;;  %v8803_v23 = vrot.slane %v8785_v40, %v8367_v39 }
 0xb48   :  { %v2990_v58 = vmul.f32 %v6934_v57, %v8698_v31  ;;  %v3221_v31 = vld [vmem:[#allocation17 + $0x18] sm:$0xff] }
 0xb49   :  { %5875 = vmatmul.mubr.msk.f32.gmra.mrb[58].mxu0 %vm2246_vm4, %v2988_v2  ;;  %v6429_v49 = vpack.c.bf16 %v3221_v31, %v3220_v36 }
 0xb4a   :  { %v6936_v60 = vpop.eup %6935  ;;  %5877 = vmatprep.mubr.msk.f32.mxu0 %vm2246_vm4, %v2990_v58 }
 0xb4b   :  { %v6938_v63 = vpop.eup %6937  ;;  %v2992_v34 = vmul.f32 %v6936_v60, %v8704_v11  ;;  %6430 = vmatprep.subr.bf16.mxu1 %v6429_v49  ;;  %v3223_v11 = vld [vmem:[#allocation17 + $0x28] sm:$0xff] }
 0xb4c   :  { %v2994_v19 = vmul.f32 %v6938_v63, %v8706_v42  ;;  %6432 = vmatpush3.bf16.msra.mxu1 %v6429_v49  ;;  %v6433_v54 = vpack.c.bf16 %v3223_v11, %v3222_v4  ;;  %v3224_v42 = vld [vmem:[#allocation17 + $0x30] sm:$0xff]  ;;  %v2651_v11 = vrot.slane %v8785_v40, %v2095_v59 }
 0xb4d   :  { %5878 = vmatmul.mubr.msk.f32.gmra.mrb[60].mxu0 %vm2246_vm4, %v2992_v34  ;;  %v6437_v48 = vpack.c.bf16 %v3225_v46, %v3224_v42 }
 0xb4e   :  { %v6940_v56 = vpop.eup %6939  ;;  %5880 = vmatprep.mubr.msk.f32.mxu0 %vm2246_vm4, %v2994_v19  ;;  %6434 = vmatprep.subr.bf16.mxu1 %v6433_v54 }
 0xb4f   :  { %v2996_v22 = vmul.f32 %v6940_v56, %v8712_v29  ;;  %v3226_v29 = vld [vmem:[#allocation17 + $0x40] sm:$0xff] }
 0xb50   :  { %6436 = vmatpush3.bf16.msra.mxu1 %v6433_v54  ;;  %v6441_v55 = vpack.c.bf16 %v3227_v12, %v3226_v29 }
 0xb51   :  { %5881 = vmatmul.mubr.msk.f32.gmra.mrb[62].mxu0 %vm2246_vm4, %v2996_v22  ;;  %6438 = vmatprep.subr.bf16.mxu1 %v6437_v48 }
 0xb52   :  { %3602 = vmatprep.mubr.f32.mxu0 %v9338_v33 }
 0xb54   :  { %6440 = vmatpush3.bf16.msra.mxu1 %v6437_v48 }
 0xb55   :  { %6442 = vmatprep.subr.bf16.mxu1 %v6441_v55 }
 0xb58   :  { %6444 = vmatpush3.bf16.msra.mxu1 %v6441_v55 }
 0xb59   :  { %6446 = vmatprep.subr.bf16.mxu1 %v6445_v1 }
 0xb5c   :  { %6448 = vmatpush3.bf16.msra.mxu1 %v6445_v1 }
 0xb5d   :  { %6450 = vmatprep.subr.bf16.mxu1 %v6449_v13 }
 0xb60   :  { %6452 = vmatpush3.bf16.msra.mxu1 %v6449_v13 }
 0xb61   :  { %6454 = vmatprep.subr.bf16.mxu1 %v6453_v10 }
 0xb64   :  { %6456 = vmatpush3.bf16.msra.mxu1 %v6453_v10 }
 0xbe8   :  { %v5797_v28 = vpop.f32.mrb[32].mxu0 }
 0xbe9   :  { %v2537_v51 = vpop.f32.mrb[33].mxu0  ;;  %v2621_v8 = vmul.f32 %v5797_v28, %v8789_v62 }
 0xbea   :  { %v2620_v47 = vmul.f32 %v8789_v62, %v2537_v51 }
 0xbec   :  { %v5800_v43 = vpop.f32.mrb[34].mxu0 }
 0xbed   :  { %v2547_v9 = vpop.f32.mrb[35].mxu0  ;;  %v2623_v18 = vmul.f32 %v5800_v43, %v8789_v62 }
 0xbee   :  { %v2622_v57 = vmul.f32 %v8789_v62, %v2547_v9 }
 0xbf0   :  { %v5803_v41 = vpop.f32.mrb[36].mxu0 }
 0xbf1   :  { %v2629_v14 = vmul.f32 %v5803_v41, %v8793_v27  ;;  %v2557_v3 = vpop.f32.mrb[37].mxu0 }
 0xbf2   :  { %v2628_v7 = vmul.f32 %v8793_v27, %v2557_v3 }
 0xbf3   :  { %v2633_v17 = vadd.f32 %v2629_v14, %v2621_v8 }
 0xbf4   :  { %v2632_v45 = vadd.f32 %v2628_v7, %v2620_v47  ;;  %v5806_v53 = vpop.f32.mrb[38].mxu0 }
 0xbf5   :  { %v2631_v0 = vmul.f32 %v5806_v53, %v8793_v27  ;;  %v2567_v32 = vpop.f32.mrb[39].mxu0 }
 0xbf6   :  { %v2630_v2 = vmul.f32 %v8793_v27, %v2567_v32 }
 0xbf7   :  { %v2635_v58 = vadd.f32 %v2631_v0, %v2623_v18 }
 0xbf8   :  { %v2634_v60 = vadd.f32 %v2630_v2, %v2622_v57  ;;  %v5809_v63 = vpop.f32.mrb[40].mxu0 }
 0xbf9   :  { %v2641_v34 = vmul.f32 %v5809_v63, %v8803_v23  ;;  %v2577_v19 = vpop.f32.mrb[41].mxu0 }
 0xbfa   :  { %v2640_v56 = vmul.f32 %v8803_v23, %v2577_v19 }
 0xbfb   :  { %v2645_v22 = vadd.f32 %v2641_v34, %v2633_v17 }
 0xbfc   :  { %v2644_v36 = vadd.f32 %v2640_v56, %v2632_v45  ;;  %v5812_v31 = vpop.f32.mrb[42].mxu0 }
 0xbfd   :  { %v2643_v49 = vmul.f32 %v5812_v31, %v8803_v23  ;;  %v2587_v4 = vpop.f32.mrb[43].mxu0 }
 0xbfe   :  { %v2642_v54 = vmul.f32 %v8803_v23, %v2587_v4 }
 0xbff   :  { %v2647_v42 = vadd.f32 %v2643_v49, %v2635_v58 }
 0xc00   :  { %v2646_v46 = vadd.f32 %v2642_v54, %v2634_v60  ;;  %v5815_v48 = vpop.f32.mrb[44].mxu0 }
 0xc01   :  { %v2653_v29 = vmul.f32 %v5815_v48, %v2651_v11  ;;  %v2597_v12 = vpop.f32.mrb[45].mxu0 }
 0xc02   :  { %v2652_v55 = vmul.f32 %v2651_v11, %v2597_v12 }
 0xc03   :  { %v2657_v6 = vadd.f32 %v2653_v29, %v2645_v22 }
 0xc04   :  { %v2656_v21 = vadd.f32 %v2652_v55, %v2644_v36  ;;  %v5818_v1 = vpop.f32.mrb[46].mxu0 }
 0xc05   :  { %v2655_v30 = vmul.f32 %v5818_v1, %v2651_v11  ;;  %v2607_v61 = vpop.f32.mrb[47].mxu0 }
 0xc06   :  { %v2654_v13 = vmul.f32 %v2651_v11, %v2607_v61  ;;  %5915 = vmatprep.mubr.f32.mxu1 %v2656_v21 }
 0xc07   :  { %v2659_v5 = vadd.f32 %v2655_v30, %v2647_v42  ;;  %5916 = vmatmul.mubr.f32.vlgmr.msra.gmra.mrb[72].mxu1 %v2657_v6  ;;  %v5109_v30 = vld [vmem:[#allocation19] ss:$0 sm:$0xff] }
 0xc08   :  { %v2658_v52 = vadd.f32 %v2654_v13, %v2646_v46  ;;  %v5861_v25 = vpop.f32.mrb[48].mxu0 }
 0xc09   :  { %v3111_v59 = vpop.f32.mrb[49].mxu0  ;;  %v3191_v43 = vmul.f32 %v5861_v25, %v8789_v62 }
 0xc0a   :  { %5918 = vmatprep.mubr.f32.mxu1 %v2658_v52  ;;  %v3190_v8 = vmul.f32 %v3111_v59, %v8789_v62 }
 0xc0b   :  { %5919 = vmatmul.mubr.f32.gmra.mrb[74].mxu1 %v2659_v5 }
 0xc0c   :  { %v5864_v10 = vpop.f32.mrb[50].mxu0 }
 0xc0d   :  { %v3121_v28 = vpop.f32.mrb[51].mxu0  ;;  %v3193_v17 = vmul.f32 %v5864_v10, %v8789_v62 }
 0xc0e   :  { %v3192_v18 = vmul.f32 %v3121_v28, %v8789_v62 }
 0xc10   :  { %v5867_v51 = vpop.f32.mrb[52].mxu0 }
 0xc11   :  { %v3195_v9 = vmul.f32 %v5867_v51, %v8793_v27  ;;  %v3131_v41 = vpop.f32.mrb[53].mxu0 }
 0xc12   :  { %v3194_v14 = vmul.f32 %v3131_v41, %v8793_v27 }
 0xc13   :  { %v3199_v3 = vadd.f32 %v3195_v9, %v3191_v43 }
 0xc14   :  { %v3198_v47 = vadd.f32 %v3194_v14, %v3190_v8  ;;  %v5870_v7 = vpop.f32.mrb[54].mxu0 }
 0xc15   :  { %v3197_v45 = vmul.f32 %v5870_v7, %v8793_v27  ;;  %v3141_v53 = vpop.f32.mrb[55].mxu0 }
 0xc16   :  { %v3196_v0 = vmul.f32 %v3141_v53, %v8793_v27 }
 0xc17   :  { %v3201_v32 = vadd.f32 %v3197_v45, %v3193_v17  ;;  %v3473_v45 = vld [vmem:[#allocation23] sm:$0xff] }
 0xc18   :  { %v3200_v57 = vadd.f32 %v3196_v0, %v3192_v18  ;;  %v5873_v2 = vpop.f32.mrb[56].mxu0  ;;  %v3476_v18 = vld [vmem:[#allocation23 + $0x18] sm:$0xff]  ;;  %v3475_v0 = vld [vmem:[#allocation23 + $0x10] sm:$0xff] }
 0xc19   :  { %v3203_v58 = vmul.f32 %v5873_v2, %v8803_v23  ;;  %v3151_v60 = vpop.f32.mrb[57].mxu0 }
 0xc1a   :  { %v3202_v63 = vmul.f32 %v3151_v60, %v8803_v23  ;;  %v3483_v60 = vld [vmem:[#allocation23 + $0x50] sm:$0xff] }
 0xc1b   :  { %v3207_v34 = vadd.f32 %v3203_v58, %v3199_v3  ;;  %v3480_v58 = vld [vmem:[#allocation23 + $0x38] sm:$0xff] }
 0xc1c   :  { %v3206_v19 = vadd.f32 %v3202_v63, %v3198_v47  ;;  %v5876_v56 = vpop.f32.mrb[58].mxu0  ;;  %v6461_v63 = vpack.c.bf16 %v3483_v60, %v3480_v58  ;;  %v3497_v60 = vld [vmem:[#allocation23 + $0xc0] sm:$0xff] }
 0xc1d   :  { %v3205_v22 = vmul.f32 %v5876_v56, %v8803_v23  ;;  %v3161_v36 = vpop.f32.mrb[59].mxu0 }
 0xc1e   :  { %v3204_v31 = vmul.f32 %v3161_v36, %v8803_v23  ;;  %v3486_v36 = vld [vmem:[#allocation23 + $0x68] sm:$0xff] }
 0xc1f   :  { %v3209_v49 = vadd.f32 %v3205_v22, %v3201_v32  ;;  %v3478_v32 = vld [vmem:[#allocation23 + $0x28] sm:$0xff] }
 0xc20   :  { %v3208_v62 = vadd.f32 %v3204_v31, %v3200_v57  ;;  %v5879_v4 = vpop.f32.mrb[60].mxu0  ;;  %v6459_v57 = vpack.c.bf16 %v3476_v18, %v3473_v45  ;;  %v6489_v2 = vpack.c.bf16 %v3478_v32, %v3475_v0  ;;  %v3489_v31 = vld [vmem:[#allocation23 + $0x80] sm:$0xff]  ;;  %v3498_v18 = vld [vmem:[#allocation23 + $0xc8] sm:$0xff] }
 0xc21   :  { %v3211_v27 = vmul.f32 %v5879_v4, %v2651_v11  ;;  %v3171_v54 = vpop.f32.mrb[61].mxu0  ;;  %v3488_v4 = vld [vmem:[#allocation23 + $0x78] sm:$0xff]  ;;  %v3501_v0 = vld [vmem:[#allocation23 + $0xe0] sm:$0xff] }
 0xc22   :  { %v3210_v42 = vmul.f32 %v3171_v54, %v2651_v11  ;;  %6490 = vmatprep.subr.bf16.mxu1 %v6489_v2  ;;  %v3490_v54 = vld [vmem:[#allocation23 + $0x88] sm:$0xff]  ;;  %v6473_v58 = vpack.c.bf16 %v3501_v0, %v3498_v18 }
 0xc23   :  { %v3215_v46 = vadd.f32 %v3211_v27, %v3207_v34  ;;  %v3481_v34 = vld [vmem:[#allocation23 + $0x40] sm:$0xff]  ;;  %6492 = vmatpush3.bf16.msra.mxu1 %v6489_v2  ;;  %v3487_v27 = vld [vmem:[#allocation23 + $0x70] sm:$0xff] }
 0xc24   :  { %v3214_v48 = vadd.f32 %v3210_v42, %v3206_v19  ;;  %v5882_v29 = vpop.f32.mrb[62].mxu0  ;;  %v3484_v19 = vld [vmem:[#allocation23 + $0x58] sm:$0xff]  ;;  %v6497_v42 = vpack.c.bf16 %v3490_v54, %v3487_v27 }
 0xc25   :  { %v3213_v12 = vmul.f32 %v5882_v29, %v2651_v11  ;;  %v3181_v55 = vpop.f32.mrb[63].mxu0  ;;  %v6493_v22 = vpack.c.bf16 %v3484_v19, %v3481_v34  ;;  %v3502_v34 = vld [vmem:[#allocation23 + $0xe8] sm:$0xff]  ;;  %v3504_v19 = vld [vmem:[#allocation23 + $0xf8] sm:$0xff] }
 0xc26   :  { %v3212_v6 = vmul.f32 %v3181_v55, %v2651_v11  ;;  %5921 = vmatprep.mubr.f32.mxu1 %v3214_v48 }
 0xc27   :  { %v3217_v21 = vadd.f32 %v3213_v12, %v3209_v49  ;;  %5922 = vmatmul.mubr.f32.gmra.mrb[76].mxu1 %v3215_v46  ;;  %v3485_v49 = vld [vmem:[#allocation23 + $0x60] sm:$0xff]  ;;  %6494 = vmatprep.subr.bf16.mxu1 %v6493_v22 }
 0xc28   :  { %v3216_v1 = vadd.f32 %v3212_v6, %v3208_v62  ;;  %v6465_v62 = vpack.c.bf16 %v3489_v31, %v3486_v36  ;;  %v6467_v46 = vpack.c.bf16 %v3488_v4, %v3485_v49  ;;  %6496 = vmatpush3.bf16.msra.mxu1 %v6493_v22  ;;  %v3503_v49 = vld [vmem:[#allocation23 + $0xf0] sm:$0xff]  ;;  %v3505_v4 = vld [vmem:[#allocation23 + $0x100] sm:$0xff] }
 0xc29   :  { %6498 = vmatprep.subr.bf16.mxu1 %v6497_v42 }
 0xc2a   :  { %5924 = vmatprep.mubr.f32.mxu1 %v3216_v1 }
 0xc2b   :  { %5925 = vmatmul.mubr.f32.gmra.mrb[78].mxu1 %v3217_v21 }
 0xc2c   :  { %6500 = vmatpush3.bf16.msra.mxu1 %v6497_v42  ;;  %v3508_v42 = vld [vmem:[#allocation23 + $0x118] sm:$0xff] }
 0xcda   :  { %v5917_v23 = vpop.f32.mrb[72].mxu1 }
 0xcdb   :  { %v3313_v61 = vadd.f32 %v5917_v23, %v5109_v30  ;;  %v3307_v13 = vpop.f32.mrb[73].mxu1 }
 0xcdc   :  { %v3308_v5 = vadd.f32 %v5109_v30, %v3307_v13 }
 0xcdd   :  { %v8827_v52 = vadd.f32 %v8321_v20, %v3313_v61 }
 0xcde   :  { %v5920_v25 = vpop.f32.mrb[74].mxu1  ;;  %v8830_v59 = vadd.f32 %v3308_v5, %v8323_v44 }
 0xcdf   :  { %v3323_v10 = vadd.f32 %v5920_v25, %v5109_v30  ;;  %3358 = vadd.xlane.f32.xlu1 %v8827_v52  ;;  %v3317_v11 = vpop.f32.mrb[75].mxu1 }
 0xce0   :  { %v3318_v28 = vadd.f32 %v5109_v30, %v3317_v11  ;;  %3356 = vadd.xlane.f32.xlu0 %v8830_v59 }
 0xce1   :  { %v8835_v51 = vadd.f32 %v8329_v15, %v3323_v10 }
 0xce2   :  { %v8838_v43 = vadd.f32 %v3318_v28, %v8331_v24  ;;  %v3492_v28 = vld [vmem:[#allocation23 + $0x98] sm:$0xff] }
 0xce3   :  { %3362 = vadd.xlane.f32.xlu1 %v8835_v51 }
 0xce4   :  { %3360 = vadd.xlane.f32.xlu0 %v8838_v43 }
 0xcfa   :  { %v5923_v20 = vpop.f32.mrb[76].mxu1 }
 0xcfb   :  { %v3333_v44 = vadd.f32 %v5923_v20, %v5109_v30  ;;  %v3327_v9 = vpop.f32.mrb[77].mxu1  ;;  %v3495_v20 = vld [vmem:[#allocation23 + $0xb0] sm:$0xff] }
 0xcfc   :  { %v3328_v41 = vadd.f32 %v5109_v30, %v3327_v9 }
 0xcfd   :  { %v8843_v8 = vadd.f32 %v8337_v38, %v3333_v44  ;;  %v3474_v38 = vld [vmem:[#allocation23 + $0x8] sm:$0xff] }
 0xcfe   :  { %v5926_v14 = vpop.f32.mrb[78].mxu1  ;;  %v8846_v3 = vadd.f32 %v3328_v41, %v8339_v50  ;;  %v3477_v50 = vld [vmem:[#allocation23 + $0x20] sm:$0xff]  ;;  %v3491_v41 = vld [vmem:[#allocation23 + $0x90] sm:$0xff] }
 0xcff   :  { %v3343_v15 = vadd.f32 %v5926_v14, %v5109_v30  ;;  %3366 = vadd.xlane.f32.xlu1 %v8843_v8  ;;  %v3337_v24 = vpop.f32.mrb[79].mxu1  ;;  %v6457_v53 = vpack.c.bf16 %v3477_v50, %v3474_v38  ;;  %v3494_v14 = vld [vmem:[#allocation23 + $0xa8] sm:$0xff] }
 0xd00   :  { %v3338_v47 = vadd.f32 %v5109_v30, %v3337_v24  ;;  %3364 = vadd.xlane.f32.xlu0 %v8846_v3  ;;  %v6471_v24 = vpack.c.bf16 %v3494_v14, %v3491_v41  ;;  %v389_v41 = vld [vmem:[%s9366_s1] sm:$0xff]  ;;  %v390_v14 = vld [vmem:[%s9366_s1 + $0x8] sm:$0xff] }
 0xd01   :  { %v8851_v7 = vadd.f32 %v8345_v35, %v3343_v15  ;;  %v3479_v35 = vld [vmem:[#allocation23 + $0x30] sm:$0xff]  ;;  %6458 = vmatprep.subr.bf16.mxu0 %v6457_v53  ;;  %v3493_v15 = vld [vmem:[#allocation23 + $0xa0] sm:$0xff] }
 0xd02   :  { %v8854_v17 = vadd.f32 %v3338_v47, %v8347_v37  ;;  %v3482_v37 = vld [vmem:[#allocation23 + $0x48] sm:$0xff]  ;;  %6460 = vmatpush1.bf16.msra.mxu0 %v6459_v57  ;;  %v3496_v47 = vld [vmem:[#allocation23 + $0xb8] sm:$0xff] }
 0xd03   :  { %3370 = vadd.xlane.f32.xlu1 %v8851_v7  ;;  %v6463_v56 = vpack.c.bf16 %v3482_v37, %v3479_v35  ;;  %6462 = vmatprep.subr.bf16.mxu0 %v6461_v63  ;;  %v6501_v50 = vpack.c.bf16 %v3496_v47, %v3493_v15  ;;  %v3500_v35 = vld [vmem:[#allocation23 + $0xd8] sm:$0xff]  ;;  %v8900_v15 = vpack.c.bf16 %v390_v14, %v389_v41 }
 0xd04   :  { %3368 = vadd.xlane.f32.xlu0 %v8854_v17 }
 0xd05   :  { %6502 = vmatprep.subr.bf16.mxu1 %v6501_v50 }
 0xd06   :  { %6464 = vmatpush1.bf16.msra.mxu0 %v6463_v56  ;;  %6504 = vmatpush3.bf16.msra.mxu1 %v6501_v50  ;;  %v3507_v56 = vld [vmem:[#allocation23 + $0x110] sm:$0xff] }
 0xd07   :  { %6466 = vmatprep.subr.bf16.mxu0 %v6465_v62  ;;  %v6477_v31 = vpack.c.bf16 %v3507_v56, %v3504_v19  ;;  %v3506_v62 = vld [vmem:[#allocation23 + $0x108] sm:$0xff] }
 0xd08   :  { %v6479_v54 = vpack.c.bf16 %v3506_v62, %v3503_v49  ;;  %v392_v49 = vld [vmem:[%s9366_s1 + $0x18] sm:$0xff] }
 0xd0a   :  { %6468 = vmatpush1.bf16.msra.mxu0 %v6467_v46  ;;  %v3510_v46 = vld [vmem:[#allocation23 + $0x128] sm:$0xff] }
 0xd6c   :  { %v3359_v48 = vpop.xlane.xlu1 %3358 }
 0xd6d   :  { %v3374_v29 = vmul.f32 0.0078125, %v3359_v48  ;;  %v3357_v12 = vpop.xlane.xlu0 %3356  ;;  %v3513_v48 = vld [vmem:[#allocation23 + $0x140] sm:$0xff] }
 0xd6e   :  { %v3373_v55 = vmul.f32 0.0078125, %v3357_v12  ;;  %v6481_v12 = vpack.c.bf16 %v3513_v48, %v3510_v46  ;;  %v393_v48 = vld [vmem:[%s9366_s1 + $0x20] sm:$0xff] }
 0xd6f   :  { %v8859_v6 = vsub.f32 %v8827_v52, %v3374_v29  ;;  %v6509_v29 = vpack.c.bf16 %v3508_v42, %v3505_v4 }
 0xd70   :  { %v8862_v21 = vsub.f32 %v8830_v59, %v3373_v55  ;;  %v3363_v1 = vpop.xlane.xlu1 %3362  ;;  %v3509_v55 = vld [vmem:[#allocation23 + $0x120] sm:$0xff] }
 0xd71   :  { %v3376_v30 = vmul.f32 0.0078125, %v3363_v1  ;;  %v3361_v23 = vpop.xlane.xlu0 %3360  ;;  %v3390_v61 = vmul.f32 %v8859_v6, %v8859_v6  ;;  %v3512_v1 = vld [vmem:[#allocation23 + $0x138] sm:$0xff] }
 0xd72   :  { %v3375_v13 = vmul.f32 0.0078125, %v3361_v23  ;;  %v3389_v5 = vmul.f32 %v8862_v21, %v8862_v21  ;;  %v3514_v23 = vld [vmem:[#allocation23 + $0x148] sm:$0xff] }
 0xd73   :  { %v8869_v25 = vsub.f32 %v8835_v51, %v3376_v30  ;;  %3399 = vadd.xlane.f32.xlu1 %v3390_v61  ;;  %v6469_v51 = vpack.c.bf16 %v3495_v20, %v3492_v28  ;;  %v3511_v30 = vld [vmem:[#allocation23 + $0x130] sm:$0xff]  ;;  %v3516_v61 = vld [vmem:[#allocation23 + $0x158] sm:$0xff] }
 0xd74   :  { %v8872_v52 = vsub.f32 %v8838_v43, %v3375_v13  ;;  %3397 = vadd.xlane.f32.xlu0 %v3389_v5  ;;  %v3519_v13 = vld [vmem:[#allocation23 + $0x170] sm:$0xff]  ;;  %v6513_v5 = vpack.c.bf16 %v3514_v23, %v3511_v30 }
 0xd75   :  { %v3392_v59 = vmul.f32 %v8869_v25, %v8869_v25  ;;  %6470 = vmatprep.subr.bf16.mxu0 %v6469_v51  ;;  %v6485_v28 = vpack.c.bf16 %v3519_v13, %v3516_v61  ;;  %v3515_v20 = vld [vmem:[#allocation23 + $0x150] sm:$0xff] }
 0xd76   :  { %v3391_v10 = vmul.f32 %v8872_v52, %v8872_v52  ;;  %6472 = vmatpush1.bf16.msra.mxu0 %v6471_v24  ;;  %v398_v23 = vld [vmem:[%s9366_s1 + $0x48] sm:$0xff] }
 0xd77   :  { %3403 = vadd.xlane.f32.xlu1 %v3392_v59  ;;  %6474 = vmatprep.subr.bf16.mxu0 %v6473_v58  ;;  %v6483_v59 = vpack.c.bf16 %v3512_v1, %v3509_v55  ;;  %v395_v55 = vld [vmem:[%s9366_s1 + $0x30] sm:$0xff]  ;;  %v396_v1 = vld [vmem:[%s9366_s1 + $0x38] sm:$0xff] }
 0xd78   :  { %3401 = vadd.xlane.f32.xlu0 %v3391_v10  ;;  %v3517_v10 = vld [vmem:[#allocation23 + $0x160] sm:$0xff]  ;;  %v8949_v30 = vpack.c.bf16 %v396_v1, %v395_v55 }
 0xd8c   :  { %v3367_v11 = vpop.xlane.xlu1 %3366 }
 0xd8d   :  { %v3378_v44 = vmul.f32 0.0078125, %v3367_v11  ;;  %v3365_v9 = vpop.xlane.xlu0 %3364  ;;  %v3520_v11 = vld [vmem:[#allocation23 + $0x178] sm:$0xff] }
 0xd8e   :  { %v3377_v43 = vmul.f32 0.0078125, %v3365_v9  ;;  %v6517_v9 = vpack.c.bf16 %v3520_v11, %v3517_v10 }
 0xd8f   :  { %v8879_v38 = vsub.f32 %v8843_v8, %v3378_v44  ;;  %v3499_v8 = vld [vmem:[#allocation23 + $0xd0] sm:$0xff]  ;;  %v3518_v44 = vld [vmem:[#allocation23 + $0x168] sm:$0xff] }
 0xd90   :  { %v8882_v45 = vsub.f32 %v8846_v3, %v3377_v43  ;;  %v3371_v53 = vpop.xlane.xlu1 %3370  ;;  %v6475_v3 = vpack.c.bf16 %v3500_v35, %v3497_v60  ;;  %v6505_v36 = vpack.c.bf16 %v3502_v34, %v3499_v8  ;;  %v6487_v51 = vpack.c.bf16 %v3518_v44, %v3515_v20  ;;  %v8903_v8 = vld [vmem:[#allocation20] ss:$0 sm:$0xff]  ;;  %v8907_v34 = vld [vmem:[#allocation22] ss:$0 sm:$0xff]  ;;  %v400_v20 = vld [vmem:[%s9366_s1 + $0x58] sm:$0xff] }
 0xd91   :  { %v3380_v32 = vmul.f32 0.0078125, %v3371_v53  ;;  %v3369_v57 = vpop.xlane.xlu0 %3368  ;;  %v3394_v2 = vmul.f32 %v8879_v38, %v8879_v38 }
 0xd92   :  { %v3379_v63 = vmul.f32 0.0078125, %v3369_v57  ;;  %v3393_v37 = vmul.f32 %v8882_v45, %v8882_v45  ;;  %6476 = vmatpush1.bf16.msra.mxu0 %v6475_v3  ;;  %6506 = vmatprep.subr.bf16.mxu1 %v6505_v36 }
 0xd93   :  { %v8889_v22 = vsub.f32 %v8851_v7, %v3380_v32  ;;  %3407 = vadd.xlane.f32.xlu1 %v3394_v2  ;;  %6478 = vmatprep.subr.bf16.mxu0 %v6477_v31  ;;  %v391_v31 = vld [vmem:[%s9366_s1 + $0x10] sm:$0xff] }
 0xd94   :  { %v8892_v27 = vsub.f32 %v8854_v17, %v3379_v63  ;;  %3405 = vadd.xlane.f32.xlu0 %v3393_v37  ;;  %6508 = vmatpush3.bf16.msra.mxu1 %v6505_v36  ;;  %v8922_v46 = vpack.c.bf16 %v392_v49, %v391_v31  ;;  %v9013_v31 = vld [vmem:[#allocation25] sm:$0x7] }
 0xd95   :  { %v3396_v7 = vmul.f32 %v8889_v22, %v8889_v22  ;;  %6510 = vmatprep.subr.bf16.mxu1 %v6509_v29  ;;  %v3526_v49 = vrot.slane %v9013_v31, %v8364_v16 }
 0xd96   :  { %v3395_v17 = vmul.f32 %v8892_v27, %v8892_v27  ;;  %6480 = vmatpush1.bf16.msra.mxu0 %v6479_v54 }
 0xd97   :  { %3411 = vadd.xlane.f32.xlu1 %v3396_v7  ;;  %6482 = vmatprep.subr.bf16.mxu0 %v6481_v12  ;;  %v394_v7 = vld [vmem:[%s9366_s1 + $0x28] sm:$0xff] }
 0xd98   :  { %3409 = vadd.xlane.f32.xlu0 %v3395_v17  ;;  %6512 = vmatpush3.bf16.msra.mxu1 %v6509_v29  ;;  %v8939_v12 = vpack.c.bf16 %v394_v7, %v393_v48  ;;  %v397_v17 = vld [vmem:[%s9366_s1 + $0x40] sm:$0xff] }
 0xd99   :  { %6514 = vmatprep.subr.bf16.mxu1 %v6513_v5  ;;  %v8957_v10 = vpack.c.bf16 %v398_v23, %v397_v17 }
 0xd9a   :  { %6484 = vmatpush1.bf16.msra.mxu0 %v6483_v59 }
 0xd9b   :  { %6486 = vmatprep.subr.bf16.mxu0 %v6485_v28  ;;  %v399_v28 = vld [vmem:[%s9366_s1 + $0x50] sm:$0xff] }
 0xd9c   :  { %6516 = vmatpush3.bf16.msra.mxu1 %v6513_v5 }
 0xd9d   :  { %6518 = vmatprep.subr.bf16.mxu1 %v6517_v9 }
 0xd9e   :  { %6488 = vmatpush1.bf16.msra.mxu0 %v6487_v51 }
 0xd9f   :  { %6522 = vmatprep.subr.bf16.mxu0 %v8900_v15 }
 0xda0   :  { %6520 = vmatpush3.bf16.msra.mxu1 %v6517_v9 }
 0xda1   :  { %6015 = vmatprep.subr.msk.mxu1 %vm3979_vm5, %v8785_v40 }
 0xe00   :  { %v3400_v43 = vpop.xlane.xlu1 %3399 }
 0xe01   :  { %v3414_v24 = vmul.f32 0.0078125, %v3400_v43  ;;  %v3398_v47 = vpop.xlane.xlu0 %3397  ;;  %v8965_v43 = vpack.c.bf16 %v400_v20, %v399_v28 }
 0xe02   :  { %v3413_v50 = vmul.f32 0.0078125, %v3398_v47 }
 0xe03   :  { %v3422_v53 = vadd.f32 1e-05, %v3414_v24 }
 0xe04   :  { %v3421_v18 = vadd.f32 1e-05, %v3413_v50  ;;  %v3404_v0 = vpop.xlane.xlu1 %3403 }
 0xe05   :  { %6941 = vrsqrt.f32 %v3422_v53  ;;  %v3416_v32 = vmul.f32 0.0078125, %v3404_v0  ;;  %v3402_v57 = vpop.xlane.xlu0 %3401 }
 0xe06   :  { %6943 = vrsqrt.f32 %v3421_v18  ;;  %v3415_v2 = vmul.f32 0.0078125, %v3402_v57 }
 0xe07   :  { %v3424_v58 = vadd.f32 1e-05, %v3416_v32 }
 0xe08   :  { %v3423_v60 = vadd.f32 1e-05, %v3415_v2 }
 0xe09   :  { %6945 = vrsqrt.f32 %v3424_v58 }
 0xe0a   :  { %6947 = vrsqrt.f32 %v3423_v60 }
 0xe0f   :  { %v6942_v35 = vpop.eup %6941 }
 0xe10   :  { %v6944_v63 = vpop.eup %6943  ;;  %v3438_v37 = vmul.f32 %v6942_v35, %v8859_v6 }
 0xe11   :  { %v3437_v3 = vmul.f32 %v6944_v63, %v8862_v21 }
 0xe12   :  { %v3452_v19 = vmul.f32 %v8903_v8, %v3438_v37 }
 0xe13   :  { %v6946_v56 = vpop.eup %6945  ;;  %v3451_v36 = vmul.f32 %v8903_v8, %v3437_v3  ;;  %v402_v3 = vld [vmem:[%s9366_s1 + $0x68] sm:$0xff] }
 0xe14   :  { %v6948_v62 = vpop.eup %6947  ;;  %v3440_v4 = vmul.f32 %v6946_v56, %v8869_v25  ;;  %v8919_v21 = vadd.f32 %v8907_v34, %v3452_v19  ;;  %v404_v56 = vld [vmem:[%s9366_s1 + $0x78] sm:$0xff] }
 0xe15   :  { %v8915_v54 = vadd.f32 %v8907_v34, %v3451_v36  ;;  %v3439_v6 = vmul.f32 %v6948_v62, %v8872_v52  ;;  %v3530_v62 = vrot.slane %v9013_v31, %v8375_v26 }
 0xe16   :  { %v3454_v42 = vmul.f32 %v8903_v8, %v3440_v4 }
 0xe17   :  { %3603 = vmatmul.mubr.f32.vlgmr.msra.gmra.mrb[64].mxu0 %v8915_v54  ;;  %5959 = vmatprep.mubr.f32.mxu1 %v8915_v54  ;;  %v3453_v25 = vmul.f32 %v8903_v8, %v3439_v6 }
 0xe18   :  { %5960 = vmatmul.mubr.f32.vlgmr.msra.gmra.mrb[80].mxu1 %v8919_v21  ;;  %3608 = vmatprep.mubr.f32.mxu0 %v9338_v33  ;;  %v8936_v29 = vadd.f32 %v8907_v34, %v3454_v42 }
 0xe19   :  { %v8932_v52 = vadd.f32 %v8907_v34, %v3453_v25  ;;  %6524 = vmatpush3.bf16.msra.mxu0 %v8900_v15  ;;  %6016 = vmatpush3.msk.msra.mxu1 %vm3979_vm5, %v8785_v40  ;;  %v3762_v40 = vld [vmem:[#allocation26 + $0x30] sm:$0xff] }
 0xe1a   :  { %6526 = vmatprep.subr.bf16.mxu0 %v8922_v46  ;;  %6586 = vmatprep.subr.bf16.mxu1 %v8900_v15 }
 0xe1b   :  { %3609 = vmatmul.mubr.f32.gmra.mrb[66].mxu0 %v8919_v21  ;;  %5962 = vmatprep.mubr.f32.mxu1 %v8932_v52 }
 0xe1c   :  { %5963 = vmatmul.mubr.f32.gmra.mrb[82].mxu1 %v8936_v29  ;;  %3614 = vmatprep.mubr.f32.mxu0 %v9338_v33 }
 0xe1d   :  { %6528 = vmatpush3.bf16.msra.mxu0 %v8922_v46 }
 0xe1e   :  { %6530 = vmatprep.subr.bf16.mxu0 %v8939_v12 }
 0xe1f   :  { %3615 = vmatmul.mubr.f32.gmra.mrb[68].mxu0 %v8932_v52 }
 0xe20   :  { %v3408_v61 = vpop.xlane.xlu1 %3407  ;;  %3620 = vmatprep.mubr.f32.mxu0 %v9338_v33 }
 0xe21   :  { %v3418_v13 = vmul.f32 0.0078125, %v3408_v61  ;;  %v3406_v5 = vpop.xlane.xlu0 %3405  ;;  %6532 = vmatpush3.bf16.msra.mxu0 %v8939_v12 }
 0xe22   :  { %v3417_v59 = vmul.f32 0.0078125, %v3406_v5  ;;  %6534 = vmatprep.subr.bf16.mxu0 %v8949_v30 }
 0xe23   :  { %v3426_v11 = vadd.f32 1e-05, %v3418_v13  ;;  %3621 = vmatmul.mubr.f32.gmra.mrb[70].mxu0 %v8936_v29 }
 0xe24   :  { %v3425_v44 = vadd.f32 1e-05, %v3417_v59  ;;  %v3412_v9 = vpop.xlane.xlu1 %3411  ;;  %3626 = vmatprep.mubr.f32.mxu0 %v9338_v33 }
 0xe25   :  { %6949 = vrsqrt.f32 %v3426_v11  ;;  %v3420_v51 = vmul.f32 0.0078125, %v3412_v9  ;;  %v3410_v41 = vpop.xlane.xlu0 %3409  ;;  %6536 = vmatpush3.bf16.msra.mxu0 %v8949_v30 }
 0xe26   :  { %6951 = vrsqrt.f32 %v3425_v44  ;;  %v3419_v14 = vmul.f32 0.0078125, %v3410_v41  ;;  %6538 = vmatprep.subr.bf16.mxu0 %v8957_v10 }
 0xe27   :  { %v3428_v24 = vadd.f32 1e-05, %v3420_v51 }
 0xe28   :  { %v3427_v47 = vadd.f32 1e-05, %v3419_v14 }
 0xe29   :  { %6953 = vrsqrt.f32 %v3428_v24  ;;  %6540 = vmatpush3.bf16.msra.mxu0 %v8957_v10 }
 0xe2a   :  { %6955 = vrsqrt.f32 %v3427_v47  ;;  %6542 = vmatprep.subr.bf16.mxu0 %v8965_v43 }
 0xe2d   :  { %6544 = vmatpush3.bf16.msra.mxu0 %v8965_v43 }
 0xe2f   :  { %v6950_v50 = vpop.eup %6949 }
 0xe30   :  { %v6952_v53 = vpop.eup %6951  ;;  %v3442_v18 = vmul.f32 %v6950_v50, %v8879_v38 }
 0xe31   :  { %v3441_v0 = vmul.f32 %v6952_v53, %v8882_v45 }
 0xe32   :  { %v3456_v32 = vmul.f32 %v8903_v8, %v3442_v18 }
 0xe33   :  { %v6954_v57 = vpop.eup %6953  ;;  %v3455_v2 = vmul.f32 %v8903_v8, %v3441_v0 }
 0xe34   :  { %v6956_v58 = vpop.eup %6955  ;;  %v3444_v60 = vmul.f32 %v6954_v57, %v8889_v22  ;;  %v8980_v37 = vadd.f32 %v8907_v34, %v3456_v32 }
 0xe35   :  { %v8976_v35 = vadd.f32 %v8907_v34, %v3455_v2  ;;  %v3443_v63 = vmul.f32 %v6956_v58, %v8892_v27 }
 0xe36   :  { %v3458_v38 = vmul.f32 %v8903_v8, %v3444_v60 }
 0xe37   :  { %3627 = vmatmul.mubr.f32.gmra.mrb[72].mxu0 %v8976_v35  ;;  %5965 = vmatprep.mubr.f32.mxu1 %v8976_v35  ;;  %v3457_v45 = vmul.f32 %v8903_v8, %v3443_v63  ;;  %v401_v8 = vld [vmem:[%s9366_s1 + $0x60] sm:$0xff] }
 0xe38   :  { %5966 = vmatmul.mubr.f32.gmra.mrb[84].mxu1 %v8980_v37  ;;  %3632 = vmatprep.mubr.f32.mxu0 %v9338_v33  ;;  %v8992_v27 = vadd.f32 %v8907_v34, %v3458_v38  ;;  %v9003_v19 = vpack.c.bf16 %v402_v3, %v401_v8 }
 0xe39   :  { %v8989_v22 = vadd.f32 %v8907_v34, %v3457_v45  ;;  %v403_v34 = vld [vmem:[%s9366_s1 + $0x70] sm:$0xff] }
 0xe3a   :  { %6546 = vmatprep.subr.bf16.mxu0 %v9003_v19  ;;  %v9009_v36 = vpack.c.bf16 %v404_v56, %v403_v34 }
 0xe3b   :  { %3633 = vmatmul.mubr.f32.gmra.mrb[74].mxu0 %v8980_v37  ;;  %5968 = vmatprep.mubr.f32.mxu1 %v8989_v22 }
 0xe3c   :  { %5969 = vmatmul.mubr.f32.gmra.mrb[86].mxu1 %v8992_v27  ;;  %3638 = vmatprep.mubr.f32.mxu0 %v9338_v33 }
 0xe3d   :  { %6548 = vmatpush3.bf16.msra.mxu0 %v9003_v19 }
 0xe3e   :  { %6550 = vmatprep.subr.bf16.mxu0 %v9009_v36 }
 0xe3f   :  { %3639 = vmatmul.mubr.f32.gmra.mrb[76].mxu0 %v8989_v22 }
 0xe40   :  { %3644 = vmatprep.mubr.f32.mxu0 %v9338_v33 }
 0xe41   :  { %6552 = vmatpush3.bf16.msra.mxu0 %v9009_v36 }
 0xe43   :  { %3645 = vmatmul.mubr.f32.gmra.mrb[78].mxu0 %v8992_v27 }
 0xeea   :  { %v3604_v4 = vpop.f32.mrb[64].mxu0 }
 0xeeb   :  { %v3605_v6 = vadd.f32 %v3604_v4, %v3526_v49  ;;  %v3606_v42 = vpop.f32.mrb[65].mxu0  ;;  %v9019_v25 = vpop.f32.mrb[80].mxu1 }
 0xeec   :  { %v3607_v48 = vadd.f32 %v3606_v42, %v3530_v62  ;;  %v9021_v7 = vpop.f32.mrb[81].mxu1 }
 0xeee   :  { %v3773_v55 = vmul.f32 %v3607_v48, %v3605_v6  ;;  %v3610_v1 = vpop.f32.mrb[66].mxu0 }
 0xeef   :  { %v3611_v17 = vadd.f32 %v3610_v1, %v3526_v49  ;;  %v3612_v23 = vpop.f32.mrb[67].mxu0  ;;  %v9023_v61 = vpop.f32.mrb[82].mxu1 }
 0xef0   :  { %v3613_v13 = vadd.f32 %v3612_v23, %v3530_v62  ;;  %v9025_v5 = vpop.f32.mrb[83].mxu1  ;;  %6003 = vmatprep.mubr.f32.mxu0 %v3773_v55 }
 0xef2   :  { %v3774_v16 = vmul.f32 %v3613_v13, %v3611_v17  ;;  %v3616_v26 = vpop.f32.mrb[68].mxu0 }
 0xef3   :  { %v3617_v59 = vadd.f32 %v3616_v26, %v3526_v49  ;;  %v3618_v11 = vpop.f32.mrb[69].mxu0 }
 0xef4   :  { %v3619_v28 = vadd.f32 %v3618_v11, %v3530_v62  ;;  %6004 = vmatmul.mubr.f32.vlgmr.msra.gmra.mrb[80].mxu0 %v3774_v16 }
 0xef6   :  { %v3775_v20 = vmul.f32 %v3619_v28, %v3617_v59  ;;  %v3622_v44 = vpop.f32.mrb[70].mxu0 }
 0xef7   :  { %v3623_v9 = vadd.f32 %v3622_v44, %v3526_v49  ;;  %v3624_v51 = vpop.f32.mrb[71].mxu0 }
 0xef8   :  { %v3625_v41 = vadd.f32 %v3624_v51, %v3530_v62  ;;  %6006 = vmatprep.mubr.f32.mxu0 %v3775_v20  ;;  %v3759_v51 = vld [vmem:[#allocation26 + $0x18] sm:$0xff] }
 0xefa   :  { %v3776_v14 = vmul.f32 %v3625_v41, %v3623_v9 }
 0xefc   :  { %6007 = vmatmul.mubr.f32.gmra.mrb[82].mxu0 %v3776_v14  ;;  %v3761_v14 = vld [vmem:[#allocation26 + $0x28] sm:$0xff] }
 0xf0a   :  { %v3628_v24 = vpop.f32.mrb[72].mxu0 }
 0xf0b   :  { %v3629_v47 = vadd.f32 %v3628_v24, %v3526_v49  ;;  %v3630_v50 = vpop.f32.mrb[73].mxu0  ;;  %v9027_v53 = vpop.f32.mrb[84].mxu1 }
 0xf0c   :  { %v3631_v18 = vadd.f32 %v3630_v50, %v3530_v62  ;;  %v9029_v0 = vpop.f32.mrb[85].mxu1 }
 0xf0d   :  { %v9031_v32 = vmul.f32 %v3629_v47, %v3607_v48 }
 0xf0e   :  { %v3777_v57 = vmul.f32 %v3631_v18, %v3605_v6  ;;  %v9033_v2 = vmul.f32 %v3631_v18, %v3629_v47  ;;  %v3634_v58 = vpop.f32.mrb[74].mxu0  ;;  %v3763_v47 = vld [vmem:[#allocation26 + $0x38] sm:$0xff] }
 0xf0f   :  { %v3635_v60 = vadd.f32 %v3634_v58, %v3526_v49  ;;  %v3636_v63 = vpop.f32.mrb[75].mxu0  ;;  %v9035_v38 = vpop.f32.mrb[86].mxu1  ;;  %v9067_v50 = vpack.c.bf16 %v3763_v47, %v3762_v40 }
 0xf10   :  { %v3637_v45 = vadd.f32 %v3636_v63, %v3530_v62  ;;  %v9037_v8 = vpop.f32.mrb[87].mxu1  ;;  %6009 = vmatprep.mubr.f32.mxu0 %v3777_v57 }
 0xf11   :  { %v9039_v3 = vmul.f32 %v3635_v60, %v3613_v13 }
 0xf12   :  { %v3778_v34 = vmul.f32 %v3637_v45, %v3611_v17  ;;  %v9041_v56 = vmul.f32 %v3637_v45, %v3635_v60  ;;  %v3640_v4 = vpop.f32.mrb[76].mxu0 }
 0xf13   :  { %v3641_v42 = vadd.f32 %v3640_v4, %v3526_v49  ;;  %v3642_v48 = vpop.f32.mrb[77].mxu0 }
 0xf14   :  { %v3643_v6 = vadd.f32 %v3642_v48, %v3530_v62  ;;  %6010 = vmatmul.mubr.f32.gmra.mrb[84].mxu0 %v3778_v34 }
 0xf15   :  { %v9043_v55 = vmul.f32 %v3641_v42, %v3619_v28  ;;  %v3758_v28 = vld [vmem:[#allocation26 + $0x10] sm:$0xff] }
 0xf16   :  { %v3779_v1 = vmul.f32 %v3643_v6, %v3617_v59  ;;  %v9045_v23 = vmul.f32 %v3643_v6, %v3641_v42  ;;  %v3646_v16 = vpop.f32.mrb[78].mxu0  ;;  %v3756_v59 = vld [vmem:[#allocation26] sm:$0xff] }
 0xf17   :  { %v3647_v26 = vadd.f32 %v3646_v16, %v3526_v49  ;;  %v3648_v11 = vpop.f32.mrb[79].mxu0  ;;  %v3757_v49 = vld [vmem:[#allocation26 + $0x8] sm:$0xff] }
 0xf18   :  { %v3649_v20 = vadd.f32 %v3648_v11, %v3530_v62  ;;  %6012 = vmatprep.mubr.f32.mxu0 %v3779_v1  ;;  %v9056_v62 = vpack.c.bf16 %v3757_v49, %v3756_v59 }
 0xf19   :  { %v9047_v13 = vmul.f32 %v3647_v26, %v3625_v41  ;;  %v9058_v41 = vpack.c.bf16 %v3759_v51, %v3758_v28 }
 0xf1a   :  { %v3780_v17 = vmul.f32 %v3649_v20, %v3623_v9  ;;  %v9049_v44 = vmul.f32 %v3649_v20, %v3647_v26  ;;  %v3760_v9 = vld [vmem:[#allocation26 + $0x20] sm:$0xff]  ;;  %6554 = vmatprep.subr.bf16.mxu0 %v9056_v62 }
 0xf1b   :  { %6556 = vmatpush3.bf16.msra.mxu0 %v9056_v62  ;;  %v9063_v24 = vpack.c.bf16 %v3761_v14, %v3760_v9 }
 0xf1c   :  { %6013 = vmatmul.mubr.f32.gmra.mrb[86].mxu0 %v3780_v17  ;;  %6558 = vmatprep.subr.bf16.mxu0 %v9058_v41 }
 0xf1f   :  { %6560 = vmatpush3.bf16.msra.mxu0 %v9058_v41 }
 0xf20   :  { %6562 = vmatprep.subr.bf16.mxu0 %v9063_v24 }
 0xf23   :  { %6564 = vmatpush3.bf16.msra.mxu0 %v9063_v24 }
 0xf24   :  { %6566 = vmatprep.subr.bf16.mxu0 %v9067_v50 }
 0xf27   :  { %6568 = vmatpush3.bf16.msra.mxu0 %v9067_v50 }
 0xfc7   :  { %v6005_v18 = vpop.f32.mrb[80].mxu0 }
 0xfc8   :  { %v3847_v57 = vpop.f32.mrb[81].mxu0  ;;  %v3887_v63 = vmul.f32 0.17677669, %v6005_v18 }
 0xfc9   :  { %v3886_v45 = vmul.f32 0.17677669, %v3847_v57 }
 0xfca   :  { %v3898_v6 = vsel %vm3894_vm6, %v3887_v63, -inf }
 0xfcb   :  { %v3895_v16 = vsel %vm3894_vm6, %v3886_v45, -inf }
 0xfcf   :  { %v6008_v58 = vpop.f32.mrb[82].mxu0 }
 0xfd0   :  { %v3857_v60 = vpop.f32.mrb[83].mxu0  ;;  %v3889_v49 = vmul.f32 0.17677669, %v6008_v58 }
 0xfd1   :  { %v3888_v28 = vmul.f32 0.17677669, %v3857_v60 }
 0xfd2   :  { %v3904_v33 = vsel %vm3894_vm6, %v3889_v49, -inf }
 0xfd3   :  { %v3901_v58 = vsel %vm3894_vm6, %v3888_v28, -inf }
 0xfe7   :  { %v6011_v34 = vpop.f32.mrb[84].mxu0 }
 0xfe8   :  { %v3891_v4 = vmul.f32 0.17677669, %v6011_v34  ;;  %v3867_v42 = vpop.f32.mrb[85].mxu0 }
 0xfe9   :  { %v3890_v48 = vmul.f32 0.17677669, %v3867_v42 }
 0xfea   :  { %v3899_v1 = vsel %vm3894_vm6, %v3891_v4, -inf }
 0xfeb   :  { %v3900_v26 = vmax.f32 %v3898_v6, %v3899_v1  ;;  %v3896_v11 = vsel %vm3894_vm6, %v3890_v48, -inf }
 0xfec   :  { %v3897_v20 = vmax.f32 %v3895_v16, %v3896_v11 }
 0xfed   :  { %v3908_v17 = vsub.f32 %v3887_v63, %v3900_v26  ;;  %v3912_v59 = vsub.f32 %v3891_v4, %v3900_v26 }
 0xfee   :  { %v3907_v51 = vsub.f32 %v3886_v45, %v3897_v20  ;;  %v3911_v9 = vsub.f32 %v3890_v48, %v3897_v20 }
 0xfef   :  { %v3917_v14 = vmul.f32 1.442695, %v3908_v17  ;;  %v3925_v40 = vmul.f32 1.442695, %v3912_v59  ;;  %v6014_v47 = vpop.f32.mrb[86].mxu0 }
 0xff0   :  { %v3915_v18 = vmul.f32 1.442695, %v3907_v51  ;;  %v3923_v57 = vmul.f32 1.442695, %v3911_v9  ;;  %v3893_v34 = vmul.f32 0.17677669, %v6014_v47 }
 0xff1   :  { %6957 = vpow2.f32 %v3917_v14  ;;  %v3877_v42 = vpop.f32.mrb[87].mxu0 }
 0xff2   :  { %6959 = vpow2.f32 %v3925_v40  ;;  %v3905_v6 = vsel %vm3894_vm6, %v3893_v34, -inf  ;;  %v3892_v1 = vmul.f32 0.17677669, %v3877_v42 }
 0xff3   :  { %6961 = vpow2.f32 %v3915_v18  ;;  %v3906_v63 = vmax.f32 %v3904_v33, %v3905_v6 }
 0xff4   :  { %6963 = vpow2.f32 %v3923_v57  ;;  %v3902_v60 = vsel %vm3894_vm6, %v3892_v1, -inf }
 0xff5   :  { %v3910_v45 = vsub.f32 %v3889_v49, %v3906_v63  ;;  %v3914_v4 = vsub.f32 %v3893_v34, %v3906_v63  ;;  %v3903_v48 = vmax.f32 %v3901_v58, %v3902_v60 }
 0xff7   :  { %v3921_v16 = vmul.f32 1.442695, %v3910_v45  ;;  %v3929_v26 = vmul.f32 1.442695, %v3914_v4  ;;  %v3909_v11 = vsub.f32 %v3888_v28, %v3903_v48  ;;  %v3913_v20 = vsub.f32 %v3892_v1, %v3903_v48 }
 0xff9   :  { %6965 = vpow2.f32 %v3921_v16  ;;  %v3919_v17 = vmul.f32 1.442695, %v3909_v11  ;;  %v3927_v59 = vmul.f32 1.442695, %v3913_v20 }
 0xffa   :  { %6967 = vpow2.f32 %v3929_v26 }
 0xffb   :  { %v6958_v51 = vpop.eup %6957  ;;  %6969 = vpow2.f32 %v3919_v17 }
 0xffc   :  { %v6960_v9 = vpop.eup %6959  ;;  %v3934_v33 = vsel %vm3894_vm6, %v6958_v51, 0.0  ;;  %6971 = vpow2.f32 %v3927_v59 }
 0xffd   :  { %v6962_v14 = vpop.eup %6961  ;;  %v3935_v40 = vsel %vm3894_vm6, %v6960_v9, 0.0 }
 0xffe   :  { %v6964_v49 = vpop.eup %6963  ;;  %v3936_v47 = vadd.f32 %v3935_v40, %v3934_v33  ;;  %v3931_v18 = vsel %vm3894_vm6, %v6962_v14, 0.0 }
 0xfff   :  { %v3932_v28 = vsel %vm3894_vm6, %v6964_v49, 0.0 }
0x1000   :  { %6973 = vrcp.f32 %v3936_v47  ;;  %v3933_v57 = vadd.f32 %v3932_v28, %v3931_v18 }
0x1002   :  { %6975 = vrcp.f32 %v3933_v57 }
0x1003   :  { %v6966_v34 = vpop.eup %6965 }
0x1004   :  { %v6968_v42 = vpop.eup %6967  ;;  %v3940_v6 = vsel %vm3894_vm6, %v6966_v34, 0.0 }
0x1005   :  { %v6970_v1 = vpop.eup %6969  ;;  %v3941_v63 = vsel %vm3894_vm6, %v6968_v42, 0.0 }
0x1006   :  { %v6972_v58 = vpop.eup %6971  ;;  %v3942_v60 = vadd.f32 %v3941_v63, %v3940_v6  ;;  %v3937_v45 = vsel %vm3894_vm6, %v6970_v1, 0.0 }
0x1007   :  { %v3938_v4 = vsel %vm3894_vm6, %v6972_v58, 0.0 }
0x1008   :  { %6977 = vrcp.f32 %v3942_v60  ;;  %v3939_v48 = vadd.f32 %v3938_v4, %v3937_v45 }
0x100a   :  { %v6974_v16 = vpop.eup %6973  ;;  %6979 = vrcp.f32 %v3939_v48 }
0x100b   :  { %v3946_v26 = vmul.f32 %v6974_v16, %v6958_v51  ;;  %v3952_v11 = vmul.f32 %v6974_v16, %v6960_v9 }
0x100c   :  { %v6976_v20 = vpop.eup %6975 }
0x100d   :  { %v3944_v17 = vmul.f32 %v6976_v20, %v6962_v14  ;;  %v3951_v59 = vmul.f32 %v6976_v20, %v6964_v49 }
0x100f   :  { %6017 = vmatprep.mubr.msk.f32.mxu1 %vm3894_vm6, %v3944_v17 }
0x1010   :  { %6018 = vmatmul.mubr.msk.f32.vlgmr.msra.gmra.mrb[88].mxu1 %vm3894_vm6, %v3946_v26 }
0x1011   :  { %6588 = vmatpush3.bf16.msra.mxu1 %v8900_v15  ;;  %v3764_v15 = vld [vmem:[#allocation26 + $0x40] sm:$0xff] }
0x1012   :  { %v6978_v33 = vpop.eup %6977  ;;  %6590 = vmatprep.subr.bf16.mxu1 %v8922_v46 }
0x1013   :  { %v3950_v40 = vmul.f32 %v6978_v33, %v6966_v34  ;;  %v3954_v47 = vmul.f32 %v6978_v33, %v6968_v42 }
0x1014   :  { %v6980_v18 = vpop.eup %6979 }
0x1015   :  { %6592 = vmatpush3.bf16.msra.mxu1 %v8922_v46  ;;  %v3948_v28 = vmul.f32 %v6980_v18, %v6970_v1  ;;  %v3953_v51 = vmul.f32 %v6980_v18, %v6972_v58  ;;  %v3765_v46 = vld [vmem:[#allocation26 + $0x48] sm:$0xff] }
0x1016   :  { %6594 = vmatprep.subr.bf16.mxu1 %v8939_v12 }
0x1017   :  { %6020 = vmatprep.mubr.msk.f32.mxu1 %vm3894_vm6, %v3948_v28 }
0x1018   :  { %6021 = vmatmul.mubr.msk.f32.gmra.mrb[90].mxu1 %vm3894_vm6, %v3950_v40 }
0x1019   :  { %6596 = vmatpush3.bf16.msra.mxu1 %v8939_v12  ;;  %6023 = vmatprep.mubr.msk.f32.mxu1 %vm3894_vm6, %v3951_v59  ;;  %v3766_v12 = vld [vmem:[#allocation26 + $0x50] sm:$0xff] }
0x101a   :  { %6598 = vmatprep.subr.bf16.mxu1 %v8949_v30 }
0x101c   :  { %6024 = vmatmul.mubr.msk.f32.gmra.mrb[92].mxu1 %vm3894_vm6, %v3952_v11 }
0x101d   :  { %6600 = vmatpush3.bf16.msra.mxu1 %v8949_v30  ;;  %6026 = vmatprep.mubr.msk.f32.mxu1 %vm3894_vm6, %v3953_v51  ;;  %v9119_v30 = vpack.c.bf16 %v3765_v46, %v3764_v15 }
0x101e   :  { %6602 = vmatprep.subr.bf16.mxu1 %v8957_v10 }
0x101f   :  { %6570 = vmatprep.subr.bf16.mxu0 %v9119_v30 }
0x1020   :  { %6027 = vmatmul.mubr.msk.f32.gmra.mrb[94].mxu1 %vm3894_vm6, %v3954_v47  ;;  %6572 = vmatpush3.bf16.msra.mxu0 %v9119_v30 }
0x1021   :  { %6604 = vmatpush3.bf16.msra.mxu1 %v8957_v10  ;;  %6099 = vmatprep.mubr.f32.mxu1 %v9031_v32  ;;  %v3767_v10 = vld [vmem:[#allocation26 + $0x58] sm:$0xff] }
0x1022   :  { %6606 = vmatprep.subr.bf16.mxu1 %v8965_v43 }
0x1025   :  { %6608 = vmatpush3.bf16.msra.mxu1 %v8965_v43  ;;  %v9121_v43 = vpack.c.bf16 %v3767_v10, %v3766_v12 }
0x1026   :  { %6610 = vmatprep.subr.bf16.mxu1 %v9003_v19 }
0x1027   :  { %6574 = vmatprep.subr.bf16.mxu0 %v9121_v43 }
0x1028   :  { %6576 = vmatpush3.bf16.msra.mxu0 %v9121_v43 }
0x1029   :  { %6612 = vmatpush3.bf16.msra.mxu1 %v9003_v19  ;;  %v3768_v19 = vld [vmem:[#allocation26 + $0x60] sm:$0xff] }
0x102a   :  { %6614 = vmatprep.subr.bf16.mxu1 %v9009_v36 }
0x102d   :  { %6616 = vmatpush3.bf16.msra.mxu1 %v9009_v36  ;;  %v3769_v36 = vld [vmem:[#allocation26 + $0x68] sm:$0xff] }
0x102e   :  { %v9127_v32 = vpack.c.bf16 %v3769_v36, %v3768_v19 }
0x1030   :  { %6100 = vmatmul.mubr.f32.vlgmr.msra.gmra.mrb[96].mxu1 %v9039_v3  ;;  %6578 = vmatprep.subr.bf16.mxu0 %v9127_v32  ;;  %v3771_v3 = vld [vmem:[#allocation26 + $0x78] sm:$0xff] }
0x1031   :  { %6102 = vmatprep.mubr.f32.mxu1 %v9043_v55  ;;  %6580 = vmatpush3.bf16.msra.mxu0 %v9127_v32  ;;  %v7030_v55 = vld [vmem:[%s9365_s28] sm:$0xf] }
0x1034   :  { %6103 = vmatmul.mubr.f32.gmra.mrb[98].mxu1 %v9047_v13 }
0x1035   :  { %6105 = vmatprep.mubr.f32.mxu1 %v9033_v2  ;;  %v3770_v2 = vld [vmem:[#allocation26 + $0x70] sm:$0xff] }
0x1038   :  { %6106 = vmatmul.mubr.f32.gmra.mrb[100].mxu1 %v9041_v56  ;;  %v9131_v56 = vpack.c.bf16 %v3771_v3, %v3770_v2 }
0x1039   :  { %6108 = vmatprep.mubr.f32.mxu1 %v9045_v23 }
0x103a   :  { %6582 = vmatprep.subr.bf16.mxu0 %v9131_v56 }
0x103b   :  { %6584 = vmatpush3.bf16.msra.mxu0 %v9131_v56 }
0x103c   :  { %6109 = vmatmul.mubr.f32.gmra.mrb[102].mxu1 %v9049_v44  ;;  %6111 = vmatprep.subr.msk.mxu0 %vm3979_vm5, %v7030_v55  ;;  %v3534_v44 = vrot.slane %v9013_v31, %v8367_v39 }
0x103e   :  { %v9140_v49 = vadd.f32 %v9019_v25, %v3534_v44  ;;  %v9143_v57 = vadd.f32 %v9027_v53, %v3534_v44  ;;  %v9146_v34 = vadd.f32 %v9021_v7, %v3534_v44  ;;  %v9149_v42 = vadd.f32 %v9029_v0, %v3534_v44 }
0x103f   :  { %v9156_v58 = vadd.f32 %v9023_v61, %v3534_v44  ;;  %v9159_v53 = vadd.f32 %v9035_v38, %v3534_v44  ;;  %v9162_v0 = vadd.f32 %v9025_v5, %v3534_v44  ;;  %v9165_v60 = vadd.f32 %v9037_v8, %v3534_v44 }
0x10e3   :  { %v6019_v23 = vpop.f32.mrb[88].mxu1 }
0x10e4   :  { %v4049_v13 = vpop.f32.mrb[89].mxu1  ;;  %v4089_v1 = vmul.f32 %v6019_v23, %v9140_v49 }
0x10e5   :  { %v4088_v31 = vmul.f32 %v4049_v13, %v9146_v34 }
0x10eb   :  { %v6022_v9 = vpop.f32.mrb[90].mxu1 }
0x10ec   :  { %v4059_v14 = vpop.f32.mrb[91].mxu1  ;;  %v4091_v48 = vmul.f32 %v6022_v9, %v9156_v58 }
0x10ed   :  { %v4090_v61 = vmul.f32 %v4059_v14, %v9162_v0 }
0x10ef   :  { %v6025_v6 = vpop.f32.mrb[92].mxu1 }
0x10f0   :  { %v4093_v63 = vmul.f32 %v6025_v6, %v9143_v57  ;;  %v4069_v39 = vpop.f32.mrb[93].mxu1 }
0x10f1   :  { %v4092_v25 = vmul.f32 %v4069_v39, %v9149_v42 }
0x10f2   :  { %v4097_v7 = vadd.f32 %v4093_v63, %v4089_v1 }
0x10f3   :  { %v4096_v45 = vadd.f32 %v4092_v25, %v4088_v31  ;;  %v6028_v4 = vpop.f32.mrb[94].mxu1 }
0x10f4   :  { %v4095_v16 = vmul.f32 %v6028_v4, %v9159_v53  ;;  %v4079_v26 = vpop.f32.mrb[95].mxu1 }
0x10f5   :  { %v4094_v11 = vmul.f32 %v4079_v26, %v9165_v60  ;;  %6061 = vmatprep.mubr.f32.mxu0 %v4096_v45 }
0x10f6   :  { %v4099_v38 = vadd.f32 %v4095_v16, %v4091_v48  ;;  %6062 = vmatmul.mubr.f32.vlgmr.msra.gmra.mrb[88].mxu0 %v4097_v7 }
0x10f7   :  { %v4098_v20 = vadd.f32 %v4094_v11, %v4090_v61  ;;  %6112 = vmatpush3.msk.msra.mxu0 %vm3979_vm5, %v7030_v55 }
0x10f8   :  { %6618 = vmatprep.subr.bf16.mxu0 %v9056_v62 }
0x10f9   :  { %6064 = vmatprep.mubr.f32.mxu0 %v4098_v20 }
0x10fa   :  { %6065 = vmatmul.mubr.f32.gmra.mrb[90].mxu0 %v4099_v38 }
0x1103   :  { %v6101_v5 = vpop.f32.mrb[96].mxu1 }
0x1104   :  { %v4339_v8 = vpop.f32.mrb[97].mxu1  ;;  %v4379_v33 = vmul.f32 0.17677669, %v6101_v5 }
0x1105   :  { %v4378_v40 = vmul.f32 0.17677669, %v4339_v8 }
0x1106   :  { %v4389_v46 = vsel %vm3894_vm6, %v4379_v33, -inf }
0x1107   :  { %v6104_v17 = vpop.f32.mrb[98].mxu1  ;;  %v4386_v19 = vsel %vm3894_vm6, %v4378_v40, -inf }
0x1108   :  { %v4349_v59 = vpop.f32.mrb[99].mxu1  ;;  %v4381_v51 = vmul.f32 0.17677669, %v6104_v17 }
0x1109   :  { %v4380_v12 = vmul.f32 0.17677669, %v4349_v59 }
0x110a   :  { %v4395_v44 = vsel %vm3894_vm6, %v4381_v51, -inf }
0x110b   :  { %v6107_v47 = vpop.f32.mrb[100].mxu1  ;;  %v4392_v1 = vsel %vm3894_vm6, %v4380_v12, -inf }
0x110c   :  { %v4383_v18 = vmul.f32 0.17677669, %v6107_v47  ;;  %v4359_v28 = vpop.f32.mrb[101].mxu1 }
0x110d   :  { %v4382_v15 = vmul.f32 0.17677669, %v4359_v28 }
0x110e   :  { %v4390_v10 = vsel %vm3894_vm6, %v4383_v18, -inf }
0x110f   :  { %v4391_v36 = vmax.f32 %v4389_v46, %v4390_v10  ;;  %v4387_v2 = vsel %vm3894_vm6, %v4382_v15, -inf  ;;  %v6110_v3 = vpop.f32.mrb[102].mxu1 }
0x1110   :  { %v4388_v55 = vmax.f32 %v4386_v19, %v4387_v2  ;;  %v4385_v23 = vmul.f32 0.17677669, %v6110_v3  ;;  %v4369_v13 = vpop.f32.mrb[103].mxu1 }
0x1111   :  { %v4399_v9 = vsub.f32 %v4379_v33, %v4391_v36  ;;  %v4403_v14 = vsub.f32 %v4383_v18, %v4391_v36  ;;  %v4384_v6 = vmul.f32 0.17677669, %v4369_v13 }
0x1112   :  { %v4398_v63 = vsub.f32 %v4378_v40, %v4388_v55  ;;  %v4402_v39 = vsub.f32 %v4382_v15, %v4388_v55  ;;  %v4396_v31 = vsel %vm3894_vm6, %v4385_v23, -inf }
0x1113   :  { %v4408_v25 = vmul.f32 1.442695, %v4399_v9  ;;  %v4416_v7 = vmul.f32 1.442695, %v4403_v14  ;;  %v4397_v45 = vmax.f32 %v4395_v44, %v4396_v31  ;;  %v4393_v4 = vsel %vm3894_vm6, %v4384_v6, -inf }
0x1114   :  { %v4406_v48 = vmul.f32 1.442695, %v4398_v63  ;;  %v4414_v16 = vmul.f32 1.442695, %v4402_v39  ;;  %v4394_v26 = vmax.f32 %v4392_v1, %v4393_v4 }
0x1115   :  { %6981 = vpow2.f32 %v4408_v25  ;;  %v4401_v61 = vsub.f32 %v4381_v51, %v4397_v45  ;;  %v4405_v11 = vsub.f32 %v4385_v23, %v4397_v45 }
0x1116   :  { %6983 = vpow2.f32 %v4416_v7  ;;  %v4400_v38 = vsub.f32 %v4380_v12, %v4394_v26  ;;  %v4404_v20 = vsub.f32 %v4384_v6, %v4394_v26 }
0x1117   :  { %6985 = vpow2.f32 %v4406_v48  ;;  %v4412_v5 = vmul.f32 1.442695, %v4401_v61  ;;  %v4420_v8 = vmul.f32 1.442695, %v4405_v11 }
0x1118   :  { %6987 = vpow2.f32 %v4414_v16  ;;  %v4410_v17 = vmul.f32 1.442695, %v4400_v38  ;;  %v4418_v59 = vmul.f32 1.442695, %v4404_v20 }
0x1119   :  { %6989 = vpow2.f32 %v4412_v5 }
0x111a   :  { %6991 = vpow2.f32 %v4420_v8 }
0x111b   :  { %6993 = vpow2.f32 %v4410_v17 }
0x111c   :  { %6995 = vpow2.f32 %v4418_v59 }
0x111f   :  { %v6982_v33 = vpop.eup %6981 }
0x1120   :  { %v6984_v40 = vpop.eup %6983  ;;  %v4425_v47 = vsel %vm3894_vm6, %v6982_v33, 0.0 }
0x1121   :  { %v6986_v18 = vpop.eup %6985  ;;  %v4426_v28 = vsel %vm3894_vm6, %v6984_v40, 0.0 }
0x1122   :  { %v6988_v51 = vpop.eup %6987  ;;  %v4427_v15 = vadd.f32 %v4426_v28, %v4425_v47  ;;  %v4422_v46 = vsel %vm3894_vm6, %v6986_v18, 0.0 }
0x1123   :  { %v6990_v12 = vpop.eup %6989  ;;  %v4423_v10 = vsel %vm3894_vm6, %v6988_v51, 0.0 }
0x1124   :  { %v6992_v19 = vpop.eup %6991  ;;  %6997 = vrcp.f32 %v4427_v15  ;;  %v4424_v36 = vadd.f32 %v4423_v10, %v4422_v46  ;;  %v4431_v2 = vsel %vm3894_vm6, %v6990_v12, 0.0 }
0x1125   :  { %v6994_v3 = vpop.eup %6993  ;;  %v4432_v55 = vsel %vm3894_vm6, %v6992_v19, 0.0 }
0x1126   :  { %v6996_v23 = vpop.eup %6995  ;;  %6999 = vrcp.f32 %v4424_v36  ;;  %v4433_v13 = vadd.f32 %v4432_v55, %v4431_v2  ;;  %v4428_v44 = vsel %vm3894_vm6, %v6994_v3, 0.0 }
0x1127   :  { %v4429_v9 = vsel %vm3894_vm6, %v6996_v23, 0.0 }
0x1128   :  { %7001 = vrcp.f32 %v4433_v13  ;;  %v4430_v14 = vadd.f32 %v4429_v9, %v4428_v44 }
0x112a   :  { %7003 = vrcp.f32 %v4430_v14 }
0x112e   :  { %v6998_v6 = vpop.eup %6997 }
0x112f   :  { %v4437_v1 = vmul.f32 %v6998_v6, %v6982_v33  ;;  %v4443_v63 = vmul.f32 %v6998_v6, %v6984_v40 }
0x1130   :  { %v7000_v39 = vpop.eup %6999 }
0x1131   :  { %v4435_v31 = vmul.f32 %v7000_v39, %v6986_v18  ;;  %v4442_v25 = vmul.f32 %v7000_v39, %v6988_v51 }
0x1132   :  { %v7002_v7 = vpop.eup %7001 }
0x1133   :  { %6113 = vmatprep.mubr.msk.f32.mxu0 %vm3894_vm6, %v4435_v31  ;;  %v4441_v45 = vmul.f32 %v7002_v7, %v6990_v12  ;;  %v4445_v4 = vmul.f32 %v7002_v7, %v6992_v19 }
0x1134   :  { %v7004_v48 = vpop.eup %7003  ;;  %6114 = vmatmul.mubr.msk.f32.vlgmr.msra.gmra.mrb[92].mxu0 %vm3894_vm6, %v4437_v1 }
0x1135   :  { %v4439_v16 = vmul.f32 %v7004_v48, %v6994_v3  ;;  %v4444_v26 = vmul.f32 %v7004_v48, %v6996_v23  ;;  %6620 = vmatpush3.bf16.msra.mxu0 %v9056_v62 }
0x1136   :  { %6622 = vmatprep.subr.bf16.mxu0 %v9058_v41 }
0x1137   :  { %6116 = vmatprep.mubr.msk.f32.mxu0 %vm3894_vm6, %v4439_v16 }
0x1138   :  { %6117 = vmatmul.mubr.msk.f32.gmra.mrb[94].mxu0 %vm3894_vm6, %v4441_v45 }
0x1139   :  { %6119 = vmatprep.mubr.msk.f32.mxu0 %vm3894_vm6, %v4442_v25  ;;  %6624 = vmatpush3.bf16.msra.mxu0 %v9058_v41  ;;  %v9212_v41 = vld [vmem:[#allocation28] ss:$0 sm:$0xff] }
0x113a   :  { %6626 = vmatprep.subr.bf16.mxu0 %v9063_v24 }
0x113c   :  { %6120 = vmatmul.mubr.msk.f32.gmra.mrb[96].mxu0 %vm3894_vm6, %v4443_v63 }
0x113d   :  { %6122 = vmatprep.mubr.msk.f32.mxu0 %vm3894_vm6, %v4444_v26  ;;  %6628 = vmatpush3.bf16.msra.mxu0 %v9063_v24 }
0x113e   :  { %6630 = vmatprep.subr.bf16.mxu0 %v9067_v50 }
0x1140   :  { %6123 = vmatmul.mubr.msk.f32.gmra.mrb[98].mxu0 %vm3894_vm6, %v4445_v4 }
0x1141   :  { %6632 = vmatpush3.bf16.msra.mxu0 %v9067_v50 }
0x1142   :  { %6634 = vmatprep.subr.bf16.mxu0 %v9119_v30 }
0x1145   :  { %6636 = vmatpush3.bf16.msra.mxu0 %v9119_v30 }
0x1146   :  { %6638 = vmatprep.subr.bf16.mxu0 %v9121_v43 }
0x1149   :  { %6640 = vmatpush3.bf16.msra.mxu0 %v9121_v43 }
0x114a   :  { %6642 = vmatprep.subr.bf16.mxu0 %v9127_v32 }
0x114d   :  { %6644 = vmatpush3.bf16.msra.mxu0 %v9127_v32 }
0x114e   :  { %6646 = vmatprep.subr.bf16.mxu0 %v9131_v56 }
0x1151   :  { %6648 = vmatpush3.bf16.msra.mxu0 %v9131_v56 }
0x11c9   :  { %v6063_v62 = vpop.f32.mrb[88].mxu0 }
0x11ca   :  { %v4186_v24 = vadd.f32 %v6063_v62, %v8919_v21  ;;  %v4166_v50 = vpop.f32.mrb[89].mxu0 }
0x11cb   :  { %v4185_v30 = vadd.f32 %v4166_v50, %v8915_v54 }
0x11cc   :  { %v4196_v61 = vadd.f32 %v9212_v41, %v4186_v24 }
0x11cd   :  { %v6066_v11 = vpop.f32.mrb[90].mxu0  ;;  %v4195_v43 = vadd.f32 %v9212_v41, %v4185_v30 }
0x11ce   :  { %4203 = vadd.xlane.f32.xlu1 %v4196_v61  ;;  %v4176_v38 = vpop.f32.mrb[91].mxu0 }
0x11cf   :  { %v4187_v32 = vadd.f32 %v4176_v38, %v8932_v52  ;;  %4201 = vadd.xlane.f32.xlu0 %v4195_v43 }
0x11d1   :  { %v4197_v56 = vadd.f32 %v9212_v41, %v4187_v32 }
0x11d3   :  { %4205 = vadd.xlane.f32.xlu0 %v4197_v56 }
0x1207   :  { %v6115_v20 = vpop.f32.mrb[92].mxu0 }
0x1208   :  { %v4536_v5 = vpop.f32.mrb[93].mxu0  ;;  %v4576_v54 = vmul.f32 %v6115_v20, %v9140_v49 }
0x1209   :  { %v4575_v40 = vmul.f32 %v4536_v5, %v9146_v34 }
0x120b   :  { %v6118_v8 = vpop.f32.mrb[94].mxu0 }
0x120c   :  { %v4546_v21 = vpop.f32.mrb[95].mxu0  ;;  %v4578_v51 = vmul.f32 %v6118_v8, %v9156_v58  ;;  %v4753_v8 = vld [vmem:[%s9367_s30] sm:$0xff] }
0x120d   :  { %v4577_v12 = vmul.f32 %v4546_v21, %v9162_v0  ;;  %v4754_v21 = vld [vmem:[%s9367_s30 + $0x8] sm:$0xff] }
0x120f   :  { %v6121_v17 = vpop.f32.mrb[96].mxu0 }
0x1210   :  { %v4580_v59 = vmul.f32 %v6121_v17, %v9143_v57  ;;  %v4556_v33 = vpop.f32.mrb[97].mxu0  ;;  %v6650_v17 = vpack.c.bf16 %v4754_v21, %v4753_v8 }
0x1211   :  { %v4579_v47 = vmul.f32 %v4556_v33, %v9149_v42  ;;  %v4756_v33 = vld [vmem:[%s9367_s30 + $0x18] sm:$0xff] }
0x1212   :  { %v4584_v18 = vadd.f32 %v4580_v59, %v4576_v54  ;;  %v7596_v54 = vmov 0.0|0.0   ;;  %v4755_v59 = vld [vmem:[%s9367_s30 + $0x10] sm:$0xff] }
0x1213   :  { %v4583_v52 = vadd.f32 %v4579_v47, %v4575_v40  ;;  %v6124_v28 = vpop.f32.mrb[98].mxu0  ;;  %6649 = vmatprep.subr.bf16.mxu1 %v7596_v54  ;;  %6673 = vmatprep.subr.bf16.mxu0 %v7596_v54  ;;  %v6653_v40 = vpack.c.bf16 %v4756_v33, %v4755_v59  ;;  %v4757_v47 = vld [vmem:[%s9367_s30 + $0x20] sm:$0xff] }
0x1214   :  { %v4582_v15 = vmul.f32 %v6124_v28, %v9159_v53  ;;  %v4566_v46 = vpop.f32.mrb[99].mxu0  ;;  %v4188_v53 = vadd.f32 %v6066_v11, %v8936_v29  ;;  %6651 = vmatpush3.bf16.msra.mxu1 %v6650_v17 }
0x1215   :  { %v4581_v10 = vmul.f32 %v4566_v46, %v9165_v60  ;;  %6157 = vmatprep.mubr.f32.mxu0 %v4583_v52  ;;  %6652 = vmatprep.subr.bf16.mxu1 %v7596_v54  ;;  %v4759_v52 = vld [vmem:[%s9367_s30 + $0x30] sm:$0xff] }
0x1216   :  { %v4586_v49 = vadd.f32 %v4582_v15, %v4578_v51  ;;  %6158 = vmatmul.mubr.f32.vlgmr.msra.gmra.mrb[100].mxu0 %v4584_v18  ;;  %v4758_v18 = vld [vmem:[%s9367_s30 + $0x28] sm:$0xff]  ;;  %v4760_v51 = vld [vmem:[%s9367_s30 + $0x38] sm:$0xff]  ;;  %v9368_v15 = vmov 0.0  }
0x1217   :  { %v4585_v57 = vadd.f32 %v4581_v10, %v4577_v12  ;;  %v6656_v28 = vpack.c.bf16 %v4758_v18, %v4757_v47  ;;  %6195 = vmatprep.mubr.msk.f32.mxu1 %vm7597_vm7, %v9368_v15  ;;  %v6659_v46 = vpack.c.bf16 %v4760_v51, %v4759_v52  ;;  %v4761_v12 = vld [vmem:[%s9367_s30 + $0x40] sm:$0xff]  ;;  %v4762_v10 = vld [vmem:[%s9367_s30 + $0x48] sm:$0xff] }
0x1218   :  { %6654 = vmatpush3.bf16.msra.mxu1 %v6653_v40  ;;  %v5123_v40 = vld [vmem:[#allocation31] ss:$0 sm:$0xff] }
0x1219   :  { %6160 = vmatprep.mubr.f32.mxu0 %v4585_v57  ;;  %6655 = vmatprep.subr.bf16.mxu1 %v7596_v54  ;;  %v4763_v57 = vld [vmem:[%s9367_s30 + $0x50] sm:$0xff] }
0x121a   :  { %6161 = vmatmul.mubr.f32.gmra.mrb[102].mxu0 %v4586_v49  ;;  %v6662_v49 = vpack.c.bf16 %v4762_v10, %v4761_v12 }
0x121b   :  { %6214 = vmatprep.mubr.msk.f32.mxu0 %vm7597_vm7, %v9368_v15 }
0x121c   :  { %6657 = vmatpush3.bf16.msra.mxu1 %v6656_v28 }
0x121d   :  { %6658 = vmatprep.subr.bf16.mxu1 %v7596_v54 }
0x1220   :  { %6660 = vmatpush3.bf16.msra.mxu1 %v6659_v46 }
0x1221   :  { %6661 = vmatprep.subr.bf16.mxu1 %v7596_v54 }
0x1224   :  { %6663 = vmatpush3.bf16.msra.mxu1 %v6662_v49 }
0x1225   :  { %6664 = vmatprep.subr.bf16.mxu1 %v7596_v54 }
0x125b   :  { %v4204_v0 = vpop.xlane.xlu1 %4203 }
0x125c   :  { %v4202_v34 = vpop.xlane.xlu0 %4201  ;;  %v4210_v9 = vmul.f32 0.0078125, %v4204_v0 }
0x125d   :  { %v4209_v3 = vmul.f32 0.0078125, %v4202_v34  ;;  %v4764_v34 = vld [vmem:[%s9367_s30 + $0x58] sm:$0xff] }
0x125e   :  { %v9239_v1 = vsub.f32 %v4196_v61, %v4210_v9 }
0x125f   :  { %v9235_v14 = vsub.f32 %v4195_v43, %v4209_v3 }
0x1260   :  { %v4206_v23 = vpop.xlane.xlu0 %4205 }
0x12e9   :  { %v6159_v42 = vpop.f32.mrb[100].mxu0 }
0x12ea   :  { %v4673_v19 = vadd.f32 %v6159_v42, %v8980_v37  ;;  %v4653_v36 = vpop.f32.mrb[101].mxu0  ;;  %v4198_v37 = vadd.f32 %v9212_v41, %v4188_v53  ;;  %v6665_v42 = vpack.c.bf16 %v4764_v34, %v4763_v57  ;;  %v4767_v53 = vld [vmem:[%s9367_s30 + $0x70] sm:$0xff] }
0x12eb   :  { %v4672_v58 = vadd.f32 %v4653_v36, %v8976_v35  ;;  %v4211_v35 = vmul.f32 0.0078125, %v4206_v23  ;;  %v4766_v36 = vld [vmem:[%s9367_s30 + $0x68] sm:$0xff] }
0x12ec   :  { %v4677_v2 = vadd.f32 %v9212_v41, %v4673_v19  ;;  %v4765_v19 = vld [vmem:[%s9367_s30 + $0x60] sm:$0xff]  ;;  %6666 = vmatpush3.bf16.msra.mxu1 %v6665_v42 }
0x12ed   :  { %v6162_v60 = vpop.f32.mrb[102].mxu0  ;;  %v4676_v55 = vadd.f32 %v9212_v41, %v4672_v58  ;;  %v9241_v63 = vsub.f32 %v4197_v56, %v4211_v35  ;;  %v6668_v58 = vpack.c.bf16 %v4766_v36, %v4765_v19  ;;  %6667 = vmatprep.subr.bf16.mxu1 %v7596_v54 }
0x12ee   :  { %4682 = vadd.xlane.f32.xlu1 %v4677_v2  ;;  %v4663_v13 = vpop.f32.mrb[103].mxu0  ;;  %v4675_v29 = vadd.f32 %v6162_v60, %v8992_v27  ;;  %v4218_v27 = vmul.f32 %v9239_v1, %v9239_v1 }
0x12ef   :  { %v4674_v44 = vadd.f32 %v4663_v13, %v8989_v22  ;;  %4680 = vadd.xlane.f32.xlu0 %v4676_v55  ;;  %v4217_v22 = vmul.f32 %v9235_v14, %v9235_v14  ;;  %v4219_v31 = vmul.f32 %v9241_v63, %v9241_v63 }
0x12f0   :  { %v4679_v39 = vadd.f32 %v9212_v41, %v4675_v29  ;;  %6669 = vmatpush3.bf16.msra.mxu1 %v6668_v58 }
0x12f1   :  { %v4678_v6 = vadd.f32 %v9212_v41, %v4674_v44  ;;  %6670 = vmatprep.subr.bf16.mxu1 %v7596_v54 }
0x12f3   :  { %4207 = vadd.xlane.f32.xlu0 %v4198_v37  ;;  %4684 = vadd.xlane.f32.xlu1 %v4678_v6 }
0x12f7   :  { %4221 = vadd.xlane.f32.xlu0 %v4217_v22  ;;  %4686 = vadd.xlane.f32.xlu1 %v4679_v39 }
0x12fb   :  { %4225 = vadd.xlane.f32.xlu0 %v4219_v31  ;;  %4223 = vadd.xlane.f32.xlu1 %v4218_v27 }
0x137b   :  { %v4683_v25 = vpop.xlane.xlu1 %4682 }
0x137c   :  { %v4689_v7 = vmul.f32 0.0078125, %v4683_v25  ;;  %v4681_v45 = vpop.xlane.xlu0 %4680 }
0x137d   :  { %v4688_v4 = vmul.f32 0.0078125, %v4681_v45 }
0x137e   :  { %v9250_v48 = vsub.f32 %v4677_v2, %v4689_v7  ;;  %v4768_v2 = vld [vmem:[%s9367_s30 + $0x78] sm:$0xff] }
0x137f   :  { %v9252_v16 = vsub.f32 %v4676_v55, %v4688_v4  ;;  %v6671_v0 = vpack.c.bf16 %v4768_v2, %v4767_v53 }
0x1380   :  { %v4208_v26 = vpop.xlane.xlu0 %4207  ;;  %v4685_v62 = vpop.xlane.xlu1 %4684  ;;  %v4697_v41 = vmul.f32 %v9250_v48, %v9250_v48 }
0x1381   :  { %v4212_v24 = vmul.f32 0.0078125, %v4208_v26  ;;  %v4690_v50 = vmul.f32 0.0078125, %v4685_v62  ;;  %v4696_v30 = vmul.f32 %v9252_v16, %v9252_v16  ;;  %6672 = vmatpush3.bf16.msra.mxu1 %v6671_v0 }
0x1382   :  { %4702 = vadd.xlane.f32.xlu1 %v4697_v41 }
0x1383   :  { %v9258_v61 = vsub.f32 %v4198_v37, %v4212_v24  ;;  %v9260_v11 = vsub.f32 %v4678_v6, %v4690_v50  ;;  %4700 = vadd.xlane.f32.xlu0 %v4696_v30 }
0x1384   :  { %v4687_v43 = vpop.xlane.xlu1 %4686  ;;  %v4222_v3 = vpop.xlane.xlu0 %4221 }
0x1385   :  { %v4691_v38 = vmul.f32 0.0078125, %v4687_v43  ;;  %v4220_v32 = vmul.f32 %v9258_v61, %v9258_v61  ;;  %v4698_v56 = vmul.f32 %v9260_v11, %v9260_v11  ;;  %v4229_v23 = vmul.f32 0.0078125, %v4222_v3 }
0x1387   :  { %v9266_v20 = vsub.f32 %v4679_v39, %v4691_v38  ;;  %4227 = vadd.xlane.f32.xlu0 %v4220_v32  ;;  %4704 = vadd.xlane.f32.xlu1 %v4698_v56  ;;  %v4233_v9 = vadd.f32 1e-05, %v4229_v23  ;;  %v5122_v56 = vld [vmem:[#allocation29] ss:$0 sm:$0xff] }
0x1388   :  { %v4224_v60 = vpop.xlane.xlu1 %4223  ;;  %v4226_v13 = vpop.xlane.xlu0 %4225 }
0x1389   :  { %v4699_v5 = vmul.f32 %v9266_v20, %v9266_v20  ;;  %v4230_v55 = vmul.f32 0.0078125, %v4224_v60  ;;  %v4231_v37 = vmul.f32 0.0078125, %v4226_v13 }
0x138b   :  { %4706 = vadd.xlane.f32.xlu1 %v4699_v5  ;;  %v4234_v44 = vadd.f32 1e-05, %v4230_v55  ;;  %v4235_v35 = vadd.f32 1e-05, %v4231_v37 }
0x138d   :  { %7005 = vrsqrt.f32 %v4234_v44 }
0x138e   :  { %7007 = vrsqrt.f32 %v4233_v9 }
0x138f   :  { %7009 = vrsqrt.f32 %v4235_v35 }
0x1397   :  { %v7006_v45 = vpop.eup %7005 }
0x1398   :  { %v7008_v62 = vpop.eup %7007  ;;  %v4242_v50 = vmul.f32 %v7006_v45, %v9239_v1  ;;  %v4879_v45 = vld [vmem:[%s7752_s17 + $0x8] sm:$0xff] }
0x1399   :  { %v4241_v38 = vmul.f32 %v7008_v62, %v9235_v14  ;;  %v7010_v32 = vpop.eup %7009  ;;  %v4881_v62 = vld [vmem:[%s7752_s17 + $0x18] sm:$0xff] }
0x139a   :  { %v4252_v8 = vmul.f32 %v5122_v56, %v4242_v50  ;;  %v4243_v59 = vmul.f32 %v7010_v32, %v9241_v63  ;;  %v4883_v50 = vld [vmem:[%s7752_s17 + $0x28] sm:$0xff] }
0x139b   :  { %v4251_v17 = vmul.f32 %v5122_v56, %v4241_v38  ;;  %v4885_v38 = vld [vmem:[%s7752_s17 + $0x38] sm:$0xff] }
0x139c   :  { %v4262_v1 = vadd.f32 %v5123_v40, %v4252_v8  ;;  %v4253_v28 = vmul.f32 %v5122_v56, %v4243_v59 }
0x139d   :  { %v4261_v52 = vadd.f32 %v5123_v40, %v4251_v17 }
0x139e   :  { %v4263_v57 = vadd.f32 %v5123_v40, %v4253_v28 }
0x139f   :  { %v4732_v12 = vadd.f32 %v4262_v1, %v4261_v52 }
0x13a1   :  { %v4733_v58 = vadd.f32 %v4732_v12, %v4263_v57 }
0x140f   :  { %v4703_v29 = vpop.xlane.xlu1 %4702 }
0x1410   :  { %v4709_v6 = vmul.f32 0.0078125, %v4703_v29  ;;  %v4701_v22 = vpop.xlane.xlu0 %4700 }
0x1411   :  { %v4708_v39 = vmul.f32 0.0078125, %v4701_v22 }
0x1412   :  { %v4713_v31 = vadd.f32 1e-05, %v4709_v6 }
0x1413   :  { %v4712_v27 = vadd.f32 1e-05, %v4708_v39 }
0x1414   :  { %7011 = vrsqrt.f32 %v4713_v31  ;;  %v4228_v25 = vpop.xlane.xlu0 %4227  ;;  %v4705_v7 = vpop.xlane.xlu1 %4704 }
0x1415   :  { %7013 = vrsqrt.f32 %v4712_v27  ;;  %v4232_v4 = vmul.f32 0.0078125, %v4228_v25  ;;  %v4710_v26 = vmul.f32 0.0078125, %v4705_v7  ;;  %v4878_v7 = vld [vmem:[%s7752_s17] sm:$0xff] }
0x1417   :  { %v4236_v41 = vadd.f32 1e-05, %v4232_v4  ;;  %v4714_v24 = vadd.f32 1e-05, %v4710_v26  ;;  %v6674_v4 = vpack.c.bf16 %v4879_v45, %v4878_v7  ;;  %v4880_v26 = vld [vmem:[%s7752_s17 + $0x10] sm:$0xff] }
0x1418   :  { %v4707_v30 = vpop.xlane.xlu1 %4706 }
0x1419   :  { %7015 = vrsqrt.f32 %v4236_v41  ;;  %v4711_v43 = vmul.f32 0.0078125, %v4707_v30  ;;  %6675 = vmatpush3.bf16.msra.mxu0 %v6674_v4  ;;  %v6677_v41 = vpack.c.bf16 %v4881_v62, %v4880_v26 }
0x141a   :  { %7017 = vrsqrt.f32 %v4714_v24  ;;  %6676 = vmatprep.subr.bf16.mxu0 %v7596_v54  ;;  %v4882_v24 = vld [vmem:[%s7752_s17 + $0x20] sm:$0xff] }
0x141b   :  { %v4715_v5 = vadd.f32 1e-05, %v4711_v43  ;;  %v6680_v30 = vpack.c.bf16 %v4883_v50, %v4882_v24  ;;  %v4884_v43 = vld [vmem:[%s7752_s17 + $0x30] sm:$0xff]  ;;  %s7598_s17 = smov [#allocation35]  }
0x141c   :  { %v6683_v32 = vpack.c.bf16 %v4885_v38, %v4884_v43  ;;  %s4987_s13 = sshll.u32 %s7598_s17, 4  ;;  %s4988_s13 = int_to_ptr.vmem [resolvable:$true] %s4987_s13 }
0x141d   :  { %7019 = vrsqrt.f32 %v4715_v5  ;;  %6678 = vmatpush3.bf16.msra.mxu0 %v6677_v41  ;;  %s7493_s12 = scalar_lea.vmem %s4988_s13, 32  ;;  %p7498_p1 = scmp.lt.s32.totalorder %s4988_s13, %s4988_s13 }
0x141e   :  { %v7012_v21 = vpop.eup %7011  ;;  %6679 = vmatprep.subr.bf16.mxu0 %v7596_v54  ;;  %p7494_p0 = scmp.ne.s32.totalorder %s4988_s13, %s7493_s12  ;;  %p7499_p2 = scmp.lt.s32.totalorder %s7493_s12, %s7493_s12 }
0x141f   :  { %v7014_v33 = vpop.eup %7013  ;;  %v4721_v47 = vmul.f32 %v7012_v21, %v9250_v48 }
0x1420   :  { %v4720_v18 = vmul.f32 %v7014_v33, %v9252_v16  ;;  %p7500_p3 = por %p7499_p2, %p7498_p1 }
0x1421   :  { %v4725_v14 = vmul.f32 %v5122_v56, %v4721_v47  ;;  %6681 = vmatpush3.bf16.msra.mxu0 %v6680_v30 }
0x1422   :  { %v4724_v51 = vmul.f32 %v5122_v56, %v4720_v18  ;;  %6682 = vmatprep.subr.bf16.mxu0 %v7596_v54  ;;  %p7501_p4 = pnand %p7500_p3, %p7494_p0 }
0x1423   :  { %v7016_v15 = vpop.eup %7015  ;;  %v4729_v63 = vadd.f32 %v5123_v40, %v4725_v14 }
0x1424   :  { %v7018_v46 = vpop.eup %7017  ;;  %v4244_v10 = vmul.f32 %v7016_v15, %v9258_v61  ;;  %v4728_v34 = vadd.f32 %v5123_v40, %v4724_v51 }
0x1425   :  { %v4722_v49 = vmul.f32 %v7018_v46, %v9260_v11  ;;  %6684 = vmatpush3.bf16.msra.mxu0 %v6683_v32 }
0x1426   :  { %v4254_v42 = vmul.f32 %v5122_v56, %v4244_v10  ;;  %v4741_v2 = vadd.f32 %v4729_v63, %v4728_v34 }
0x1427   :  { %v7020_v19 = vpop.eup %7019  ;;  %v4726_v48 = vmul.f32 %v5122_v56, %v4722_v49 }
0x1428   :  { %v4264_v36 = vadd.f32 %v5123_v40, %v4254_v42  ;;  %v4723_v16 = vmul.f32 %v7020_v19, %v9266_v20 }
0x1429   :  { %v4730_v53 = vadd.f32 %v5123_v40, %v4726_v48 }
0x142a   :  { %v4727_v0 = vmul.f32 %v5122_v56, %v4723_v16  ;;  %v4734_v3 = vadd.f32 %v4733_v58, %v4264_v36  ;;  %v5133_v56 = vld [vmem:[#allocation32] ss:$0 sm:$0xff]  ;;  %v5134_v58 = vld [vmem:[#allocation34] ss:$0 sm:$0xff] }
0x142b   :  { %v4742_v60 = vadd.f32 %v4741_v2, %v4730_v53 }
0x142c   :  { %v4731_v55 = vadd.f32 %v5123_v40, %v4727_v0  ;;  %v4735_v23 = vrot.slane %v4734_v3, 4 }
0x142e   :  { %v4736_v61 = vadd.f32 %v4735_v23, %v4734_v3  ;;  %v4743_v13 = vadd.f32 %v4742_v60, %v4731_v55 }
0x1430   :  { %v4737_v11 = vrot.slane %v4736_v61, 2  ;;  %v4744_v44 = vrot.slane %v4743_v13, 4 }
0x1432   :  { %v4738_v9 = vadd.f32 %v4737_v11, %v4736_v61  ;;  %v4745_v37 = vadd.f32 %v4744_v44, %v4743_v13 }
0x1434   :  { %v4739_v35 = vrot.slane %v4738_v9, 1  ;;  %v4746_v29 = vrot.slane %v4745_v37, 2 }
0x1436   :  { %v4747_v20 = vadd.f32 %v4746_v29, %v4745_v37  ;;  %v4740_v6 = vadd.f32 %v4739_v35, %v4738_v9 }
0x1438   :  { %v4748_v22 = vrot.slane %v4747_v20, 1  ;;  %v4751_v31 = vmul.f32 0.03125, %v4740_v6 }
0x143a   :  { %v4749_v39 = vadd.f32 %v4748_v22, %v4747_v20 }
0x143c   :  { %v4752_v27 = vmul.f32 0.03125, %v4749_v39 }
0x143e   :  { %v4779_v25 = vsel %vm4778_vm8, %v4752_v27, %v4751_v31 }
0x143f   :  { %6196 = vmatmul.mubr.f32.vlgmr.msra.gmra.mrb[104].mxu1 %v4779_v25 }
0x1512   :  { %v4847_v5 = vpop.f32.mrb[104].mxu1 }
0x1513   :  { %v4848_v8 = vadd.f32 %v5133_v56, %v4847_v5  ;;  %v6197_v21 = vpop.f32.mrb[105].mxu1 }
0x1515   :  { %v4852_v17 = vmul.f32 0.70710677, %v4848_v8  ;;  %v4851_v48 = vmul.f32 0.5, %v4848_v8 }
0x1517   :  { %v4853_v59 = vand.u32 2147483647, %v4852_v17  ;;  %vm4873_vm9 = vcmp.ge.f32.partialorder %v4852_v17, 0.0 }
0x1519   :  { %v4854_v33 = vmul.f32 0.3275911, %v4853_v59  ;;  %v4867_v47 = vsub.f32 0.0, %v4853_v59 }
0x151b   :  { %v4855_v40 = vadd.f32 1.0, %v4854_v33  ;;  %v4868_v18 = vmul.f32 %v4867_v47, %v4853_v59 }
0x151d   :  { %7021 = vrcp.f32 %v4855_v40  ;;  %v4869_v14 = vmul.f32 1.442695, %v4868_v18 }
0x151f   :  { %7023 = vpow2.f32 %v4869_v14 }
0x1527   :  { %v7022_v1 = vpop.eup %7021 }
0x1528   :  { %v4858_v52 = vmul.f32 1.0614054, %v7022_v1 }
0x1529   :  { %v7024_v57 = vpop.eup %7023 }
0x152a   :  { %v4859_v28 = vadd.f32 -1.4531521, %v4858_v52 }
0x152c   :  { %v4860_v51 = vmul.f32 %v7022_v1, %v4859_v28 }
0x152e   :  { %v4861_v15 = vadd.f32 1.4214138, %v4860_v51 }
0x1530   :  { %v4862_v54 = vmul.f32 %v7022_v1, %v4861_v15 }
0x1532   :  { %v4863_v46 = vadd.f32 -0.28449672, %v4862_v54 }
0x1534   :  { %v4864_v12 = vmul.f32 %v7022_v1, %v4863_v46 }
0x1536   :  { %v4865_v10 = vadd.f32 0.2548296, %v4864_v12 }
0x1538   :  { %v4866_v49 = vmul.f32 %v7022_v1, %v4865_v10 }
0x153a   :  { %v4871_v63 = vmul.f32 %v7024_v57, %v4866_v49 }
0x153c   :  { %v4872_v34 = vsub.f32 1.0, %v4871_v63 }
0x153e   :  { %v4874_v42 = vsub.f32 0.0, %v4872_v34 }
0x1540   :  { %v4875_v19 = vsel %vm4873_vm9, %v4872_v34, %v4874_v42 }
0x1541   :  { %v4876_v36 = vadd.f32 1.0, %v4875_v19 }
0x1543   :  { %v4877_v16 = vmul.f32 %v4876_v36, %v4851_v48 }
0x1545   :  { %6215 = vmatmul.mubr.msk.f32.vlgmr.msra.gmra.mrb[104].mxu0 %vm684_vm2, %v4877_v16 }
0x1618   :  { %v4962_v53 = vpop.f32.mrb[104].mxu0 }
0x1619   :  { %v4963_v2 = vadd.f32 %v5134_v58, %v4962_v53  ;;  %v6216_v0 = vpop.f32.mrb[105].mxu0 }
0x161b   :  { %v4967_v3 = vsel %vm4966_vm10, %v4963_v2, -inf }
0x161c   :  { %4968 = vmax.xlane.f32.xlu0 %v4967_v3 }
0x16a9   :  { %v4969_v60 = vpop.xlane.xlu0 %4968 }
0x16aa   :  { %v4970_v55 = vsub.f32 %v4963_v2, %v4969_v60 }
0x16ac   :  { %v4971_v23 = vmul.f32 1.442695, %v4970_v55 }
0x16ae   :  { %7025 = vpow2.f32 %v4971_v23 }
0x16b8   :  { %v7026_v61 = vpop.eup %7025 }
0x16b9   :  { %v4973_v13 = vsel %vm4966_vm10, %v7026_v61, 0.0 }
0x16ba   :  { %4974 = vadd.xlane.f32.xlu1 %v4973_v13 }
0x1747   :  { %v4975_v11 = vpop.xlane.xlu1 %4974 }
0x1748   :  { %7027 = vlog2.f32 %v4975_v11 }
0x1752   :  { %v7028_v44 = vpop.eup %7027 }
0x1753   :  { %v4977_v9 = vmul.f32 0.6931472, %v7028_v44 }
0x1755   :  { %v4978_v37 = vadd.f32 %v4977_v9, %v4969_v60 }
0x1757   :  { %v4979_v35 = vsub.f32 %v4963_v2, %v4978_v37 }
0x1759   :  { %4980 = vst.msk [vmem:[#allocation35] sm:$0x3] %vm4966_vm10, %v4979_v35 }
0x175a   :  { %7504 = shalt.err (!%p7501_p4)
}
0x175b   :  { %s7505_s15 = scalar_lea.hbm %s7762_s20, 32 }
0x175c   :  { %p7506_p5 = scmp.ne.s32.totalorder %s7762_s20, %s7505_s15  ;;  %p7509_p6 = scmp.lt.u32.totalorder %s7505_s15, %s7762_s20 }
0x175e   :  { %p7511_p7 = pnand %p7509_p6, %p7506_p5 }
0x1760   :  { %7514 = shalt.err (!%p7511_p7)
}
0x1761   :  { %4990 = dma.vmem_to_hbm [thread:$0]  %s4988_s13, 32, %s7762_s20, [#allocation4]  }
0x1762   :  { %7537 = dma.done.wait [#allocation4], 32  }
0x1763   :  { %7538 = vsyncadd [#allocation4], 4294967264 }
0x1764   :  { %4994 = vsyncpa [#allocation3], 1 }
0x1765   :  { %4995 = vsyncpa [#allocation6], 1 }
0x1766   :  { %4996 = vsyncpa [#allocation9], 1 }
0x1767   :  { %4997 = vsyncpa [#allocation12], 1 }
0x1768   :  { %4998 = vsyncpa [#allocation15], 1 }
0x1769   :  { %4999 = vsyncpa [#allocation18], 1 }
0x176a   :  { %5000 = vsyncpa [#allocation21], 1 }
0x176b   :  { %5001 = vsyncpa [#allocation24], 1 }
0x176c   :  { %5002 = vsyncpa [#allocation27], 1 }
0x176d   :  { %5003 = vsyncpa [#allocation30], 1 }
0x176e   :  { %5004 = vsyncpa [#allocation33], 1 }
0x176f   :  { %5005 = vsyncpa [#allocation4], 1 }

</bundles_post_ra>
